<compile_context>
chip_gen: v7x
topology: tpu7x:2x2x1
jax: 0.10.0
libtpu: 0.0.40
codegen_flags: <defaults>
</compile_context>

<pallas_src>
import functools

import jax
import jax.numpy as jnp
from jax.experimental import pallas as pl
from jax.experimental.pallas import tpu as pltpu


N_FILTERS = 32                     # out channels of each conv
KS = (3, 4, 5, 6)                  # conv kernel heights
K_MAX = max(KS)
N_FEAT = len(KS) * N_FILTERS       # 128 pooled features
N_EVENT_TYPES = 10                 # synthetic stand-in for len(EE_settings.event_types_full)


def _round_up(x, m):
    return ((x + m - 1) // m) * m


def _event_type_kernel(g_ref, w_ref, bconv_ref, mask_ref, wc_ref, bc_ref, out_ref,
                       *, n_taps, im2col, xlu_roll, compute_dtype):
    """One grid step == TB batch elements.

    g_ref:     (TB, C, H)   f32 input tile (cast to compute_dtype in-kernel)
    w_ref:     (6*H, 128)   fused conv weight        [im2col path]
               (6, H, 128)  fused per-tap weights    [per-tap path]
    bconv_ref: (1, 128)     fused conv bias (f32)
    mask_ref:  (C, 128)     0 / -inf conv-position validity mask (f32)
    wc_ref:    (128, NTp)   classifier weight, transposed + lane-padded (f32)
    bc_ref:    (1, NTp)     classifier bias, lane-padded (f32)
    out_ref:   (TB, NTp)    f32 logits (lane-dense)
    """
    tb, c, h = g_ref.shape
    n_feat = mask_ref.shape[1]
    g = g_ref[...]                                     # (TB, C, H) f32

    def shifted(dk):
        # Rows dk..dk+C-1 of each batch element, wrapping *inside* the element.
        # Wrapped rows only ever reach structurally-zero taps or -inf-masked
        # positions, so the wrap never changes the pooled result.
        if dk == 0:
            s = g
        elif xlu_roll:
            s = pltpu.roll(g, c - dk, axis=1)          # XLU sublane rotate
        else:
            s = jnp.roll(g, -dk, axis=1)               # two static slices + concat
        return s.astype(compute_dtype)

    if im2col:
        # One deep matmul: (TB*C, 6H) @ (6H, 128).
        lhs = jnp.concatenate([shifted(dk) for dk in range(n_taps)], axis=-1)
        acc = jnp.dot(lhs.reshape(tb * c, n_taps * h), w_ref[...],
                      preferred_element_type=jnp.float32)
    else:
        # Per-tap matmuls (contraction is already deep when hidden >= 256).
        acc = jnp.dot(shifted(0).reshape(tb * c, h), w_ref[0],
                      preferred_element_type=jnp.float32)
        for dk in range(1, n_taps):
            acc = acc + jnp.dot(shifted(dk).reshape(tb * c, h), w_ref[dk],
                                preferred_element_type=jnp.float32)

    # Mask invalid tail positions per 32-filter group, a single max over the
    # conv positions, conv bias added after the pool (max(x+b) == max(x)+b).
    acc = acc.reshape(tb, c, n_feat) + mask_ref[...][None, :, :]
    feat = jnp.max(acc, axis=1) + bconv_ref[...]                    # (TB, 128)

    logits = jnp.dot(feat, wc_ref[...], preferred_element_type=jnp.float32)
    out_ref[...] = (logits + bc_ref[...]).astype(out_ref.dtype)


def _vmem_capacity_bytes():
    try:
        return int(pltpu.get_tpu_info().vmem_capacity_bytes)
    except Exception:
        return 64 << 20           # conservative default (v7x per-TensorCore VMEM)


def _pick_block_batch(bsz, C, H, nt_pad, c_itemsize, im2col, vmem_budget, dual_core):
    """Batch-tile size: multiple of 8 (unmasked output stores), ~512-1024 matmul
    rows per step, ALL resident buffers budgeted against VMEM, and >= 4 grid
    steps on dual-TensorCore chips so each core keeps double-buffer overlap."""
    kh = K_MAX * H if im2col else H
    # Resident bytes per batch element in one grid step (G tile double-buffered,
    # im2col LHS / rolled temp / f32 accumulator / output tile included).
    per_elem = (C * H * 4 * 2 + C * kh * c_itemsize + C * H * 4
                + C * N_FEAT * 4 + nt_pad * 4 * 2)
    # Grid-invariant operands (at most 2 buffers each).
    fixed = (K_MAX * H * N_FEAT * c_itemsize * 2 + C * N_FEAT * 4 * 2
             + N_FEAT * nt_pad * 4 * 2 + (N_FEAT + nt_pad) * 4 * 4)
    tb_mem = max(1, (vmem_budget - fixed) // per_elem)
    tb_rows = max(8, _round_up(-(-768 // max(C, 1)), 8))     # ~512-1024 rows/step
    tb = min(bsz, tb_mem, tb_rows)
    if dual_core and bsz >= 32:
        tb = min(tb, -(-bsz // 4))       # >= 4 grid steps -> >= 2 per TensorCore
    if tb >= bsz:
        return bsz                        # single step, no partial block needed
    return max(8, (tb // 8) * 8)          # sublane-aligned (TB, NTp) output tile


def event_type_classifier_forward(G, params, *, compute_dtype=jnp.bfloat16,
                                  block_batch=None, im2col=None):
    """G: (bsz, C, hidden) float32. Returns (bsz, n_event_types) float32."""
    bsz, C, H = G.shape
    n_types = params["bc"].shape[0]
    assert C >= K_MAX, "sequence length must be >= largest conv kernel (6)"
    f32 = jnp.float32
    auto_path = im2col is None
    if auto_path:
        im2col = H < 256          # shallow-K per-tap matmuls underuse the MXU

    # ---- fused, lane-dense parameters (wrapper glue, not the hot path) ------
    w_blocks, b_blocks = [], []
    for k in KS:
        wk = jnp.transpose(params[f"w{k}"][:, 0], (1, 2, 0)).astype(f32)   # (k, H, 32)
        wk = jnp.pad(wk, ((0, K_MAX - k), (0, 0), (0, 0)))                 # (6, H, 32)
        w_blocks.append(wk)
        b_blocks.append(params[f"b{k}"].reshape(1, N_FILTERS).astype(f32))
    w_taps = jnp.concatenate(w_blocks, axis=2).astype(compute_dtype)       # (6, H, 128)
    b_all = jnp.concatenate(b_blocks, axis=1)                              # (1, 128)

    nt_pad = _round_up(n_types, 128)                                       # lane-dense out
    wc_pad = jnp.zeros((N_FEAT, nt_pad), f32).at[:, :n_types].set(
        params["wc"].T.astype(f32))
    bc_pad = jnp.zeros((1, nt_pad), f32).at[:, :n_types].set(
        params["bc"].reshape(1, -1).astype(f32))

    # 0 / -inf validity mask over all C conv positions (per 32-filter group).
    pos = jnp.arange(C, dtype=jnp.int32)[:, None]
    kcol = jnp.asarray([k for k in KS for _ in range(N_FILTERS)],
                       jnp.int32)[None, :]
    mask = jnp.where(pos <= (C - kcol), 0.0, -jnp.inf).astype(f32)         # (C, 128)

    # ---- batch tiling: no wrapper-side pad or cast pass over G --------------
    vmem_cap = _vmem_capacity_bytes()
    vmem_budget = min((vmem_cap // 4) * 3, 112 << 20)
    dual_core = vmem_cap <= (64 << 20)       # v7x-like: 64 MiB VMEM per TensorCore
    c_itemsize = jnp.dtype(compute_dtype).itemsize
    tb = block_batch if block_batch is not None else _pick_block_batch(
        bsz, C, H, nt_pad, c_itemsize, im2col, vmem_budget, dual_core)
    tb = max(1, min(int(tb), bsz))
    grid = -(-bsz // tb)
    G = G.astype(f32)

    def _run(use_im2col, xlu_roll, buffered):
        w = w_taps.reshape(K_MAX * H, N_FEAT) if use_im2col else w_taps
        kernel = functools.partial(
            _event_type_kernel, n_taps=K_MAX, im2col=use_im2col,
            xlu_roll=xlu_roll, compute_dtype=compute_dtype)

        def const_spec(shape):
            imap = (lambda b: (0, 0)) if len(shape) == 2 else (lambda b: (0, 0, 0))
            if buffered:     # DMA'd once; a single buffer halves their VMEM cost
                return pl.BlockSpec(shape, imap, pipeline_mode=pl.Buffered(1))
            return pl.BlockSpec(shape, imap)

        in_specs = [
            pl.BlockSpec((tb, C, H), lambda b: (b, 0, 0)),   # batch-tiled G (f32)
            const_spec(w.shape),                             # fused conv weight
            const_spec((1, N_FEAT)),                         # fused conv bias
            const_spec((C, N_FEAT)),                         # position mask
            const_spec((N_FEAT, nt_pad)),                    # classifier weight
            const_spec((1, nt_pad)),                         # classifier bias
        ]
        return pl.pallas_call(
            kernel,
            out_shape=jax.ShapeDtypeStruct((bsz, nt_pad), jnp.float32),
            grid_spec=pltpu.PrefetchScalarGridSpec(
                num_scalar_prefetch=0,
                grid=(grid,),
                in_specs=in_specs,
                out_specs=pl.BlockSpec((tb, nt_pad), lambda b: (b, 0)),
            ),
            compiler_params=pltpu.CompilerParams(
                dimension_semantics=("parallel",),
                vmem_limit_bytes=int(vmem_budget)),
        )(G, w, b_all, mask, wc_pad, bc_pad)

    # Try the fully optimized configuration first, then progressively drop
    # optional features (XLU roll, single-buffered constants, im2col fusion)
    # if this JAX / Mosaic build rejects one of them.
    attempts = [(im2col, True, True), (im2col, True, False),
                (im2col, False, True), (im2col, False, False)]
    if auto_path and im2col:
        attempts.append((False, False, False))
    err = None
    for cfg in attempts:
        try:
            out = _run(*cfg)
            break
        except Exception as e:   # noqa: BLE001 - feature-capability fallback
            err = e
    else:
        raise err
    return out[:, :n_types]


def make_params(key, hidden, n_types=N_EVENT_TYPES):
    """Deterministic synthetic parameters matching the module's shapes."""
    params = {}
    keys = jax.random.split(key, 2 * len(KS) + 1)
    for i, k in enumerate(KS):
        fan_in = 1 * k * hidden
        params[f"w{k}"] = jax.random.normal(
            keys[2 * i], (N_FILTERS, 1, k, hidden), jnp.float32) / jnp.sqrt(fan_in)
        params[f"b{k}"] = 0.01 * jax.random.normal(
            keys[2 * i + 1], (N_FILTERS,), jnp.float32)
    # classifier: xavier_uniform weight, zero bias (as in init_weights)
    limit = jnp.sqrt(6.0 / (N_FEAT + n_types))
    params["wc"] = jax.random.uniform(
        keys[-1], (n_types, N_FEAT), jnp.float32, -limit, limit)
    params["bc"] = jnp.zeros((n_types,), jnp.float32)
    return params


def reference_forward(G, params):
    """Pure-JAX reference replicating the PyTorch forward semantics (f32)."""
    bsz, C, H = G.shape
    outs = []
    for k in KS:
        w = params[f"w{k}"][:, 0]                 # (32, k, H)
        b = params[f"b{k}"]                       # (32,)
        L = C - k + 1
        patches = jnp.stack([G[:, t:t + k, :] for t in range(L)], axis=1)   # (B,L,k,H)
        conv = jnp.einsum("blkh,okh->bol", patches, w) + b[None, :, None]   # (B,32,L)
        outs.append(jnp.max(conv, axis=-1))       # (B, 32)
    feat = jnp.concatenate(outs, axis=-1)         # (B, 128)
    return feat @ params["wc"].T + params["bc"]


if __name__ == "__main__":
    bsz, C, hidden = 2, 16, 32
    key = jax.random.PRNGKey(0)
    k_g, k_p = jax.random.split(key)
    G = jax.random.normal(k_g, (bsz, C, hidden), jnp.float32)
    params = make_params(k_p, hidden)

    ref = reference_forward(G, params)

    # f32 compute, fused single-matmul (im2col) path: tight check vs reference.
    out_f32 = jax.block_until_ready(
        event_type_classifier_forward(G, params, compute_dtype=jnp.float32))
    assert out_f32.shape == (bsz, N_EVENT_TYPES)
    assert jnp.max(jnp.abs(out_f32 - ref)) < 1e-3, "f32 im2col kernel mismatch"

    # f32 compute, per-tap matmul path (selected automatically when hidden >= 256).
    out_tap = jax.block_until_ready(
        event_type_classifier_forward(G, params, compute_dtype=jnp.float32,
                                      im2col=False))
    assert jnp.max(jnp.abs(out_tap - ref)) < 1e-3, "f32 per-tap kernel mismatch"

    # Default path: bf16 matmuls with f32 accumulation / epilogue.
    out_bf16 = jax.block_until_ready(event_type_classifier_forward(G, params))
    assert out_bf16.shape == (bsz, N_EVENT_TYPES)
    assert jnp.max(jnp.abs(out_bf16 - ref)) < 5e-2, "bf16 kernel mismatch"

    # Multi-step grid with a partial final batch block (no wrapper-side padding).
    bsz2 = 20
    G2 = jax.random.normal(jax.random.fold_in(key, 7), (bsz2, C, hidden), jnp.float32)
    ref2 = reference_forward(G2, params)
    out_tiled = jax.block_until_ready(
        event_type_classifier_forward(G2, params, compute_dtype=jnp.float32,
                                      block_batch=8))
    assert out_tiled.shape == (bsz2, N_EVENT_TYPES)
    assert jnp.max(jnp.abs(out_tiled - ref2)) < 1e-3, "tiled kernel mismatch"

    print("KERNEL_OK")
</pallas_src>

<mosaic_0001>
module attributes {stable_mosaic.version = 11 : i64} {
  func.func @_event_type_kernel(%arg0: i32, %arg1: memref<2x16x32xf32, #tpu.memory_space<vmem>>, %arg2: memref<192x128xf32, #tpu.memory_space<vmem>>, %arg3: memref<1x128xf32, #tpu.memory_space<vmem>>, %arg4: memref<16x128xf32, #tpu.memory_space<vmem>>, %arg5: memref<128x128xf32, #tpu.memory_space<vmem>>, %arg6: memref<1x128xf32, #tpu.memory_space<vmem>>, %arg7: memref<2x128xf32, #tpu.memory_space<vmem>>) attributes {dimension_semantics = [#tpu.dimension_semantics<parallel>], iteration_bounds = array<i64: 1>, scalar_prefetch = 0 : i64, scratch_operands = 0 : i64, tpu.core_type = #tpu.core_type<tc>, window_params = [{transform_indices = @transform_0, window_bounds = array<i64: 2, 16, 32>}, {pipeline_mode = #tpu.pipeline_mode<synchronous>, transform_indices = @transform_1, window_bounds = array<i64: 192, 128>}, {pipeline_mode = #tpu.pipeline_mode<synchronous>, transform_indices = @transform_2, window_bounds = array<i64: 1, 128>}, {pipeline_mode = #tpu.pipeline_mode<synchronous>, transform_indices = @transform_3, window_bounds = array<i64: 16, 128>}, {pipeline_mode = #tpu.pipeline_mode<synchronous>, transform_indices = @transform_4, window_bounds = array<i64: 128, 128>}, {pipeline_mode = #tpu.pipeline_mode<synchronous>, transform_indices = @transform_5, window_bounds = array<i64: 1, 128>}, {transform_indices = @transform_6, window_bounds = array<i64: 2, 128>}]} {
    %c0 = arith.constant 0 : index
    %c0_0 = arith.constant 0 : index
    %c0_1 = arith.constant 0 : index
    %0 = vector.load %arg1[%c0, %c0_0, %c0_1] : memref<2x16x32xf32, #tpu.memory_space<vmem>>, vector<2x16x32xf32>
    %c15_i32 = arith.constant 15 : i32
    %1 = tpu.dynamic_rotate %0 by %c15_i32 dim 1 : vector<2x16x32xf32>, i32 -> vector<2x16x32xf32>
    %c14_i32 = arith.constant 14 : i32
    %2 = tpu.dynamic_rotate %0 by %c14_i32 dim 1 : vector<2x16x32xf32>, i32 -> vector<2x16x32xf32>
    %c13_i32 = arith.constant 13 : i32
    %3 = tpu.dynamic_rotate %0 by %c13_i32 dim 1 : vector<2x16x32xf32>, i32 -> vector<2x16x32xf32>
    %c12_i32 = arith.constant 12 : i32
    %4 = tpu.dynamic_rotate %0 by %c12_i32 dim 1 : vector<2x16x32xf32>, i32 -> vector<2x16x32xf32>
    %c11_i32 = arith.constant 11 : i32
    %5 = tpu.dynamic_rotate %0 by %c11_i32 dim 1 : vector<2x16x32xf32>, i32 -> vector<2x16x32xf32>
    %6 = tpu.concatenate %0, %1, %2, %3, %4, %5 in 2 : vector<2x16x32xf32>, vector<2x16x32xf32>, vector<2x16x32xf32>, vector<2x16x32xf32>, vector<2x16x32xf32>, vector<2x16x32xf32> -> vector<2x16x192xf32>
    %7 = vector.shape_cast %6 : vector<2x16x192xf32> to vector<32x192xf32>
    %c0_2 = arith.constant 0 : index
    %c0_3 = arith.constant 0 : index
    %8 = vector.load %arg2[%c0_2, %c0_3] : memref<192x128xf32, #tpu.memory_space<vmem>>, vector<192x128xf32>
    %cst = arith.constant dense<0.000000e+00> : vector<32x128xf32>
    %9 = tpu.matmul %7, %8, %cst {dimension_numbers = #tpu.dot_dimension_numbers<[1], [0], [0], [1], [0, 0, 1, 1], [], []>} : vector<32x192xf32>, vector<192x128xf32>, vector<32x128xf32> -> vector<32x128xf32>
    %10 = vector.shape_cast %9 : vector<32x128xf32> to vector<2x16x128xf32>
    %c0_4 = arith.constant 0 : index
    %c0_5 = arith.constant 0 : index
    %11 = vector.load %arg4[%c0_4, %c0_5] : memref<16x128xf32, #tpu.memory_space<vmem>>, vector<16x128xf32>
    %12 = vector.shape_cast %11 : vector<16x128xf32> to vector<1x16x128xf32>
    %13 = vector.broadcast %12 : vector<1x16x128xf32> to vector<2x16x128xf32>
    %14 = arith.addf %10, %13 : vector<2x16x128xf32>
    %cst_6 = arith.constant dense<0xFF800000> : vector<2x128xf32>
    %15 = vector.multi_reduction <maximumf>, %14, %cst_6 [1] : vector<2x16x128xf32> to vector<2x128xf32>
    %c0_7 = arith.constant 0 : index
    %c0_8 = arith.constant 0 : index
    %16 = vector.load %arg3[%c0_7, %c0_8] : memref<1x128xf32, #tpu.memory_space<vmem>>, vector<1x128xf32>
    %17 = vector.broadcast %16 : vector<1x128xf32> to vector<2x128xf32>
    %18 = arith.addf %15, %17 : vector<2x128xf32>
    %c0_9 = arith.constant 0 : index
    %c0_10 = arith.constant 0 : index
    %19 = vector.load %arg5[%c0_9, %c0_10] : memref<128x128xf32, #tpu.memory_space<vmem>>, vector<128x128xf32>
    %cst_11 = arith.constant dense<0.000000e+00> : vector<2x128xf32>
    %20 = tpu.matmul %18, %19, %cst_11 {dimension_numbers = #tpu.dot_dimension_numbers<[1], [0], [0], [1], [0, 0, 1, 1], [], []>} : vector<2x128xf32>, vector<128x128xf32>, vector<2x128xf32> -> vector<2x128xf32>
    %c0_12 = arith.constant 0 : index
    %c0_13 = arith.constant 0 : index
    %21 = vector.load %arg6[%c0_12, %c0_13] : memref<1x128xf32, #tpu.memory_space<vmem>>, vector<1x128xf32>
    %22 = vector.broadcast %21 : vector<1x128xf32> to vector<2x128xf32>
    %23 = arith.addf %20, %22 : vector<2x128xf32>
    %c0_14 = arith.constant 0 : index
    %c0_15 = arith.constant 0 : index
    %24 = vector.load %arg7[%c0_14, %c0_15] : memref<2x128xf32, #tpu.memory_space<vmem>>, vector<2x128xf32>
    tpu.vector_store %arg7[%c0_14, %c0_15], %23 {strides = array<i32>} : memref<2x128xf32, #tpu.memory_space<vmem>>, vector<2x128xf32>,
    return
  }
  func.func @transform_0(%arg0: i32) -> (i32, i32, i32) {
    %c0_i32 = arith.constant 0 : i32
    %c0_i32_0 = arith.constant 0 : i32
    %c0_i32_1 = arith.constant 0 : i32
    return %arg0, %c0_i32, %c0_i32_0 : i32, i32, i32
  }
  func.func @transform_1(%arg0: i32) -> (i32, i32) {
    %c0_i32 = arith.constant 0 : i32
    %c0_i32_0 = arith.constant 0 : i32
    %c0_i32_1 = arith.constant 0 : i32
    return %c0_i32, %c0_i32_0 : i32, i32
  }
  func.func @transform_2(%arg0: i32) -> (i32, i32) {
    %c0_i32 = arith.constant 0 : i32
    %c0_i32_0 = arith.constant 0 : i32
    %c0_i32_1 = arith.constant 0 : i32
    return %c0_i32, %c0_i32_0 : i32, i32
  }
  func.func @transform_3(%arg0: i32) -> (i32, i32) {
    %c0_i32 = arith.constant 0 : i32
    %c0_i32_0 = arith.constant 0 : i32
    %c0_i32_1 = arith.constant 0 : i32
    return %c0_i32, %c0_i32_0 : i32, i32
  }
  func.func @transform_4(%arg0: i32) -> (i32, i32) {
    %c0_i32 = arith.constant 0 : i32
    %c0_i32_0 = arith.constant 0 : i32
    %c0_i32_1 = arith.constant 0 : i32
    return %c0_i32, %c0_i32_0 : i32, i32
  }
  func.func @transform_5(%arg0: i32) -> (i32, i32) {
    %c0_i32 = arith.constant 0 : i32
    %c0_i32_0 = arith.constant 0 : i32
    %c0_i32_1 = arith.constant 0 : i32
    return %c0_i32, %c0_i32_0 : i32, i32
  }
  func.func @transform_6(%arg0: i32) -> (i32, i32) {
    %c0_i32 = arith.constant 0 : i32
    %c0_i32_0 = arith.constant 0 : i32
    return %arg0, %c0_i32 : i32, i32
  }
}

module attributes {stable_mosaic.version = 11 : i64} {
  func.func @_event_type_kernel(%arg0: i32, %arg1: memref<2x16x32xf32, #tpu.memory_space<vmem>>, %arg2: memref<192x128xf32, #tpu.memory_space<vmem>>, %arg3: memref<1x128xf32, #tpu.memory_space<vmem>>, %arg4: memref<16x128xf32, #tpu.memory_space<vmem>>, %arg5: memref<128x128xf32, #tpu.memory_space<vmem>>, %arg6: memref<1x128xf32, #tpu.memory_space<vmem>>, %arg7: memref<2x128xf32, #tpu.memory_space<vmem>>) attributes {dimension_semantics = [#tpu.dimension_semantics<parallel>], iteration_bounds = array<i64: 1>, scalar_prefetch = 0 : i64, scratch_operands = 0 : i64, tpu.core_type = #tpu.core_type<tc>, window_params = [{transform_indices = @transform_0, window_bounds = array<i64: 2, 16, 32>}, {pipeline_mode = #tpu.pipeline_mode<synchronous>, transform_indices = @transform_1, window_bounds = array<i64: 192, 128>}, {pipeline_mode = #tpu.pipeline_mode<synchronous>, transform_indices = @transform_2, window_bounds = array<i64: 1, 128>}, {pipeline_mode = #tpu.pipeline_mode<synchronous>, transform_indices = @transform_3, window_bounds = array<i64: 16, 128>}, {pipeline_mode = #tpu.pipeline_mode<synchronous>, transform_indices = @transform_4, window_bounds = array<i64: 128, 128>}, {pipeline_mode = #tpu.pipeline_mode<synchronous>, transform_indices = @transform_5, window_bounds = array<i64: 1, 128>}, {transform_indices = @transform_6, window_bounds = array<i64: 2, 128>}]} {
    %c0 = arith.constant 0 : index
    %c0_0 = arith.constant 0 : index
    %c0_1 = arith.constant 0 : index
    %0 = vector.load %arg1[%c0, %c0_0, %c0_1] : memref<2x16x32xf32, #tpu.memory_space<vmem>>, vector<2x16x32xf32>
    %c15_i32 = arith.constant 15 : i32
    %1 = tpu.dynamic_rotate %0 by %c15_i32 dim 1 : vector<2x16x32xf32>, i32 -> vector<2x16x32xf32>
    %c14_i32 = arith.constant 14 : i32
    %2 = tpu.dynamic_rotate %0 by %c14_i32 dim 1 : vector<2x16x32xf32>, i32 -> vector<2x16x32xf32>
    %c13_i32 = arith.constant 13 : i32
    %3 = tpu.dynamic_rotate %0 by %c13_i32 dim 1 : vector<2x16x32xf32>, i32 -> vector<2x16x32xf32>
    %c12_i32 = arith.constant 12 : i32
    %4 = tpu.dynamic_rotate %0 by %c12_i32 dim 1 : vector<2x16x32xf32>, i32 -> vector<2x16x32xf32>
    %c11_i32 = arith.constant 11 : i32
    %5 = tpu.dynamic_rotate %0 by %c11_i32 dim 1 : vector<2x16x32xf32>, i32 -> vector<2x16x32xf32>
    %6 = tpu.concatenate %0, %1, %2, %3, %4, %5 in 2 : vector<2x16x32xf32>, vector<2x16x32xf32>, vector<2x16x32xf32>, vector<2x16x32xf32>, vector<2x16x32xf32>, vector<2x16x32xf32> -> vector<2x16x192xf32>
    %7 = vector.shape_cast %6 : vector<2x16x192xf32> to vector<32x192xf32>
    %c0_2 = arith.constant 0 : index
    %c0_3 = arith.constant 0 : index
    %8 = vector.load %arg2[%c0_2, %c0_3] : memref<192x128xf32, #tpu.memory_space<vmem>>, vector<192x128xf32>
    %cst = arith.constant dense<0.000000e+00> : vector<32x128xf32>
    %9 = tpu.matmul %7, %8, %cst {dimension_numbers = #tpu.dot_dimension_numbers<[1], [0], [0], [1], [0, 0, 1, 1], [], []>} : vector<32x192xf32>, vector<192x128xf32>, vector<32x128xf32> -> vector<32x128xf32>
    %10 = vector.shape_cast %9 : vector<32x128xf32> to vector<2x16x128xf32>
    %c0_4 = arith.constant 0 : index
    %c0_5 = arith.constant 0 : index
    %11 = vector.load %arg4[%c0_4, %c0_5] : memref<16x128xf32, #tpu.memory_space<vmem>>, vector<16x128xf32>
    %12 = vector.shape_cast %11 : vector<16x128xf32> to vector<1x16x128xf32>
    %13 = vector.broadcast %12 : vector<1x16x128xf32> to vector<2x16x128xf32>
    %14 = arith.addf %10, %13 : vector<2x16x128xf32>
    %cst_6 = arith.constant dense<0xFF800000> : vector<2x128xf32>
    %15 = vector.multi_reduction <maximumf>, %14, %cst_6 [1] : vector<2x16x128xf32> to vector<2x128xf32>
    %c0_7 = arith.constant 0 : index
    %c0_8 = arith.constant 0 : index
    %16 = vector.load %arg3[%c0_7, %c0_8] : memref<1x128xf32, #tpu.memory_space<vmem>>, vector<1x128xf32>
    %17 = vector.broadcast %16 : vector<1x128xf32> to vector<2x128xf32>
    %18 = arith.addf %15, %17 : vector<2x128xf32>
    %c0_9 = arith.constant 0 : index
    %c0_10 = arith.constant 0 : index
    %19 = vector.load %arg5[%c0_9, %c0_10] : memref<128x128xf32, #tpu.memory_space<vmem>>, vector<128x128xf32>
    %cst_11 = arith.constant dense<0.000000e+00> : vector<2x128xf32>
    %20 = tpu.matmul %18, %19, %cst_11 {dimension_numbers = #tpu.dot_dimension_numbers<[1], [0], [0], [1], [0, 0, 1, 1], [], []>} : vector<2x128xf32>, vector<128x128xf32>, vector<2x128xf32> -> vector<2x128xf32>
    %c0_12 = arith.constant 0 : index
    %c0_13 = arith.constant 0 : index
    %21 = vector.load %arg6[%c0_12, %c0_13] : memref<1x128xf32, #tpu.memory_space<vmem>>, vector<1x128xf32>
    %22 = vector.broadcast %21 : vector<1x128xf32> to vector<2x128xf32>
    %23 = arith.addf %20, %22 : vector<2x128xf32>
    %c0_14 = arith.constant 0 : index
    %c0_15 = arith.constant 0 : index
    %24 = vector.load %arg7[%c0_14, %c0_15] : memref<2x128xf32, #tpu.memory_space<vmem>>, vector<2x128xf32>
    tpu.vector_store %arg7[%c0_14, %c0_15], %23 {strides = array<i32>} : memref<2x128xf32, #tpu.memory_space<vmem>>, vector<2x128xf32>,
    return
  }
  func.func @transform_0(%arg0: i32) -> (i32, i32, i32) {
    %c0_i32 = arith.constant 0 : i32
    %c0_i32_0 = arith.constant 0 : i32
    %c0_i32_1 = arith.constant 0 : i32
    return %arg0, %c0_i32, %c0_i32_0 : i32, i32, i32
  }
  func.func @transform_1(%arg0: i32) -> (i32, i32) {
    %c0_i32 = arith.constant 0 : i32
    %c0_i32_0 = arith.constant 0 : i32
    %c0_i32_1 = arith.constant 0 : i32
    return %c0_i32, %c0_i32_0 : i32, i32
  }
  func.func @transform_2(%arg0: i32) -> (i32, i32) {
    %c0_i32 = arith.constant 0 : i32
    %c0_i32_0 = arith.constant 0 : i32
    %c0_i32_1 = arith.constant 0 : i32
    return %c0_i32, %c0_i32_0 : i32, i32
  }
  func.func @transform_3(%arg0: i32) -> (i32, i32) {
    %c0_i32 = arith.constant 0 : i32
    %c0_i32_0 = arith.constant 0 : i32
    %c0_i32_1 = arith.constant 0 : i32
    return %c0_i32, %c0_i32_0 : i32, i32
  }
  func.func @transform_4(%arg0: i32) -> (i32, i32) {
    %c0_i32 = arith.constant 0 : i32
    %c0_i32_0 = arith.constant 0 : i32
    %c0_i32_1 = arith.constant 0 : i32
    return %c0_i32, %c0_i32_0 : i32, i32
  }
  func.func @transform_5(%arg0: i32) -> (i32, i32) {
    %c0_i32 = arith.constant 0 : i32
    %c0_i32_0 = arith.constant 0 : i32
    %c0_i32_1 = arith.constant 0 : i32
    return %c0_i32, %c0_i32_0 : i32, i32
  }
  func.func @transform_6(%arg0: i32) -> (i32, i32) {
    %c0_i32 = arith.constant 0 : i32
    %c0_i32_0 = arith.constant 0 : i32
    return %arg0, %c0_i32 : i32, i32
  }
}

module attributes {stable_mosaic.version = 11 : i64} {
  func.func @_event_type_kernel(%arg0: i32, %arg1: memref<2x16x32xf32, #tpu.memory_space<vmem>>, %arg2: memref<192x128xf32, #tpu.memory_space<vmem>>, %arg3: memref<1x128xf32, #tpu.memory_space<vmem>>, %arg4: memref<16x128xf32, #tpu.memory_space<vmem>>, %arg5: memref<128x128xf32, #tpu.memory_space<vmem>>, %arg6: memref<1x128xf32, #tpu.memory_space<vmem>>, %arg7: memref<2x128xf32, #tpu.memory_space<vmem>>) attributes {dimension_semantics = [#tpu.dimension_semantics<parallel>], iteration_bounds = array<i64: 1>, scalar_prefetch = 0 : i64, scratch_operands = 0 : i64, tpu.core_type = #tpu.core_type<tc>, window_params = [{transform_indices = @transform_0, window_bounds = array<i64: 2, 16, 32>}, {pipeline_mode = #tpu.pipeline_mode<synchronous>, transform_indices = @transform_1, window_bounds = array<i64: 192, 128>}, {pipeline_mode = #tpu.pipeline_mode<synchronous>, transform_indices = @transform_2, window_bounds = array<i64: 1, 128>}, {pipeline_mode = #tpu.pipeline_mode<synchronous>, transform_indices = @transform_3, window_bounds = array<i64: 16, 128>}, {pipeline_mode = #tpu.pipeline_mode<synchronous>, transform_indices = @transform_4, window_bounds = array<i64: 128, 128>}, {pipeline_mode = #tpu.pipeline_mode<synchronous>, transform_indices = @transform_5, window_bounds = array<i64: 1, 128>}, {transform_indices = @transform_6, window_bounds = array<i64: 2, 128>}]} {
    %c0 = arith.constant 0 : index
    %c0_0 = arith.constant 0 : index
    %c0_1 = arith.constant 0 : index
    %0 = vector.load %arg1[%c0, %c0_0, %c0_1] : memref<2x16x32xf32, #tpu.memory_space<vmem>>, vector<2x16x32xf32>
    %1 = vector.extract_strided_slice %0 {offsets = [0, 1, 0], sizes = [2, 15, 32], strides = [1, 1, 1]} : vector<2x16x32xf32> to vector<2x15x32xf32>
    %2 = vector.extract_strided_slice %0 {offsets = [0, 0, 0], sizes = [2, 1, 32], strides = [1, 1, 1]} : vector<2x16x32xf32> to vector<2x1x32xf32>
    %3 = tpu.concatenate %1, %2 in 1 : vector<2x15x32xf32>, vector<2x1x32xf32> -> vector<2x16x32xf32>
    %4 = vector.extract_strided_slice %0 {offsets = [0, 2, 0], sizes = [2, 14, 32], strides = [1, 1, 1]} : vector<2x16x32xf32> to vector<2x14x32xf32>
    %5 = vector.extract_strided_slice %0 {offsets = [0, 0, 0], sizes = [2, 2, 32], strides = [1, 1, 1]} : vector<2x16x32xf32> to vector<2x2x32xf32>
    %6 = tpu.concatenate %4, %5 in 1 : vector<2x14x32xf32>, vector<2x2x32xf32> -> vector<2x16x32xf32>
    %7 = vector.extract_strided_slice %0 {offsets = [0, 3, 0], sizes = [2, 13, 32], strides = [1, 1, 1]} : vector<2x16x32xf32> to vector<2x13x32xf32>
    %8 = vector.extract_strided_slice %0 {offsets = [0, 0, 0], sizes = [2, 3, 32], strides = [1, 1, 1]} : vector<2x16x32xf32> to vector<2x3x32xf32>
    %9 = tpu.concatenate %7, %8 in 1 : vector<2x13x32xf32>, vector<2x3x32xf32> -> vector<2x16x32xf32>
    %10 = vector.extract_strided_slice %0 {offsets = [0, 4, 0], sizes = [2, 12, 32], strides = [1, 1, 1]} : vector<2x16x32xf32> to vector<2x12x32xf32>
    %11 = vector.extract_strided_slice %0 {offsets = [0, 0, 0], sizes = [2, 4, 32], strides = [1, 1, 1]} : vector<2x16x32xf32> to vector<2x4x32xf32>
    %12 = tpu.concatenate %10, %11 in 1 : vector<2x12x32xf32>, vector<2x4x32xf32> -> vector<2x16x32xf32>
    %13 = vector.extract_strided_slice %0 {offsets = [0, 5, 0], sizes = [2, 11, 32], strides = [1, 1, 1]} : vector<2x16x32xf32> to vector<2x11x32xf32>
    %14 = vector.extract_strided_slice %0 {offsets = [0, 0, 0], sizes = [2, 5, 32], strides = [1, 1, 1]} : vector<2x16x32xf32> to vector<2x5x32xf32>
    %15 = tpu.concatenate %13, %14 in 1 : vector<2x11x32xf32>, vector<2x5x32xf32> -> vector<2x16x32xf32>
    %16 = tpu.concatenate %0, %3, %6, %9, %12, %15 in 2 : vector<2x16x32xf32>, vector<2x16x32xf32>, vector<2x16x32xf32>, vector<2x16x32xf32>, vector<2x16x32xf32>, vector<2x16x32xf32> -> vector<2x16x192xf32>
    %17 = vector.shape_cast %16 : vector<2x16x192xf32> to vector<32x192xf32>
    %c0_2 = arith.constant 0 : index
    %c0_3 = arith.constant 0 : index
    %18 = vector.load %arg2[%c0_2, %c0_3] : memref<192x128xf32, #tpu.memory_space<vmem>>, vector<192x128xf32>
    %cst = arith.constant dense<0.000000e+00> : vector<32x128xf32>
    %19 = tpu.matmul %17, %18, %cst {dimension_numbers = #tpu.dot_dimension_numbers<[1], [0], [0], [1], [0, 0, 1, 1], [], []>} : vector<32x192xf32>, vector<192x128xf32>, vector<32x128xf32> -> vector<32x128xf32>
    %20 = vector.shape_cast %19 : vector<32x128xf32> to vector<2x16x128xf32>
    %c0_4 = arith.constant 0 : index
    %c0_5 = arith.constant 0 : index
    %21 = vector.load %arg4[%c0_4, %c0_5] : memref<16x128xf32, #tpu.memory_space<vmem>>, vector<16x128xf32>
    %22 = vector.shape_cast %21 : vector<16x128xf32> to vector<1x16x128xf32>
    %23 = vector.broadcast %22 : vector<1x16x128xf32> to vector<2x16x128xf32>
    %24 = arith.addf %20, %23 : vector<2x16x128xf32>
    %cst_6 = arith.constant dense<0xFF800000> : vector<2x128xf32>
    %25 = vector.multi_reduction <maximumf>, %24, %cst_6 [1] : vector<2x16x128xf32> to vector<2x128xf32>
    %c0_7 = arith.constant 0 : index
    %c0_8 = arith.constant 0 : index
    %26 = vector.load %arg3[%c0_7, %c0_8] : memref<1x128xf32, #tpu.memory_space<vmem>>, vector<1x128xf32>
    %27 = vector.broadcast %26 : vector<1x128xf32> to vector<2x128xf32>
    %28 = arith.addf %25, %27 : vector<2x128xf32>
    %c0_9 = arith.constant 0 : index
    %c0_10 = arith.constant 0 : index
    %29 = vector.load %arg5[%c0_9, %c0_10] : memref<128x128xf32, #tpu.memory_space<vmem>>, vector<128x128xf32>
    %cst_11 = arith.constant dense<0.000000e+00> : vector<2x128xf32>
    %30 = tpu.matmul %28, %29, %cst_11 {dimension_numbers = #tpu.dot_dimension_numbers<[1], [0], [0], [1], [0, 0, 1, 1], [], []>} : vector<2x128xf32>, vector<128x128xf32>, vector<2x128xf32> -> vector<2x128xf32>
    %c0_12 = arith.constant 0 : index
    %c0_13 = arith.constant 0 : index
    %31 = vector.load %arg6[%c0_12, %c0_13] : memref<1x128xf32, #tpu.memory_space<vmem>>, vector<1x128xf32>
    %32 = vector.broadcast %31 : vector<1x128xf32> to vector<2x128xf32>
    %33 = arith.addf %30, %32 : vector<2x128xf32>
    %c0_14 = arith.constant 0 : index
    %c0_15 = arith.constant 0 : index
    %34 = vector.load %arg7[%c0_14, %c0_15] : memref<2x128xf32, #tpu.memory_space<vmem>>, vector<2x128xf32>
    tpu.vector_store %arg7[%c0_14, %c0_15], %33 {strides = array<i32>} : memref<2x128xf32, #tpu.memory_space<vmem>>, vector<2x128xf32>,
    return
  }
  func.func @transform_0(%arg0: i32) -> (i32, i32, i32) {
    %c0_i32 = arith.constant 0 : i32
    %c0_i32_0 = arith.constant 0 : i32
    %c0_i32_1 = arith.constant 0 : i32
    return %arg0, %c0_i32, %c0_i32_0 : i32, i32, i32
  }
  func.func @transform_1(%arg0: i32) -> (i32, i32) {
    %c0_i32 = arith.constant 0 : i32
    %c0_i32_0 = arith.constant 0 : i32
    %c0_i32_1 = arith.constant 0 : i32
    return %c0_i32, %c0_i32_0 : i32, i32
  }
  func.func @transform_2(%arg0: i32) -> (i32, i32) {
    %c0_i32 = arith.constant 0 : i32
    %c0_i32_0 = arith.constant 0 : i32
    %c0_i32_1 = arith.constant 0 : i32
    return %c0_i32, %c0_i32_0 : i32, i32
  }
  func.func @transform_3(%arg0: i32) -> (i32, i32) {
    %c0_i32 = arith.constant 0 : i32
    %c0_i32_0 = arith.constant 0 : i32
    %c0_i32_1 = arith.constant 0 : i32
    return %c0_i32, %c0_i32_0 : i32, i32
  }
  func.func @transform_4(%arg0: i32) -> (i32, i32) {
    %c0_i32 = arith.constant 0 : i32
    %c0_i32_0 = arith.constant 0 : i32
    %c0_i32_1 = arith.constant 0 : i32
    return %c0_i32, %c0_i32_0 : i32, i32
  }
  func.func @transform_5(%arg0: i32) -> (i32, i32) {
    %c0_i32 = arith.constant 0 : i32
    %c0_i32_0 = arith.constant 0 : i32
    %c0_i32_1 = arith.constant 0 : i32
    return %c0_i32, %c0_i32_0 : i32, i32
  }
  func.func @transform_6(%arg0: i32) -> (i32, i32) {
    %c0_i32 = arith.constant 0 : i32
    %c0_i32_0 = arith.constant 0 : i32
    return %arg0, %c0_i32 : i32, i32
  }
}

module attributes {stable_mosaic.version = 11 : i64} {
  func.func @_event_type_kernel(%arg0: i32, %arg1: memref<2x16x32xf32, #tpu.memory_space<vmem>>, %arg2: memref<192x128xf32, #tpu.memory_space<vmem>>, %arg3: memref<1x128xf32, #tpu.memory_space<vmem>>, %arg4: memref<16x128xf32, #tpu.memory_space<vmem>>, %arg5: memref<128x128xf32, #tpu.memory_space<vmem>>, %arg6: memref<1x128xf32, #tpu.memory_space<vmem>>, %arg7: memref<2x128xf32, #tpu.memory_space<vmem>>) attributes {dimension_semantics = [#tpu.dimension_semantics<parallel>], iteration_bounds = array<i64: 1>, scalar_prefetch = 0 : i64, scratch_operands = 0 : i64, tpu.core_type = #tpu.core_type<tc>, window_params = [{transform_indices = @transform_0, window_bounds = array<i64: 2, 16, 32>}, {pipeline_mode = #tpu.pipeline_mode<synchronous>, transform_indices = @transform_1, window_bounds = array<i64: 192, 128>}, {pipeline_mode = #tpu.pipeline_mode<synchronous>, transform_indices = @transform_2, window_bounds = array<i64: 1, 128>}, {pipeline_mode = #tpu.pipeline_mode<synchronous>, transform_indices = @transform_3, window_bounds = array<i64: 16, 128>}, {pipeline_mode = #tpu.pipeline_mode<synchronous>, transform_indices = @transform_4, window_bounds = array<i64: 128, 128>}, {pipeline_mode = #tpu.pipeline_mode<synchronous>, transform_indices = @transform_5, window_bounds = array<i64: 1, 128>}, {transform_indices = @transform_6, window_bounds = array<i64: 2, 128>}]} {
    %c0 = arith.constant 0 : index
    %c0_0 = arith.constant 0 : index
    %c0_1 = arith.constant 0 : index
    %0 = vector.load %arg1[%c0, %c0_0, %c0_1] : memref<2x16x32xf32, #tpu.memory_space<vmem>>, vector<2x16x32xf32>
    %1 = vector.extract_strided_slice %0 {offsets = [0, 1, 0], sizes = [2, 15, 32], strides = [1, 1, 1]} : vector<2x16x32xf32> to vector<2x15x32xf32>
    %2 = vector.extract_strided_slice %0 {offsets = [0, 0, 0], sizes = [2, 1, 32], strides = [1, 1, 1]} : vector<2x16x32xf32> to vector<2x1x32xf32>
    %3 = tpu.concatenate %1, %2 in 1 : vector<2x15x32xf32>, vector<2x1x32xf32> -> vector<2x16x32xf32>
    %4 = vector.extract_strided_slice %0 {offsets = [0, 2, 0], sizes = [2, 14, 32], strides = [1, 1, 1]} : vector<2x16x32xf32> to vector<2x14x32xf32>
    %5 = vector.extract_strided_slice %0 {offsets = [0, 0, 0], sizes = [2, 2, 32], strides = [1, 1, 1]} : vector<2x16x32xf32> to vector<2x2x32xf32>
    %6 = tpu.concatenate %4, %5 in 1 : vector<2x14x32xf32>, vector<2x2x32xf32> -> vector<2x16x32xf32>
    %7 = vector.extract_strided_slice %0 {offsets = [0, 3, 0], sizes = [2, 13, 32], strides = [1, 1, 1]} : vector<2x16x32xf32> to vector<2x13x32xf32>
    %8 = vector.extract_strided_slice %0 {offsets = [0, 0, 0], sizes = [2, 3, 32], strides = [1, 1, 1]} : vector<2x16x32xf32> to vector<2x3x32xf32>
    %9 = tpu.concatenate %7, %8 in 1 : vector<2x13x32xf32>, vector<2x3x32xf32> -> vector<2x16x32xf32>
    %10 = vector.extract_strided_slice %0 {offsets = [0, 4, 0], sizes = [2, 12, 32], strides = [1, 1, 1]} : vector<2x16x32xf32> to vector<2x12x32xf32>
    %11 = vector.extract_strided_slice %0 {offsets = [0, 0, 0], sizes = [2, 4, 32], strides = [1, 1, 1]} : vector<2x16x32xf32> to vector<2x4x32xf32>
    %12 = tpu.concatenate %10, %11 in 1 : vector<2x12x32xf32>, vector<2x4x32xf32> -> vector<2x16x32xf32>
    %13 = vector.extract_strided_slice %0 {offsets = [0, 5, 0], sizes = [2, 11, 32], strides = [1, 1, 1]} : vector<2x16x32xf32> to vector<2x11x32xf32>
    %14 = vector.extract_strided_slice %0 {offsets = [0, 0, 0], sizes = [2, 5, 32], strides = [1, 1, 1]} : vector<2x16x32xf32> to vector<2x5x32xf32>
    %15 = tpu.concatenate %13, %14 in 1 : vector<2x11x32xf32>, vector<2x5x32xf32> -> vector<2x16x32xf32>
    %16 = tpu.concatenate %0, %3, %6, %9, %12, %15 in 2 : vector<2x16x32xf32>, vector<2x16x32xf32>, vector<2x16x32xf32>, vector<2x16x32xf32>, vector<2x16x32xf32>, vector<2x16x32xf32> -> vector<2x16x192xf32>
    %17 = vector.shape_cast %16 : vector<2x16x192xf32> to vector<32x192xf32>
    %c0_2 = arith.constant 0 : index
    %c0_3 = arith.constant 0 : index
    %18 = vector.load %arg2[%c0_2, %c0_3] : memref<192x128xf32, #tpu.memory_space<vmem>>, vector<192x128xf32>
    %cst = arith.constant dense<0.000000e+00> : vector<32x128xf32>
    %19 = tpu.matmul %17, %18, %cst {dimension_numbers = #tpu.dot_dimension_numbers<[1], [0], [0], [1], [0, 0, 1, 1], [], []>} : vector<32x192xf32>, vector<192x128xf32>, vector<32x128xf32> -> vector<32x128xf32>
    %20 = vector.shape_cast %19 : vector<32x128xf32> to vector<2x16x128xf32>
    %c0_4 = arith.constant 0 : index
    %c0_5 = arith.constant 0 : index
    %21 = vector.load %arg4[%c0_4, %c0_5] : memref<16x128xf32, #tpu.memory_space<vmem>>, vector<16x128xf32>
    %22 = vector.shape_cast %21 : vector<16x128xf32> to vector<1x16x128xf32>
    %23 = vector.broadcast %22 : vector<1x16x128xf32> to vector<2x16x128xf32>
    %24 = arith.addf %20, %23 : vector<2x16x128xf32>
    %cst_6 = arith.constant dense<0xFF800000> : vector<2x128xf32>
    %25 = vector.multi_reduction <maximumf>, %24, %cst_6 [1] : vector<2x16x128xf32> to vector<2x128xf32>
    %c0_7 = arith.constant 0 : index
    %c0_8 = arith.constant 0 : index
    %26 = vector.load %arg3[%c0_7, %c0_8] : memref<1x128xf32, #tpu.memory_space<vmem>>, vector<1x128xf32>
    %27 = vector.broadcast %26 : vector<1x128xf32> to vector<2x128xf32>
    %28 = arith.addf %25, %27 : vector<2x128xf32>
    %c0_9 = arith.constant 0 : index
    %c0_10 = arith.constant 0 : index
    %29 = vector.load %arg5[%c0_9, %c0_10] : memref<128x128xf32, #tpu.memory_space<vmem>>, vector<128x128xf32>
    %cst_11 = arith.constant dense<0.000000e+00> : vector<2x128xf32>
    %30 = tpu.matmul %28, %29, %cst_11 {dimension_numbers = #tpu.dot_dimension_numbers<[1], [0], [0], [1], [0, 0, 1, 1], [], []>} : vector<2x128xf32>, vector<128x128xf32>, vector<2x128xf32> -> vector<2x128xf32>
    %c0_12 = arith.constant 0 : index
    %c0_13 = arith.constant 0 : index
    %31 = vector.load %arg6[%c0_12, %c0_13] : memref<1x128xf32, #tpu.memory_space<vmem>>, vector<1x128xf32>
    %32 = vector.broadcast %31 : vector<1x128xf32> to vector<2x128xf32>
    %33 = arith.addf %30, %32 : vector<2x128xf32>
    %c0_14 = arith.constant 0 : index
    %c0_15 = arith.constant 0 : index
    %34 = vector.load %arg7[%c0_14, %c0_15] : memref<2x128xf32, #tpu.memory_space<vmem>>, vector<2x128xf32>
    tpu.vector_store %arg7[%c0_14, %c0_15], %33 {strides = array<i32>} : memref<2x128xf32, #tpu.memory_space<vmem>>, vector<2x128xf32>,
    return
  }
  func.func @transform_0(%arg0: i32) -> (i32, i32, i32) {
    %c0_i32 = arith.constant 0 : i32
    %c0_i32_0 = arith.constant 0 : i32
    %c0_i32_1 = arith.constant 0 : i32
    return %arg0, %c0_i32, %c0_i32_0 : i32, i32, i32
  }
  func.func @transform_1(%arg0: i32) -> (i32, i32) {
    %c0_i32 = arith.constant 0 : i32
    %c0_i32_0 = arith.constant 0 : i32
    %c0_i32_1 = arith.constant 0 : i32
    return %c0_i32, %c0_i32_0 : i32, i32
  }
  func.func @transform_2(%arg0: i32) -> (i32, i32) {
    %c0_i32 = arith.constant 0 : i32
    %c0_i32_0 = arith.constant 0 : i32
    %c0_i32_1 = arith.constant 0 : i32
    return %c0_i32, %c0_i32_0 : i32, i32
  }
  func.func @transform_3(%arg0: i32) -> (i32, i32) {
    %c0_i32 = arith.constant 0 : i32
    %c0_i32_0 = arith.constant 0 : i32
    %c0_i32_1 = arith.constant 0 : i32
    return %c0_i32, %c0_i32_0 : i32, i32
  }
  func.func @transform_4(%arg0: i32) -> (i32, i32) {
    %c0_i32 = arith.constant 0 : i32
    %c0_i32_0 = arith.constant 0 : i32
    %c0_i32_1 = arith.constant 0 : i32
    return %c0_i32, %c0_i32_0 : i32, i32
  }
  func.func @transform_5(%arg0: i32) -> (i32, i32) {
    %c0_i32 = arith.constant 0 : i32
    %c0_i32_0 = arith.constant 0 : i32
    %c0_i32_1 = arith.constant 0 : i32
    return %c0_i32, %c0_i32_0 : i32, i32
  }
  func.func @transform_6(%arg0: i32) -> (i32, i32) {
    %c0_i32 = arith.constant 0 : i32
    %c0_i32_0 = arith.constant 0 : i32
    return %arg0, %c0_i32 : i32, i32
  }
}

module attributes {stable_mosaic.version = 11 : i64} {
  func.func @_event_type_kernel(%arg0: i32, %arg1: memref<2x16x32xf32, #tpu.memory_space<vmem>>, %arg2: memref<6x32x128xf32, #tpu.memory_space<vmem>>, %arg3: memref<1x128xf32, #tpu.memory_space<vmem>>, %arg4: memref<16x128xf32, #tpu.memory_space<vmem>>, %arg5: memref<128x128xf32, #tpu.memory_space<vmem>>, %arg6: memref<1x128xf32, #tpu.memory_space<vmem>>, %arg7: memref<2x128xf32, #tpu.memory_space<vmem>>) attributes {dimension_semantics = [#tpu.dimension_semantics<parallel>], iteration_bounds = array<i64: 1>, scalar_prefetch = 0 : i64, scratch_operands = 0 : i64, tpu.core_type = #tpu.core_type<tc>, window_params = [{transform_indices = @transform_0, window_bounds = array<i64: 2, 16, 32>}, {pipeline_mode = #tpu.pipeline_mode<synchronous>, transform_indices = @transform_1, window_bounds = array<i64: 6, 32, 128>}, {pipeline_mode = #tpu.pipeline_mode<synchronous>, transform_indices = @transform_2, window_bounds = array<i64: 1, 128>}, {pipeline_mode = #tpu.pipeline_mode<synchronous>, transform_indices = @transform_3, window_bounds = array<i64: 16, 128>}, {pipeline_mode = #tpu.pipeline_mode<synchronous>, transform_indices = @transform_4, window_bounds = array<i64: 128, 128>}, {pipeline_mode = #tpu.pipeline_mode<synchronous>, transform_indices = @transform_5, window_bounds = array<i64: 1, 128>}, {transform_indices = @transform_6, window_bounds = array<i64: 2, 128>}]} {
    %c0 = arith.constant 0 : index
    %c0_0 = arith.constant 0 : index
    %c0_1 = arith.constant 0 : index
    %0 = vector.load %arg1[%c0, %c0_0, %c0_1] : memref<2x16x32xf32, #tpu.memory_space<vmem>>, vector<2x16x32xf32>
    %1 = vector.shape_cast %0 : vector<2x16x32xf32> to vector<32x32xf32>
    %c0_2 = arith.constant 0 : index
    %c0_3 = arith.constant 0 : index
    %c0_4 = arith.constant 0 : index
    %2 = vector.load %arg2[%c0_2, %c0_3, %c0_4] : memref<6x32x128xf32, #tpu.memory_space<vmem>>, vector<1x32x128xf32>
    %3 = vector.shape_cast %2 : vector<1x32x128xf32> to vector<32x128xf32>
    %cst = arith.constant dense<0.000000e+00> : vector<32x128xf32>
    %4 = tpu.matmul %1, %3, %cst {dimension_numbers = #tpu.dot_dimension_numbers<[1], [0], [0], [1], [0, 0, 1, 1], [], []>} : vector<32x32xf32>, vector<32x128xf32>, vector<32x128xf32> -> vector<32x128xf32>
    %5 = vector.extract_strided_slice %0 {offsets = [0, 1, 0], sizes = [2, 15, 32], strides = [1, 1, 1]} : vector<2x16x32xf32> to vector<2x15x32xf32>
    %6 = vector.extract_strided_slice %0 {offsets = [0, 0, 0], sizes = [2, 1, 32], strides = [1, 1, 1]} : vector<2x16x32xf32> to vector<2x1x32xf32>
    %7 = tpu.concatenate %5, %6 in 1 : vector<2x15x32xf32>, vector<2x1x32xf32> -> vector<2x16x32xf32>
    %8 = vector.shape_cast %7 : vector<2x16x32xf32> to vector<32x32xf32>
    %c1 = arith.constant 1 : index
    %c0_5 = arith.constant 0 : index
    %c0_6 = arith.constant 0 : index
    %9 = vector.load %arg2[%c1, %c0_5, %c0_6] : memref<6x32x128xf32, #tpu.memory_space<vmem>>, vector<1x32x128xf32>
    %10 = vector.shape_cast %9 : vector<1x32x128xf32> to vector<32x128xf32>
    %cst_7 = arith.constant dense<0.000000e+00> : vector<32x128xf32>
    %11 = tpu.matmul %8, %10, %cst_7 {dimension_numbers = #tpu.dot_dimension_numbers<[1], [0], [0], [1], [0, 0, 1, 1], [], []>} : vector<32x32xf32>, vector<32x128xf32>, vector<32x128xf32> -> vector<32x128xf32>
    %12 = arith.addf %4, %11 : vector<32x128xf32>
    %13 = vector.extract_strided_slice %0 {offsets = [0, 2, 0], sizes = [2, 14, 32], strides = [1, 1, 1]} : vector<2x16x32xf32> to vector<2x14x32xf32>
    %14 = vector.extract_strided_slice %0 {offsets = [0, 0, 0], sizes = [2, 2, 32], strides = [1, 1, 1]} : vector<2x16x32xf32> to vector<2x2x32xf32>
    %15 = tpu.concatenate %13, %14 in 1 : vector<2x14x32xf32>, vector<2x2x32xf32> -> vector<2x16x32xf32>
    %16 = vector.shape_cast %15 : vector<2x16x32xf32> to vector<32x32xf32>
    %c2 = arith.constant 2 : index
    %c0_8 = arith.constant 0 : index
    %c0_9 = arith.constant 0 : index
    %17 = vector.load %arg2[%c2, %c0_8, %c0_9] : memref<6x32x128xf32, #tpu.memory_space<vmem>>, vector<1x32x128xf32>
    %18 = vector.shape_cast %17 : vector<1x32x128xf32> to vector<32x128xf32>
    %cst_10 = arith.constant dense<0.000000e+00> : vector<32x128xf32>
    %19 = tpu.matmul %16, %18, %cst_10 {dimension_numbers = #tpu.dot_dimension_numbers<[1], [0], [0], [1], [0, 0, 1, 1], [], []>} : vector<32x32xf32>, vector<32x128xf32>, vector<32x128xf32> -> vector<32x128xf32>
    %20 = arith.addf %12, %19 : vector<32x128xf32>
    %21 = vector.extract_strided_slice %0 {offsets = [0, 3, 0], sizes = [2, 13, 32], strides = [1, 1, 1]} : vector<2x16x32xf32> to vector<2x13x32xf32>
    %22 = vector.extract_strided_slice %0 {offsets = [0, 0, 0], sizes = [2, 3, 32], strides = [1, 1, 1]} : vector<2x16x32xf32> to vector<2x3x32xf32>
    %23 = tpu.concatenate %21, %22 in 1 : vector<2x13x32xf32>, vector<2x3x32xf32> -> vector<2x16x32xf32>
    %24 = vector.shape_cast %23 : vector<2x16x32xf32> to vector<32x32xf32>
    %c3 = arith.constant 3 : index
    %c0_11 = arith.constant 0 : index
    %c0_12 = arith.constant 0 : index
    %25 = vector.load %arg2[%c3, %c0_11, %c0_12] : memref<6x32x128xf32, #tpu.memory_space<vmem>>, vector<1x32x128xf32>
    %26 = vector.shape_cast %25 : vector<1x32x128xf32> to vector<32x128xf32>
    %cst_13 = arith.constant dense<0.000000e+00> : vector<32x128xf32>
    %27 = tpu.matmul %24, %26, %cst_13 {dimension_numbers = #tpu.dot_dimension_numbers<[1], [0], [0], [1], [0, 0, 1, 1], [], []>} : vector<32x32xf32>, vector<32x128xf32>, vector<32x128xf32> -> vector<32x128xf32>
    %28 = arith.addf %20, %27 : vector<32x128xf32>
    %29 = vector.extract_strided_slice %0 {offsets = [0, 4, 0], sizes = [2, 12, 32], strides = [1, 1, 1]} : vector<2x16x32xf32> to vector<2x12x32xf32>
    %30 = vector.extract_strided_slice %0 {offsets = [0, 0, 0], sizes = [2, 4, 32], strides = [1, 1, 1]} : vector<2x16x32xf32> to vector<2x4x32xf32>
    %31 = tpu.concatenate %29, %30 in 1 : vector<2x12x32xf32>, vector<2x4x32xf32> -> vector<2x16x32xf32>
    %32 = vector.shape_cast %31 : vector<2x16x32xf32> to vector<32x32xf32>
    %c4 = arith.constant 4 : index
    %c0_14 = arith.constant 0 : index
    %c0_15 = arith.constant 0 : index
    %33 = vector.load %arg2[%c4, %c0_14, %c0_15] : memref<6x32x128xf32, #tpu.memory_space<vmem>>, vector<1x32x128xf32>
    %34 = vector.shape_cast %33 : vector<1x32x128xf32> to vector<32x128xf32>
    %cst_16 = arith.constant dense<0.000000e+00> : vector<32x128xf32>
    %35 = tpu.matmul %32, %34, %cst_16 {dimension_numbers = #tpu.dot_dimension_numbers<[1], [0], [0], [1], [0, 0, 1, 1], [], []>} : vector<32x32xf32>, vector<32x128xf32>, vector<32x128xf32> -> vector<32x128xf32>
    %36 = arith.addf %28, %35 : vector<32x128xf32>
    %37 = vector.extract_strided_slice %0 {offsets = [0, 5, 0], sizes = [2, 11, 32], strides = [1, 1, 1]} : vector<2x16x32xf32> to vector<2x11x32xf32>
    %38 = vector.extract_strided_slice %0 {offsets = [0, 0, 0], sizes = [2, 5, 32], strides = [1, 1, 1]} : vector<2x16x32xf32> to vector<2x5x32xf32>
    %39 = tpu.concatenate %37, %38 in 1 : vector<2x11x32xf32>, vector<2x5x32xf32> -> vector<2x16x32xf32>
    %40 = vector.shape_cast %39 : vector<2x16x32xf32> to vector<32x32xf32>
    %c5 = arith.constant 5 : index
    %c0_17 = arith.constant 0 : index
    %c0_18 = arith.constant 0 : index
    %41 = vector.load %arg2[%c5, %c0_17, %c0_18] : memref<6x32x128xf32, #tpu.memory_space<vmem>>, vector<1x32x128xf32>
    %42 = vector.shape_cast %41 : vector<1x32x128xf32> to vector<32x128xf32>
    %cst_19 = arith.constant dense<0.000000e+00> : vector<32x128xf32>
    %43 = tpu.matmul %40, %42, %cst_19 {dimension_numbers = #tpu.dot_dimension_numbers<[1], [0], [0], [1], [0, 0, 1, 1], [], []>} : vector<32x32xf32>, vector<32x128xf32>, vector<32x128xf32> -> vector<32x128xf32>
    %44 = arith.addf %36, %43 : vector<32x128xf32>
    %45 = vector.shape_cast %44 : vector<32x128xf32> to vector<2x16x128xf32>
    %c0_20 = arith.constant 0 : index
    %c0_21 = arith.constant 0 : index
    %46 = vector.load %arg4[%c0_20, %c0_21] : memref<16x128xf32, #tpu.memory_space<vmem>>, vector<16x128xf32>
    %47 = vector.shape_cast %46 : vector<16x128xf32> to vector<1x16x128xf32>
    %48 = vector.broadcast %47 : vector<1x16x128xf32> to vector<2x16x128xf32>
    %49 = arith.addf %45, %48 : vector<2x16x128xf32>
    %cst_22 = arith.constant dense<0xFF800000> : vector<2x128xf32>
    %50 = vector.multi_reduction <maximumf>, %49, %cst_22 [1] : vector<2x16x128xf32> to vector<2x128xf32>
    %c0_23 = arith.constant 0 : index
    %c0_24 = arith.constant 0 : index
    %51 = vector.load %arg3[%c0_23, %c0_24] : memref<1x128xf32, #tpu.memory_space<vmem>>, vector<1x128xf32>
    %52 = vector.broadcast %51 : vector<1x128xf32> to vector<2x128xf32>
    %53 = arith.addf %50, %52 : vector<2x128xf32>
    %c0_25 = arith.constant 0 : index
    %c0_26 = arith.constant 0 : index
    %54 = vector.load %arg5[%c0_25, %c0_26] : memref<128x128xf32, #tpu.memory_space<vmem>>, vector<128x128xf32>
    %cst_27 = arith.constant dense<0.000000e+00> : vector<2x128xf32>
    %55 = tpu.matmul %53, %54, %cst_27 {dimension_numbers = #tpu.dot_dimension_numbers<[1], [0], [0], [1], [0, 0, 1, 1], [], []>} : vector<2x128xf32>, vector<128x128xf32>, vector<2x128xf32> -> vector<2x128xf32>
    %c0_28 = arith.constant 0 : index
    %c0_29 = arith.constant 0 : index
    %56 = vector.load %arg6[%c0_28, %c0_29] : memref<1x128xf32, #tpu.memory_space<vmem>>, vector<1x128xf32>
    %57 = vector.broadcast %56 : vector<1x128xf32> to vector<2x128xf32>
    %58 = arith.addf %55, %57 : vector<2x128xf32>
    %c0_30 = arith.constant 0 : index
    %c0_31 = arith.constant 0 : index
    %59 = vector.load %arg7[%c0_30, %c0_31] : memref<2x128xf32, #tpu.memory_space<vmem>>, vector<2x128xf32>
    tpu.vector_store %arg7[%c0_30, %c0_31], %58 {strides = array<i32>} : memref<2x128xf32, #tpu.memory_space<vmem>>, vector<2x128xf32>,
    return
  }
  func.func @transform_0(%arg0: i32) -> (i32, i32, i32) {
    %c0_i32 = arith.constant 0 : i32
    %c0_i32_0 = arith.constant 0 : i32
    %c0_i32_1 = arith.constant 0 : i32
    return %arg0, %c0_i32, %c0_i32_0 : i32, i32, i32
  }
  func.func @transform_1(%arg0: i32) -> (i32, i32, i32) {
    %c0_i32 = arith.constant 0 : i32
    %c0_i32_0 = arith.constant 0 : i32
    %c0_i32_1 = arith.constant 0 : i32
    %c0_i32_2 = arith.constant 0 : i32
    return %c0_i32, %c0_i32_0, %c0_i32_1 : i32, i32, i32
  }
  func.func @transform_2(%arg0: i32) -> (i32, i32) {
    %c0_i32 = arith.constant 0 : i32
    %c0_i32_0 = arith.constant 0 : i32
    %c0_i32_1 = arith.constant 0 : i32
    return %c0_i32, %c0_i32_0 : i32, i32
  }
  func.func @transform_3(%arg0: i32) -> (i32, i32) {
    %c0_i32 = arith.constant 0 : i32
    %c0_i32_0 = arith.constant 0 : i32
    %c0_i32_1 = arith.constant 0 : i32
    return %c0_i32, %c0_i32_0 : i32, i32
  }
  func.func @transform_4(%arg0: i32) -> (i32, i32) {
    %c0_i32 = arith.constant 0 : i32
    %c0_i32_0 = arith.constant 0 : i32
    %c0_i32_1 = arith.constant 0 : i32
    return %c0_i32, %c0_i32_0 : i32, i32
  }
  func.func @transform_5(%arg0: i32) -> (i32, i32) {
    %c0_i32 = arith.constant 0 : i32
    %c0_i32_0 = arith.constant 0 : i32
    %c0_i32_1 = arith.constant 0 : i32
    return %c0_i32, %c0_i32_0 : i32, i32
  }
  func.func @transform_6(%arg0: i32) -> (i32, i32) {
    %c0_i32 = arith.constant 0 : i32
    %c0_i32_0 = arith.constant 0 : i32
    return %arg0, %c0_i32 : i32, i32
  }
}

</mosaic_0001>

<bundles_post_ra>
// kernel: tpu_custom_call.1
= control target key start
LH: loop header
LB: loop body
LE: loop exit
PB: predicated region body
PF: predicated region fallthrough
CT: control target
= control target key end

     0   :  { %11 = vsyncpa [#allocation3], 0  ;;  %s1022_s0 = inlined_call_operand.hbm [shape: f32[2,16,32], index: 0, kind: input, shape index: {}]   ;;  %s1023_s1 = inlined_call_operand.hbm [shape: f32[192,128], index: 1, kind: input, shape index: {}]   ;;  %s1024_s2 = inlined_call_operand.vmem [shape: f32[1,128], index: 2, kind: input, shape index: {}]   ;;  %s1025_s3 = inlined_call_operand.hbm [shape: f32[16,128], index: 3, kind: input, shape index: {}]   ;;  %s1026_s4 = inlined_call_operand.hbm [shape: f32[128,128], index: 4, kind: input, shape index: {}]   ;;  %s1027_s5 = inlined_call_operand.vmem [shape: f32[1,128], index: 5, kind: input, shape index: {}]   ;;  %s1028_s6 = inlined_call_operand.hbm [shape: f32[2,128], index: 6, kind: output, shape index: {}]  }
   0x1   :  { %12 = vsyncpa [#allocation6], 0 }
   0x2   :  { %13 = vsyncpa [#allocation9], 0 }
   0x3   :  { %14 = vsyncpa [#allocation4], 0  ;;  %s754_s21 = smov [#allocation5]   ;;  %s755_s23 = smov [#allocation2]  }
   0x4   :  { %s32_s22 = sshll.u32 %s754_s21, 4  ;;  %s20_s24 = sshll.u32 %s755_s23, 4  ;;  %s33_s22 = int_to_ptr.vmem [resolvable:$true] %s32_s22  ;;  %s802_s24 = int_to_ptr.vmem [resolvable:$true] %s20_s24 }
   0x5   :  { %s636_s27 = scalar_lea.hbm %s1023_s1, 3072 }
   0x6   :  { %p637_p0 = scmp.ne.s32.totalorder %s1023_s1, %s636_s27  ;;  %p640_p1 = scmp.lt.u32.totalorder %s636_s27, %s1023_s1 }
   0x8   :  { %p642_p2 = pnand %p640_p1, %p637_p0 }
   0xa   :  { %645 = shalt.err (!%p642_p2)
}
   0xb   :  { %s646_s8 = scalar_lea.vmem %s33_s22, 3072  ;;  %p651_p4 = scmp.lt.s32.totalorder %s33_s22, %s33_s22 }
   0xc   :  { %p647_p3 = scmp.ne.s32.totalorder %s33_s22, %s646_s8  ;;  %p652_p5 = scmp.lt.s32.totalorder %s646_s8, %s646_s8 }
   0xe   :  { %p653_p6 = por %p652_p5, %p651_p4 }
  0x10   :  { %p654_p7 = pnand %p653_p6, %p647_p3 }
  0x12   :  { %657 = shalt.err (!%p654_p7)
}
  0x13   :  { %s756_s9 = smov 128   ;;  %s757_s10 = smov 8  }
  0x14   :  { %38 = dma.hbm_to_vmem [thread:$0]  %s1023_s1, 3072, %s33_s22, [#allocation6], %s756_s9, %s756_s9, %s757_s10  }
  0x15   :  { %s658_s15 = scalar_lea.hbm %s1022_s0, 512 }
  0x16   :  { %p659_p8 = scmp.ne.s32.totalorder %s1022_s0, %s658_s15  ;;  %p662_p9 = scmp.lt.u32.totalorder %s658_s15, %s1022_s0 }
  0x18   :  { %p664_p10 = pnand %p662_p9, %p659_p8 }
  0x1a   :  { %667 = shalt.err (!%p664_p10)
}
  0x1b   :  { %s668_s20 = scalar_lea.vmem %s802_s24, 512  ;;  %p673_p12 = scmp.lt.s32.totalorder %s802_s24, %s802_s24 }
  0x1c   :  { %p669_p11 = scmp.ne.s32.totalorder %s802_s24, %s668_s20  ;;  %p674_p13 = scmp.lt.s32.totalorder %s668_s20, %s668_s20 }
  0x1e   :  { %p675_p0 = por %p674_p13, %p673_p12 }
  0x20   :  { %p676_p1 = pnand %p675_p0, %p669_p11 }
  0x22   :  { %679 = shalt.err (!%p676_p1)
}
  0x23   :  { %26 = dma.hbm_to_vmem [thread:$0]  %s1022_s0, 512, %s802_s24, [#allocation3], %s756_s9, %s756_s9, %s757_s10  }
  0x24   :  { %s758_s22 = smov [#allocation7]   ;;  %s759_s25 = smov [#allocation8]  }
  0x25   :  { %s46_s23 = sshll.u32 %s758_s22, 4  ;;  %s58_s26 = sshll.u32 %s759_s25, 4  ;;  %s47_s23 = int_to_ptr.vmem [resolvable:$true] %s46_s23  ;;  %s839_s26 = int_to_ptr.vmem [resolvable:$true] %s58_s26 }
  0x26   :  { %s680_s29 = scalar_lea.hbm %s1025_s3, 256 }
  0x27   :  { %p681_p2 = scmp.ne.s32.totalorder %s1025_s3, %s680_s29  ;;  %p684_p3 = scmp.lt.u32.totalorder %s680_s29, %s1025_s3 }
  0x29   :  { %p686_p4 = pnand %p684_p3, %p681_p2 }
  0x2b   :  { %689 = shalt.err (!%p686_p4)
}
  0x2c   :  { %s690_s0 = scalar_lea.vmem %s47_s23, 256  ;;  %p695_p6 = scmp.lt.s32.totalorder %s47_s23, %s47_s23 }
  0x2d   :  { %p691_p5 = scmp.ne.s32.totalorder %s47_s23, %s690_s0  ;;  %p696_p7 = scmp.lt.s32.totalorder %s690_s0, %s690_s0 }
  0x2f   :  { %p697_p8 = por %p696_p7, %p695_p6 }
  0x31   :  { %p698_p9 = pnand %p697_p8, %p691_p5 }
  0x33   :  { %701 = shalt.err (!%p698_p9)
}
  0x34   :  { %52 = dma.hbm_to_vmem [thread:$0]  %s1025_s3, 256, %s47_s23, [#allocation6], %s756_s9, %s756_s9, %s757_s10  }
  0x35   :  { %s702_s15 = scalar_lea.hbm %s1026_s4, 2048 }
  0x36   :  { %p703_p10 = scmp.ne.s32.totalorder %s1026_s4, %s702_s15  ;;  %p706_p11 = scmp.lt.u32.totalorder %s702_s15, %s1026_s4 }
  0x38   :  { %p708_p12 = pnand %p706_p11, %p703_p10 }
  0x3a   :  { %711 = shalt.err (!%p708_p12)
}
  0x3b   :  { %s712_s20 = scalar_lea.vmem %s839_s26, 2048  ;;  %p717_p0 = scmp.lt.s32.totalorder %s839_s26, %s839_s26 }
  0x3c   :  { %p713_p13 = scmp.ne.s32.totalorder %s839_s26, %s712_s20  ;;  %p718_p1 = scmp.lt.s32.totalorder %s712_s20, %s712_s20 }
  0x3e   :  { %p719_p2 = por %p718_p1, %p717_p0 }
  0x40   :  { %p720_p3 = pnand %p719_p2, %p713_p13 }
  0x42   :  { %723 = shalt.err (!%p720_p3)
}
  0x43   :  { %64 = dma.hbm_to_vmem [thread:$0]  %s1026_s4, 2048, %s839_s26, [#allocation9], %s756_s9, %s756_s9, %s757_s10  }
  0x44   :  { %746 = dma.done.wait [#allocation3], 512  }
  0x45   :  { %747 = vsyncadd [#allocation3], 4294966784 }
  0x46   :  { %748 = dma.done.wait [#allocation6], 3328  }
  0x47   :  { %749 = vsyncadd [#allocation6], 4294963968 }
  0x48   :  { %750 = dma.done.wait [#allocation9], 2048  }
  0x49   :  { %751 = vsyncadd [#allocation9], 4294965248  ;;  %v87_v0 = vlaneseq  ;;  %v760_v1 = vmov 0.0|0.0   ;;  %v880_v3 = vld [vmem:[#allocation2] sm:$0xff]  ;;  %v882_v4 = vld [vmem:[#allocation2 + $0x8] sm:$0xff]  ;;  %s761_s4 = smov 32  }
  0x4a   :  { %538 = vmatprep.subr.bf16.mxu0 %v760_v1  ;;  %574 = vmatprep.subr.bf16.mxu1 %v760_v1  ;;  %v83_v5 = vrot.slane %v880_v3, 1  ;;  %v85_v6 = vrot.slane %v882_v4, 1  ;;  %v121_v7 = vrot.slane %v880_v3, 5  ;;  %v123_v8 = vrot.slane %v882_v4, 5  ;;  %v896_v13 = vld [vmem:[#allocation2 + $0x10] sm:$0xff]  ;;  %v898_v14 = vld [vmem:[#allocation2 + $0x18] sm:$0xff] }
  0x4b   :  { %v878_v2 = vshrl.u32 %v87_v0, 7  ;;  %v94_v9 = vrot.slane %v880_v3, 2  ;;  %v96_v10 = vrot.slane %v882_v4, 2  ;;  %v103_v11 = vrot.slane %v880_v3, 3  ;;  %v213_v27 = vld [vmem:[#allocation5] sm:$0xff]  ;;  %v214_v28 = vld [vmem:[#allocation5 + $0x8] sm:$0xff] }
  0x4c   :  { %v105_v12 = vrot.slane %v882_v4, 3  ;;  %v84_v23 = vrot.slane %v896_v13, 1  ;;  %v86_v24 = vrot.slane %v898_v14, 1  ;;  %v95_v31 = vrot.slane %v896_v13, 2  ;;  %s762_s9 = smov 96   ;;  %v215_v34 = vld [vmem:[#allocation5 + $0x10] sm:$0xff] }
  0x4d   :  { %vm89_vm0 = vcmp.lt.s32.totalorder %v878_v2, 7  ;;  %vm125_vm1 = vcmp.lt.s32.totalorder %v878_v2, 3  ;;  %vm98_vm2 = vcmp.lt.s32.totalorder %v878_v2, 6  ;;  %vm107_vm3 = vcmp.lt.s32.totalorder %v878_v2, 5  ;;  %v216_v35 = vld [vmem:[#allocation5 + $0x18] sm:$0xff]  ;;  %s763_s10 = smov 64  }
  0x4e   :  { %v90_v15 = vsel %vm89_vm0, %v83_v5, %v85_v6  ;;  %v92_v16 = vsel %vm89_vm0, %v85_v6, %v83_v5  ;;  %v126_v17 = vsel %vm125_vm1, %v121_v7, %v123_v8  ;;  %v99_v19 = vsel %vm98_vm2, %v94_v9, %v96_v10  ;;  %v217_v43 = vld [vmem:[#allocation5 + $0x20] sm:$0xff]  ;;  %v218_v44 = vld [vmem:[#allocation5 + $0x28] sm:$0xff]  ;;  %v219_v50 = vld [vmem:[#allocation5 + $0x30] sm:$0xff]  ;;  %s766_s26 = smov [#allocation10]  }
  0x4f   :  { %v611_v18 = vpack.i.bf16 %v92_v16, %v90_v15  ;;  %182 = vrot.lane.b32.xlu1 %v126_v17, %s761_s4  ;;  %v101_v20 = vsel %vm98_vm2, %v96_v10, %v94_v9  ;;  %v108_v21 = vsel %vm107_vm3, %v103_v11, %v105_v12  ;;  %v110_v22 = vsel %vm107_vm3, %v105_v12, %v103_v11  ;;  %v220_v51 = vld [vmem:[#allocation5 + $0x38] sm:$0xff]  ;;  %v221_v55 = vld [vmem:[#allocation5 + $0x40] sm:$0xff]  ;;  %v222_v56 = vld [vmem:[#allocation5 + $0x48] sm:$0xff]  ;;  %s469_s27 = sshll.u32 %s766_s26, 4  ;;  %s470_s27 = int_to_ptr.vmem [resolvable:$true] %s469_s27 }
  0x50   :  { %v616_v25 = vpack.i.bf16 %v101_v20, %v99_v19  ;;  %v621_v26 = vpack.i.bf16 %v110_v22, %v108_v21  ;;  %v91_v29 = vsel %vm89_vm0, %v84_v23, %v86_v24  ;;  %v93_v30 = vsel %vm89_vm0, %v86_v24, %v84_v23  ;;  %v223_v59 = vld [vmem:[#allocation5 + $0x50] sm:$0xff]  ;;  %v224_v60 = vld [vmem:[#allocation5 + $0x58] sm:$0xff]  ;;  %v225_v62 = vld [vmem:[#allocation5 + $0x60] sm:$0xff]  ;;  %s724_s28 = scalar_lea.vmem %s470_s27, 32  ;;  %p729_p5 = scmp.lt.s32.totalorder %s470_s27, %s470_s27 }
  0x51   :  { %612 = vrot.lane.b32.xlu0 %v611_v18, %s761_s4  ;;  %v97_v32 = vrot.slane %v898_v14, 2  ;;  %v626_v33 = vpack.i.bf16 %v93_v30, %v91_v29  ;;  %v122_v36 = vrot.slane %v896_v13, 5  ;;  %v124_v37 = vrot.slane %v898_v14, 5  ;;  %v226_v63 = vld [vmem:[#allocation5 + $0x68] sm:$0xff]  ;;  %v227_v5 = vld [vmem:[#allocation5 + $0x70] sm:$0xff]  ;;  %v228_v6 = vld [vmem:[#allocation5 + $0x78] sm:$0xff]  ;;  %p725_p4 = scmp.ne.s32.totalorder %s470_s27, %s724_s28  ;;  %p730_p6 = scmp.lt.s32.totalorder %s724_s28, %s724_s28 }
  0x52   :  { %v539_v38 = vpack.c.bf16 %v214_v28, %v213_v27  ;;  %v128_v39 = vsel %vm125_vm1, %v123_v8, %v121_v7  ;;  %v542_v42 = vpack.c.bf16 %v216_v35, %v215_v34  ;;  %v104_v47 = vrot.slane %v896_v13, 3  ;;  %v229_v8 = vld [vmem:[#allocation5 + $0x80] sm:$0xff]  ;;  %v230_v9 = vld [vmem:[#allocation5 + $0x88] sm:$0xff]  ;;  %v231_v11 = vld [vmem:[#allocation5 + $0x90] sm:$0xff] }
  0x53   :  { %622 = vrot.lane.b32.xlu1 %v621_v26, %s762_s9  ;;  %v100_v40 = vsel %vm98_vm2, %v95_v31, %v97_v32  ;;  %v102_v41 = vsel %vm98_vm2, %v97_v32, %v95_v31  ;;  %v127_v45 = vsel %vm125_vm1, %v122_v36, %v124_v37  ;;  %v106_v48 = vrot.slane %v898_v14, 3  ;;  %v232_v12 = vld [vmem:[#allocation5 + $0x98] sm:$0xff]  ;;  %v233_v16 = vld [vmem:[#allocation5 + $0xa0] sm:$0xff]  ;;  %v234_v17 = vld [vmem:[#allocation5 + $0xa8] sm:$0xff]  ;;  %p731_p7 = por %p730_p6, %p729_p5 }
  0x54   :  { %540 = vmatpush1.bf16.msra.mxu0 %v539_v38  ;;  %v631_v46 = vpack.i.bf16 %v102_v41, %v100_v40  ;;  %v545_v49 = vpack.c.bf16 %v218_v44, %v217_v43  ;;  %v129_v52 = vsel %vm125_vm1, %v124_v37, %v122_v36  ;;  %v548_v54 = vpack.c.bf16 %v220_v51, %v219_v50  ;;  %v235_v19 = vld [vmem:[#allocation5 + $0xb0] sm:$0xff]  ;;  %v236_v20 = vld [vmem:[#allocation5 + $0xb8] sm:$0xff] }
  0x55   :  { %617 = vrot.lane.b32.xlu0 %v616_v25, %s763_s10  ;;  %541 = vmatprep.subr.bf16.mxu0 %v760_v1  ;;  %v109_v53 = vsel %vm107_vm3, %v104_v47, %v106_v48  ;;  %v111_v57 = vsel %vm107_vm3, %v106_v48, %v104_v47  ;;  %v551_v58 = vpack.c.bf16 %v222_v56, %v221_v55  ;;  %v112_v22 = vrot.slane %v880_v3, 4  ;;  %p732_p8 = pnand %p731_p7, %p725_p4 }
  0x56   :  { %v554_v61 = vpack.c.bf16 %v224_v60, %v223_v59  ;;  %v557_v0 = vpack.c.bf16 %v226_v63, %v225_v62  ;;  %v560_v7 = vpack.c.bf16 %v228_v6, %v227_v5  ;;  %v563_v10 = vpack.c.bf16 %v230_v9, %v229_v8  ;;  %v363_v63 = vld [vmem:[#allocation8] sm:$0xff]  ;;  %v365_v6 = vld [vmem:[#allocation8 + $0x10] sm:$0xff]  ;;  %v368_v9 = vld [vmem:[#allocation8 + $0x28] sm:$0xff] }
  0x57   :  { %627 = vrot.lane.b32.xlu1 %v626_v33, %s761_s4  ;;  %v566_v15 = vpack.c.bf16 %v232_v12, %v231_v11  ;;  %v569_v18 = vpack.c.bf16 %v234_v17, %v233_v16  ;;  %v572_v21 = vpack.c.bf16 %v236_v20, %v235_v19  ;;  %v114_v23 = vrot.slane %v882_v4, 4  ;;  %v369_v11 = vld [vmem:[#allocation8 + $0x30] sm:$0xff]  ;;  %v370_v12 = vld [vmem:[#allocation8 + $0x38] sm:$0xff]  ;;  %v371_v16 = vld [vmem:[#allocation8 + $0x40] sm:$0xff] }
  0x58   :  { %543 = vmatpush1.bf16.msra.mxu0 %v542_v42  ;;  %vm116_vm4 = vcmp.lt.s32.totalorder %v878_v2, 4  ;;  %vm194_vm5 = vcmask 261120   ;;  %vm199_vm6 = vcmask 523264   ;;  %v113_v30 = vrot.slane %v896_v13, 4  ;;  %v372_v17 = vld [vmem:[#allocation8 + $0x48] sm:$0xff]  ;;  %v373_v19 = vld [vmem:[#allocation8 + $0x50] sm:$0xff] }
  0x59   :  { %184 = vrot.lane.b32.xlu0 %v128_v39, %s761_s4  ;;  %544 = vmatprep.subr.bf16.mxu0 %v760_v1  ;;  %v117_v24 = vsel %vm116_vm4, %v112_v22, %v114_v23  ;;  %v115_v31 = vrot.slane %v898_v14, 4  ;;  %vm204_vm7 = vcmask 785408   ;;  %v119_v37 = vsel %vm116_vm4, %v114_v23, %v112_v22  ;;  %v374_v20 = vld [vmem:[#allocation8 + $0x58] sm:$0xff]  ;;  %v375_v22 = vld [vmem:[#allocation8 + $0x60] sm:$0xff]  ;;  %v376_v23 = vld [vmem:[#allocation8 + $0x68] sm:$0xff] }
  0x5a   :  { %vm764_vm8 = vmmov 0   ;;  %vm389_vm9 = vcmask 1041409  }
  0x5b   :  { %186 = vrot.lane.b32.xlu1 %v127_v45, %s761_s4  ;;  %v118_v41 = vsel %vm116_vm4, %v113_v30, %v115_v31 }
  0x5c   :  { %546 = vmatpush1.bf16.msra.mxu0 %v545_v49 }
  0x5d   :  { %632 = vrot.lane.b32.xlu0 %v631_v46, %s763_s10  ;;  %547 = vmatprep.subr.bf16.mxu0 %v760_v1 }
  0x5f   :  { %188 = vrot.lane.b32.xlu1 %v129_v52, %s761_s4 }
  0x60   :  { %549 = vmatpush1.bf16.msra.mxu0 %v548_v54 }
  0x61   :  { %170 = vrot.lane.b32.xlu0 %v109_v53, %s762_s9  ;;  %550 = vmatprep.subr.bf16.mxu0 %v760_v1 }
  0x64   :  { %552 = vmatpush1.bf16.msra.mxu0 %v551_v58 }
  0x65   :  { %172 = vrot.lane.b32.xlu0 %v111_v57, %s762_s9  ;;  %553 = vmatprep.subr.bf16.mxu0 %v760_v1 }
  0x68   :  { %555 = vmatpush1.bf16.msra.mxu0 %v554_v61 }
  0x69   :  { %556 = vmatprep.subr.bf16.mxu0 %v760_v1 }
  0x6c   :  { %558 = vmatpush1.bf16.msra.mxu0 %v557_v0  ;;  %v364_v0 = vld [vmem:[#allocation8 + $0x8] sm:$0xff] }
  0x6d   :  { %559 = vmatprep.subr.bf16.mxu0 %v760_v1  ;;  %v575_v5 = vpack.c.bf16 %v364_v0, %v363_v63 }
  0x6f   :  { %576 = vmatpush3.bf16.msra.mxu1 %v575_v5 }
  0x70   :  { %561 = vmatpush1.bf16.msra.mxu0 %v560_v7  ;;  %577 = vmatprep.subr.bf16.mxu1 %v760_v1  ;;  %v366_v7 = vld [vmem:[#allocation8 + $0x18] sm:$0xff] }
  0x71   :  { %562 = vmatprep.subr.bf16.mxu0 %v760_v1  ;;  %v578_v8 = vpack.c.bf16 %v366_v7, %v365_v6 }
  0x73   :  { %579 = vmatpush3.bf16.msra.mxu1 %v578_v8 }
  0x74   :  { %564 = vmatpush1.bf16.msra.mxu0 %v563_v10  ;;  %580 = vmatprep.subr.bf16.mxu1 %v760_v1 }
  0x75   :  { %565 = vmatprep.subr.bf16.mxu0 %v760_v1 }
  0x78   :  { %567 = vmatpush1.bf16.msra.mxu0 %v566_v15  ;;  %v584_v15 = vpack.c.bf16 %v370_v12, %v369_v11 }
  0x79   :  { %568 = vmatprep.subr.bf16.mxu0 %v760_v1 }
  0x7c   :  { %570 = vmatpush1.bf16.msra.mxu0 %v569_v18  ;;  %v587_v18 = vpack.c.bf16 %v372_v17, %v371_v16 }
  0x7d   :  { %571 = vmatprep.subr.bf16.mxu0 %v760_v1 }
  0x80   :  { %573 = vmatpush1.bf16.msra.mxu0 %v572_v21  ;;  %v590_v21 = vpack.c.bf16 %v374_v20, %v373_v19 }
  0xc1   :  { %v183_v25 = vpop.permute.xlu1 %182 }
  0xc2   :  { %v209_v26 = vsel %vm194_vm5, %v117_v24, %v183_v25  ;;  %v593_v24 = vpack.c.bf16 %v376_v23, %v375_v22  ;;  %v377_v25 = vld [vmem:[#allocation8 + $0x70] sm:$0xff] }
  0xc3   :  { %v613_v27 = vpop.permute.xlu0 %612  ;;  %480 = vmatprep.mubr.msk.f32.mxu0 %vm199_vm6, %v209_v26  ;;  %v378_v26 = vld [vmem:[#allocation8 + $0x78] sm:$0xff] }
  0xc4   :  { %v614_v28 = vunpack.i.l.bf16 %v613_v27  ;;  %v615_v32 = vunpack.i.h.bf16 %v613_v27  ;;  %v596_v27 = vpack.c.bf16 %v378_v26, %v377_v25 }
  0xc5   :  { %v623_v29 = vpop.permute.xlu1 %622 }
  0xc6   :  { %v624_v34 = vunpack.i.l.bf16 %v623_v29  ;;  %v195_v38 = vsel %vm194_vm5, %v880_v3, %v614_v28  ;;  %v625_v42 = vunpack.i.h.bf16 %v623_v29  ;;  %v196_v46 = vsel %vm194_vm5, %v882_v4, %v615_v32  ;;  %v335_v32 = vld [vmem:[#allocation7 + $0x8] sm:$0xff] }
  0xc7   :  { %v618_v33 = vpop.permute.xlu0 %617  ;;  %v120_v4 = vsel %vm116_vm4, %v115_v31, %v113_v30  ;;  %v765_v28 = vmov 0.0   ;;  %v334_v31 = vld [vmem:[#allocation7] sm:$0xff] }
  0xc8   :  { %v620_v35 = vunpack.i.h.bf16 %v618_v33  ;;  %v619_v36 = vunpack.i.l.bf16 %v618_v33  ;;  %535 = vmatprep.mubr.msk.f32.mxu1 %vm764_vm8, %v765_v28 }
  0xc9   :  { %v628_v39 = vpop.permute.xlu1 %627 }
  0xca   :  { %v200_v40 = vsel %vm199_vm6, %v195_v38, %v619_v36  ;;  %v629_v45 = vunpack.i.l.bf16 %v628_v39  ;;  %v201_v48 = vsel %vm199_vm6, %v196_v46, %v620_v35  ;;  %v630_v53 = vunpack.i.h.bf16 %v628_v39 }
  0xcb   :  { %v185_v43 = vpop.permute.xlu0 %184  ;;  %v205_v44 = vsel %vm204_vm7, %v200_v40, %v624_v34  ;;  %v206_v51 = vsel %vm204_vm7, %v201_v48, %v625_v42 }
  0xcc   :  { %v210_v47 = vsel %vm194_vm5, %v119_v37, %v185_v43  ;;  %314 = vmatmul.mubr.f32.vlgmr.msra.gmra.mrb[0].mxu0 %v205_v44  ;;  %v197_v52 = vsel %vm194_vm5, %v896_v13, %v629_v45  ;;  %v198_v13 = vsel %vm194_vm5, %v898_v14, %v630_v53  ;;  %v367_v14 = vld [vmem:[#allocation8 + $0x20] sm:$0xff] }
  0xcd   :  { %481 = vmatprep.mubr.msk.f32.mxu0 %vm199_vm6, %v210_v47  ;;  %v187_v3 = vpop.permute.xlu1 %186  ;;  %v581_v10 = vpack.c.bf16 %v368_v9, %v367_v14 }
  0xce   :  { %v211_v49 = vsel %vm194_vm5, %v118_v41, %v187_v3 }
  0xcf   :  { %v633_v50 = vpop.permute.xlu0 %632  ;;  %582 = vmatpush3.bf16.msra.mxu1 %v581_v10 }
  0xd0   :  { %v634_v54 = vunpack.i.l.bf16 %v633_v50  ;;  %319 = vmatmul.mubr.f32.gmra.mrb[2].mxu0 %v206_v51  ;;  %v635_v57 = vunpack.i.h.bf16 %v633_v50  ;;  %583 = vmatprep.subr.bf16.mxu1 %v760_v1 }
  0xd1   :  { %482 = vmatprep.mubr.msk.f32.mxu0 %vm199_vm6, %v211_v49  ;;  %v189_v55 = vpop.permute.xlu1 %188 }
  0xd2   :  { %v202_v56 = vsel %vm199_vm6, %v197_v52, %v634_v54  ;;  %v212_v59 = vsel %vm194_vm5, %v120_v4, %v189_v55  ;;  %v203_v2 = vsel %vm199_vm6, %v198_v13, %v635_v57  ;;  %v484_v4 = vld [vmem:[%s1024_s2] ss:$0 sm:$0xff] }
  0xd3   :  { %v171_v58 = vpop.permute.xlu0 %170  ;;  %585 = vmatpush3.bf16.msra.mxu1 %v584_v15 }
  0xd4   :  { %v207_v60 = vsel %vm204_vm7, %v202_v56, %v171_v58  ;;  %586 = vmatprep.subr.bf16.mxu1 %v760_v1 }
  0xd5   :  { %324 = vmatmul.mubr.f32.gmra.mrb[4].mxu0 %v207_v60 }
  0xd6   :  { %483 = vmatprep.mubr.msk.f32.mxu0 %vm199_vm6, %v212_v59  ;;  %v485_v59 = vld [vmem:[%s1027_s5] ss:$0 sm:$0xff] }
  0xd7   :  { %v173_v61 = vpop.permute.xlu0 %172  ;;  %588 = vmatpush3.bf16.msra.mxu1 %v587_v18 }
  0xd8   :  { %v208_v62 = vsel %vm204_vm7, %v203_v2, %v173_v61  ;;  %589 = vmatprep.subr.bf16.mxu1 %v760_v1 }
  0xd9   :  { %329 = vmatmul.mubr.f32.gmra.mrb[6].mxu0 %v208_v62 }
  0xdb   :  { %591 = vmatpush3.bf16.msra.mxu1 %v590_v21 }
  0xdc   :  { %592 = vmatprep.subr.bf16.mxu1 %v760_v1 }
  0xdf   :  { %594 = vmatpush3.bf16.msra.mxu1 %v593_v24 }
  0xe0   :  { %595 = vmatprep.subr.bf16.mxu1 %v760_v1 }
  0xe3   :  { %597 = vmatpush3.bf16.msra.mxu1 %v596_v27 }
 0x19f   :  { %v315_v29 = vpop.f32.mrb[0].mxu0 }
 0x1a0   :  { %v317_v30 = vpop.f32.mrb[1].mxu0  ;;  %v336_v34 = vadd.f32 %v334_v31, %v315_v29 }
 0x1a3   :  { %v320_v33 = vpop.f32.mrb[2].mxu0 }
 0x1a4   :  { %v337_v35 = vadd.f32 %v335_v32, %v320_v33  ;;  %v322_v36 = vpop.f32.mrb[3].mxu0 }
 0x1a6   :  { %v340_v37 = vmax.f32 %v336_v34, %v337_v35 }
 0x1a8   :  { %v341_v38 = vrot.slane %v340_v37, 4  ;;  %v325_v39 = vpop.f32.mrb[4].mxu0 }
 0x1a9   :  { %v327_v40 = vpop.f32.mrb[5].mxu0  ;;  %v338_v1 = vadd.f32 %v334_v31, %v325_v39 }
 0x1aa   :  { %v342_v41 = vmax.f32 %v340_v37, %v341_v38 }
 0x1ac   :  { %v330_v42 = vpop.f32.mrb[6].mxu0  ;;  %v343_v45 = vrot.slane %v342_v41, 2 }
 0x1ad   :  { %v339_v43 = vadd.f32 %v335_v32, %v330_v42  ;;  %v332_v44 = vpop.f32.mrb[7].mxu0 }
 0x1ae   :  { %v344_v48 = vmax.f32 %v342_v41, %v343_v45 }
 0x1af   :  { %v347_v46 = vmax.f32 %v338_v1, %v339_v43 }
 0x1b0   :  { %v345_v50 = vrot.slane %v344_v48, 1 }
 0x1b1   :  { %v348_v47 = vrot.slane %v347_v46, 4 }
 0x1b2   :  { %v346_v54 = vmax.f32 %v344_v48, %v345_v50 }
 0x1b3   :  { %v349_v3 = vmax.f32 %v347_v46, %v348_v47 }
 0x1b4   :  { %v361_v56 = vadd.f32 %v484_v4, %v346_v54 }
 0x1b5   :  { %v350_v49 = vrot.slane %v349_v3, 2 }
 0x1b7   :  { %v351_v51 = vmax.f32 %v349_v3, %v350_v49 }
 0x1b9   :  { %v352_v52 = vrot.slane %v351_v51, 1 }
 0x1bb   :  { %v353_v53 = vmax.f32 %v351_v51, %v352_v52 }
 0x1bd   :  { %v362_v55 = vadd.f32 %v484_v4, %v353_v53 }
 0x1bf   :  { %v388_v57 = vrot.slane %v362_v55, 7 }
 0x1c1   :  { %v390_v58 = vsel %vm389_vm9, %v388_v57, %v361_v56 }
 0x1c2   :  { %536 = vmatmul.mubr.f32.vlgmr.msra.gmra.mrb[0].mxu1 %v390_v58 }
 0x295   :  { %v458_v60 = vpop.f32.mrb[0].mxu1 }
 0x296   :  { %v459_v13 = vadd.f32 %v485_v59, %v458_v60  ;;  %v537_v61 = vpop.f32.mrb[1].mxu1 }
 0x298   :  { %462 = vst [vmem:[#allocation10] sm:$0x3] %v459_v13 }
 0x299   :  { %735 = shalt.err (!%p732_p8)
}
 0x29a   :  { %s736_s30 = scalar_lea.hbm %s1028_s6, 32 }
 0x29b   :  { %p737_p9 = scmp.ne.s32.totalorder %s1028_s6, %s736_s30  ;;  %p740_p10 = scmp.lt.u32.totalorder %s736_s30, %s1028_s6 }
 0x29d   :  { %p742_p11 = pnand %p740_p10, %p737_p9 }
 0x29f   :  { %745 = shalt.err (!%p742_p11)
}
 0x2a0   :  { %472 = dma.vmem_to_hbm [thread:$0]  %s470_s27, 32, %s1028_s6, [#allocation4]  }
 0x2a1   :  { %752 = dma.done.wait [#allocation4], 32  }
 0x2a2   :  { %753 = vsyncadd [#allocation4], 4294967264 }
 0x2a3   :  { %476 = vsyncpa [#allocation3], 1 }
 0x2a4   :  { %477 = vsyncpa [#allocation6], 1 }
 0x2a5   :  { %478 = vsyncpa [#allocation9], 1 }
 0x2a6   :  { %479 = vsyncpa [#allocation4], 1 }

// kernel: tpu_custom_call.1
= control target key start
LH: loop header
LB: loop body
LE: loop exit
PB: predicated region body
PF: predicated region fallthrough
CT: control target
= control target key end

     0   :  { %11 = vsyncpa [#allocation3], 0  ;;  %s1022_s0 = inlined_call_operand.hbm [shape: f32[2,16,32], index: 0, kind: input, shape index: {}]   ;;  %s1023_s1 = inlined_call_operand.hbm [shape: f32[192,128], index: 1, kind: input, shape index: {}]   ;;  %s1024_s2 = inlined_call_operand.vmem [shape: f32[1,128], index: 2, kind: input, shape index: {}]   ;;  %s1025_s3 = inlined_call_operand.hbm [shape: f32[16,128], index: 3, kind: input, shape index: {}]   ;;  %s1026_s4 = inlined_call_operand.hbm [shape: f32[128,128], index: 4, kind: input, shape index: {}]   ;;  %s1027_s5 = inlined_call_operand.vmem [shape: f32[1,128], index: 5, kind: input, shape index: {}]   ;;  %s1028_s6 = inlined_call_operand.hbm [shape: f32[2,128], index: 6, kind: output, shape index: {}]  }
   0x1   :  { %12 = vsyncpa [#allocation6], 0 }
   0x2   :  { %13 = vsyncpa [#allocation9], 0 }
   0x3   :  { %14 = vsyncpa [#allocation4], 0  ;;  %s754_s21 = smov [#allocation5]   ;;  %s755_s23 = smov [#allocation2]  }
   0x4   :  { %s32_s22 = sshll.u32 %s754_s21, 4  ;;  %s20_s24 = sshll.u32 %s755_s23, 4  ;;  %s33_s22 = int_to_ptr.vmem [resolvable:$true] %s32_s22  ;;  %s802_s24 = int_to_ptr.vmem [resolvable:$true] %s20_s24 }
   0x5   :  { %s636_s27 = scalar_lea.hbm %s1023_s1, 3072 }
   0x6   :  { %p637_p0 = scmp.ne.s32.totalorder %s1023_s1, %s636_s27  ;;  %p640_p1 = scmp.lt.u32.totalorder %s636_s27, %s1023_s1 }
   0x8   :  { %p642_p2 = pnand %p640_p1, %p637_p0 }
   0xa   :  { %645 = shalt.err (!%p642_p2)
}
   0xb   :  { %s646_s8 = scalar_lea.vmem %s33_s22, 3072  ;;  %p651_p4 = scmp.lt.s32.totalorder %s33_s22, %s33_s22 }
   0xc   :  { %p647_p3 = scmp.ne.s32.totalorder %s33_s22, %s646_s8  ;;  %p652_p5 = scmp.lt.s32.totalorder %s646_s8, %s646_s8 }
   0xe   :  { %p653_p6 = por %p652_p5, %p651_p4 }
  0x10   :  { %p654_p7 = pnand %p653_p6, %p647_p3 }
  0x12   :  { %657 = shalt.err (!%p654_p7)
}
  0x13   :  { %s756_s9 = smov 128   ;;  %s757_s10 = smov 8  }
  0x14   :  { %38 = dma.hbm_to_vmem [thread:$0]  %s1023_s1, 3072, %s33_s22, [#allocation6], %s756_s9, %s756_s9, %s757_s10  }
  0x15   :  { %s658_s15 = scalar_lea.hbm %s1022_s0, 512 }
  0x16   :  { %p659_p8 = scmp.ne.s32.totalorder %s1022_s0, %s658_s15  ;;  %p662_p9 = scmp.lt.u32.totalorder %s658_s15, %s1022_s0 }
  0x18   :  { %p664_p10 = pnand %p662_p9, %p659_p8 }
  0x1a   :  { %667 = shalt.err (!%p664_p10)
}
  0x1b   :  { %s668_s20 = scalar_lea.vmem %s802_s24, 512  ;;  %p673_p12 = scmp.lt.s32.totalorder %s802_s24, %s802_s24 }
  0x1c   :  { %p669_p11 = scmp.ne.s32.totalorder %s802_s24, %s668_s20  ;;  %p674_p13 = scmp.lt.s32.totalorder %s668_s20, %s668_s20 }
  0x1e   :  { %p675_p0 = por %p674_p13, %p673_p12 }
  0x20   :  { %p676_p1 = pnand %p675_p0, %p669_p11 }
  0x22   :  { %679 = shalt.err (!%p676_p1)
}
  0x23   :  { %26 = dma.hbm_to_vmem [thread:$0]  %s1022_s0, 512, %s802_s24, [#allocation3], %s756_s9, %s756_s9, %s757_s10  }
  0x24   :  { %s758_s22 = smov [#allocation7]   ;;  %s759_s25 = smov [#allocation8]  }
  0x25   :  { %s46_s23 = sshll.u32 %s758_s22, 4  ;;  %s58_s26 = sshll.u32 %s759_s25, 4  ;;  %s47_s23 = int_to_ptr.vmem [resolvable:$true] %s46_s23  ;;  %s839_s26 = int_to_ptr.vmem [resolvable:$true] %s58_s26 }
  0x26   :  { %s680_s29 = scalar_lea.hbm %s1025_s3, 256 }
  0x27   :  { %p681_p2 = scmp.ne.s32.totalorder %s1025_s3, %s680_s29  ;;  %p684_p3 = scmp.lt.u32.totalorder %s680_s29, %s1025_s3 }
  0x29   :  { %p686_p4 = pnand %p684_p3, %p681_p2 }
  0x2b   :  { %689 = shalt.err (!%p686_p4)
}
  0x2c   :  { %s690_s0 = scalar_lea.vmem %s47_s23, 256  ;;  %p695_p6 = scmp.lt.s32.totalorder %s47_s23, %s47_s23 }
  0x2d   :  { %p691_p5 = scmp.ne.s32.totalorder %s47_s23, %s690_s0  ;;  %p696_p7 = scmp.lt.s32.totalorder %s690_s0, %s690_s0 }
  0x2f   :  { %p697_p8 = por %p696_p7, %p695_p6 }
  0x31   :  { %p698_p9 = pnand %p697_p8, %p691_p5 }
  0x33   :  { %701 = shalt.err (!%p698_p9)
}
  0x34   :  { %52 = dma.hbm_to_vmem [thread:$0]  %s1025_s3, 256, %s47_s23, [#allocation6], %s756_s9, %s756_s9, %s757_s10  }
  0x35   :  { %s702_s15 = scalar_lea.hbm %s1026_s4, 2048 }
  0x36   :  { %p703_p10 = scmp.ne.s32.totalorder %s1026_s4, %s702_s15  ;;  %p706_p11 = scmp.lt.u32.totalorder %s702_s15, %s1026_s4 }
  0x38   :  { %p708_p12 = pnand %p706_p11, %p703_p10 }
  0x3a   :  { %711 = shalt.err (!%p708_p12)
}
  0x3b   :  { %s712_s20 = scalar_lea.vmem %s839_s26, 2048  ;;  %p717_p0 = scmp.lt.s32.totalorder %s839_s26, %s839_s26 }
  0x3c   :  { %p713_p13 = scmp.ne.s32.totalorder %s839_s26, %s712_s20  ;;  %p718_p1 = scmp.lt.s32.totalorder %s712_s20, %s712_s20 }
  0x3e   :  { %p719_p2 = por %p718_p1, %p717_p0 }
  0x40   :  { %p720_p3 = pnand %p719_p2, %p713_p13 }
  0x42   :  { %723 = shalt.err (!%p720_p3)
}
  0x43   :  { %64 = dma.hbm_to_vmem [thread:$0]  %s1026_s4, 2048, %s839_s26, [#allocation9], %s756_s9, %s756_s9, %s757_s10  }
  0x44   :  { %746 = dma.done.wait [#allocation3], 512  }
  0x45   :  { %747 = vsyncadd [#allocation3], 4294966784 }
  0x46   :  { %748 = dma.done.wait [#allocation6], 3328  }
  0x47   :  { %749 = vsyncadd [#allocation6], 4294963968 }
  0x48   :  { %750 = dma.done.wait [#allocation9], 2048  }
  0x49   :  { %751 = vsyncadd [#allocation9], 4294965248  ;;  %v87_v0 = vlaneseq  ;;  %v760_v1 = vmov 0.0|0.0   ;;  %v880_v3 = vld [vmem:[#allocation2] sm:$0xff]  ;;  %v882_v4 = vld [vmem:[#allocation2 + $0x8] sm:$0xff]  ;;  %s761_s4 = smov 32  }
  0x4a   :  { %538 = vmatprep.subr.bf16.mxu0 %v760_v1  ;;  %574 = vmatprep.subr.bf16.mxu1 %v760_v1  ;;  %v83_v5 = vrot.slane %v880_v3, 1  ;;  %v85_v6 = vrot.slane %v882_v4, 1  ;;  %v121_v7 = vrot.slane %v880_v3, 5  ;;  %v123_v8 = vrot.slane %v882_v4, 5  ;;  %v896_v13 = vld [vmem:[#allocation2 + $0x10] sm:$0xff]  ;;  %v898_v14 = vld [vmem:[#allocation2 + $0x18] sm:$0xff] }
  0x4b   :  { %v878_v2 = vshrl.u32 %v87_v0, 7  ;;  %v94_v9 = vrot.slane %v880_v3, 2  ;;  %v96_v10 = vrot.slane %v882_v4, 2  ;;  %v103_v11 = vrot.slane %v880_v3, 3  ;;  %v213_v27 = vld [vmem:[#allocation5] sm:$0xff]  ;;  %v214_v28 = vld [vmem:[#allocation5 + $0x8] sm:$0xff] }
  0x4c   :  { %v105_v12 = vrot.slane %v882_v4, 3  ;;  %v84_v23 = vrot.slane %v896_v13, 1  ;;  %v86_v24 = vrot.slane %v898_v14, 1  ;;  %v95_v31 = vrot.slane %v896_v13, 2  ;;  %s762_s9 = smov 96   ;;  %v215_v34 = vld [vmem:[#allocation5 + $0x10] sm:$0xff] }
  0x4d   :  { %vm89_vm0 = vcmp.lt.s32.totalorder %v878_v2, 7  ;;  %vm125_vm1 = vcmp.lt.s32.totalorder %v878_v2, 3  ;;  %vm98_vm2 = vcmp.lt.s32.totalorder %v878_v2, 6  ;;  %vm107_vm3 = vcmp.lt.s32.totalorder %v878_v2, 5  ;;  %v216_v35 = vld [vmem:[#allocation5 + $0x18] sm:$0xff]  ;;  %s763_s10 = smov 64  }
  0x4e   :  { %v90_v15 = vsel %vm89_vm0, %v83_v5, %v85_v6  ;;  %v92_v16 = vsel %vm89_vm0, %v85_v6, %v83_v5  ;;  %v126_v17 = vsel %vm125_vm1, %v121_v7, %v123_v8  ;;  %v99_v19 = vsel %vm98_vm2, %v94_v9, %v96_v10  ;;  %v217_v43 = vld [vmem:[#allocation5 + $0x20] sm:$0xff]  ;;  %v218_v44 = vld [vmem:[#allocation5 + $0x28] sm:$0xff]  ;;  %v219_v50 = vld [vmem:[#allocation5 + $0x30] sm:$0xff]  ;;  %s766_s26 = smov [#allocation10]  }
  0x4f   :  { %v611_v18 = vpack.i.bf16 %v92_v16, %v90_v15  ;;  %182 = vrot.lane.b32.xlu1 %v126_v17, %s761_s4  ;;  %v101_v20 = vsel %vm98_vm2, %v96_v10, %v94_v9  ;;  %v108_v21 = vsel %vm107_vm3, %v103_v11, %v105_v12  ;;  %v110_v22 = vsel %vm107_vm3, %v105_v12, %v103_v11  ;;  %v220_v51 = vld [vmem:[#allocation5 + $0x38] sm:$0xff]  ;;  %v221_v55 = vld [vmem:[#allocation5 + $0x40] sm:$0xff]  ;;  %v222_v56 = vld [vmem:[#allocation5 + $0x48] sm:$0xff]  ;;  %s469_s27 = sshll.u32 %s766_s26, 4  ;;  %s470_s27 = int_to_ptr.vmem [resolvable:$true] %s469_s27 }
  0x50   :  { %v616_v25 = vpack.i.bf16 %v101_v20, %v99_v19  ;;  %v621_v26 = vpack.i.bf16 %v110_v22, %v108_v21  ;;  %v91_v29 = vsel %vm89_vm0, %v84_v23, %v86_v24  ;;  %v93_v30 = vsel %vm89_vm0, %v86_v24, %v84_v23  ;;  %v223_v59 = vld [vmem:[#allocation5 + $0x50] sm:$0xff]  ;;  %v224_v60 = vld [vmem:[#allocation5 + $0x58] sm:$0xff]  ;;  %v225_v62 = vld [vmem:[#allocation5 + $0x60] sm:$0xff]  ;;  %s724_s28 = scalar_lea.vmem %s470_s27, 32  ;;  %p729_p5 = scmp.lt.s32.totalorder %s470_s27, %s470_s27 }
  0x51   :  { %612 = vrot.lane.b32.xlu0 %v611_v18, %s761_s4  ;;  %v97_v32 = vrot.slane %v898_v14, 2  ;;  %v626_v33 = vpack.i.bf16 %v93_v30, %v91_v29  ;;  %v122_v36 = vrot.slane %v896_v13, 5  ;;  %v124_v37 = vrot.slane %v898_v14, 5  ;;  %v226_v63 = vld [vmem:[#allocation5 + $0x68] sm:$0xff]  ;;  %v227_v5 = vld [vmem:[#allocation5 + $0x70] sm:$0xff]  ;;  %v228_v6 = vld [vmem:[#allocation5 + $0x78] sm:$0xff]  ;;  %p725_p4 = scmp.ne.s32.totalorder %s470_s27, %s724_s28  ;;  %p730_p6 = scmp.lt.s32.totalorder %s724_s28, %s724_s28 }
  0x52   :  { %v539_v38 = vpack.c.bf16 %v214_v28, %v213_v27  ;;  %v128_v39 = vsel %vm125_vm1, %v123_v8, %v121_v7  ;;  %v542_v42 = vpack.c.bf16 %v216_v35, %v215_v34  ;;  %v104_v47 = vrot.slane %v896_v13, 3  ;;  %v229_v8 = vld [vmem:[#allocation5 + $0x80] sm:$0xff]  ;;  %v230_v9 = vld [vmem:[#allocation5 + $0x88] sm:$0xff]  ;;  %v231_v11 = vld [vmem:[#allocation5 + $0x90] sm:$0xff] }
  0x53   :  { %622 = vrot.lane.b32.xlu1 %v621_v26, %s762_s9  ;;  %v100_v40 = vsel %vm98_vm2, %v95_v31, %v97_v32  ;;  %v102_v41 = vsel %vm98_vm2, %v97_v32, %v95_v31  ;;  %v127_v45 = vsel %vm125_vm1, %v122_v36, %v124_v37  ;;  %v106_v48 = vrot.slane %v898_v14, 3  ;;  %v232_v12 = vld [vmem:[#allocation5 + $0x98] sm:$0xff]  ;;  %v233_v16 = vld [vmem:[#allocation5 + $0xa0] sm:$0xff]  ;;  %v234_v17 = vld [vmem:[#allocation5 + $0xa8] sm:$0xff]  ;;  %p731_p7 = por %p730_p6, %p729_p5 }
  0x54   :  { %540 = vmatpush1.bf16.msra.mxu0 %v539_v38  ;;  %v631_v46 = vpack.i.bf16 %v102_v41, %v100_v40  ;;  %v545_v49 = vpack.c.bf16 %v218_v44, %v217_v43  ;;  %v129_v52 = vsel %vm125_vm1, %v124_v37, %v122_v36  ;;  %v548_v54 = vpack.c.bf16 %v220_v51, %v219_v50  ;;  %v235_v19 = vld [vmem:[#allocation5 + $0xb0] sm:$0xff]  ;;  %v236_v20 = vld [vmem:[#allocation5 + $0xb8] sm:$0xff] }
  0x55   :  { %617 = vrot.lane.b32.xlu0 %v616_v25, %s763_s10  ;;  %541 = vmatprep.subr.bf16.mxu0 %v760_v1  ;;  %v109_v53 = vsel %vm107_vm3, %v104_v47, %v106_v48  ;;  %v111_v57 = vsel %vm107_vm3, %v106_v48, %v104_v47  ;;  %v551_v58 = vpack.c.bf16 %v222_v56, %v221_v55  ;;  %v112_v22 = vrot.slane %v880_v3, 4  ;;  %p732_p8 = pnand %p731_p7, %p725_p4 }
  0x56   :  { %v554_v61 = vpack.c.bf16 %v224_v60, %v223_v59  ;;  %v557_v0 = vpack.c.bf16 %v226_v63, %v225_v62  ;;  %v560_v7 = vpack.c.bf16 %v228_v6, %v227_v5  ;;  %v563_v10 = vpack.c.bf16 %v230_v9, %v229_v8  ;;  %v363_v63 = vld [vmem:[#allocation8] sm:$0xff]  ;;  %v365_v6 = vld [vmem:[#allocation8 + $0x10] sm:$0xff]  ;;  %v368_v9 = vld [vmem:[#allocation8 + $0x28] sm:$0xff] }
  0x57   :  { %627 = vrot.lane.b32.xlu1 %v626_v33, %s761_s4  ;;  %v566_v15 = vpack.c.bf16 %v232_v12, %v231_v11  ;;  %v569_v18 = vpack.c.bf16 %v234_v17, %v233_v16  ;;  %v572_v21 = vpack.c.bf16 %v236_v20, %v235_v19  ;;  %v114_v23 = vrot.slane %v882_v4, 4  ;;  %v369_v11 = vld [vmem:[#allocation8 + $0x30] sm:$0xff]  ;;  %v370_v12 = vld [vmem:[#allocation8 + $0x38] sm:$0xff]  ;;  %v371_v16 = vld [vmem:[#allocation8 + $0x40] sm:$0xff] }
  0x58   :  { %543 = vmatpush1.bf16.msra.mxu0 %v542_v42  ;;  %vm116_vm4 = vcmp.lt.s32.totalorder %v878_v2, 4  ;;  %vm194_vm5 = vcmask 261120   ;;  %vm199_vm6 = vcmask 523264   ;;  %v113_v30 = vrot.slane %v896_v13, 4  ;;  %v372_v17 = vld [vmem:[#allocation8 + $0x48] sm:$0xff]  ;;  %v373_v19 = vld [vmem:[#allocation8 + $0x50] sm:$0xff] }
  0x59   :  { %184 = vrot.lane.b32.xlu0 %v128_v39, %s761_s4  ;;  %544 = vmatprep.subr.bf16.mxu0 %v760_v1  ;;  %v117_v24 = vsel %vm116_vm4, %v112_v22, %v114_v23  ;;  %v115_v31 = vrot.slane %v898_v14, 4  ;;  %vm204_vm7 = vcmask 785408   ;;  %v119_v37 = vsel %vm116_vm4, %v114_v23, %v112_v22  ;;  %v374_v20 = vld [vmem:[#allocation8 + $0x58] sm:$0xff]  ;;  %v375_v22 = vld [vmem:[#allocation8 + $0x60] sm:$0xff]  ;;  %v376_v23 = vld [vmem:[#allocation8 + $0x68] sm:$0xff] }
  0x5a   :  { %vm764_vm8 = vmmov 0   ;;  %vm389_vm9 = vcmask 1041409  }
  0x5b   :  { %186 = vrot.lane.b32.xlu1 %v127_v45, %s761_s4  ;;  %v118_v41 = vsel %vm116_vm4, %v113_v30, %v115_v31 }
  0x5c   :  { %546 = vmatpush1.bf16.msra.mxu0 %v545_v49 }
  0x5d   :  { %632 = vrot.lane.b32.xlu0 %v631_v46, %s763_s10  ;;  %547 = vmatprep.subr.bf16.mxu0 %v760_v1 }
  0x5f   :  { %188 = vrot.lane.b32.xlu1 %v129_v52, %s761_s4 }
  0x60   :  { %549 = vmatpush1.bf16.msra.mxu0 %v548_v54 }
  0x61   :  { %170 = vrot.lane.b32.xlu0 %v109_v53, %s762_s9  ;;  %550 = vmatprep.subr.bf16.mxu0 %v760_v1 }
  0x64   :  { %552 = vmatpush1.bf16.msra.mxu0 %v551_v58 }
  0x65   :  { %172 = vrot.lane.b32.xlu0 %v111_v57, %s762_s9  ;;  %553 = vmatprep.subr.bf16.mxu0 %v760_v1 }
  0x68   :  { %555 = vmatpush1.bf16.msra.mxu0 %v554_v61 }
  0x69   :  { %556 = vmatprep.subr.bf16.mxu0 %v760_v1 }
  0x6c   :  { %558 = vmatpush1.bf16.msra.mxu0 %v557_v0  ;;  %v364_v0 = vld [vmem:[#allocation8 + $0x8] sm:$0xff] }
  0x6d   :  { %559 = vmatprep.subr.bf16.mxu0 %v760_v1  ;;  %v575_v5 = vpack.c.bf16 %v364_v0, %v363_v63 }
  0x6f   :  { %576 = vmatpush3.bf16.msra.mxu1 %v575_v5 }
  0x70   :  { %561 = vmatpush1.bf16.msra.mxu0 %v560_v7  ;;  %577 = vmatprep.subr.bf16.mxu1 %v760_v1  ;;  %v366_v7 = vld [vmem:[#allocation8 + $0x18] sm:$0xff] }
  0x71   :  { %562 = vmatprep.subr.bf16.mxu0 %v760_v1  ;;  %v578_v8 = vpack.c.bf16 %v366_v7, %v365_v6 }
  0x73   :  { %579 = vmatpush3.bf16.msra.mxu1 %v578_v8 }
  0x74   :  { %564 = vmatpush1.bf16.msra.mxu0 %v563_v10  ;;  %580 = vmatprep.subr.bf16.mxu1 %v760_v1 }
  0x75   :  { %565 = vmatprep.subr.bf16.mxu0 %v760_v1 }
  0x78   :  { %567 = vmatpush1.bf16.msra.mxu0 %v566_v15  ;;  %v584_v15 = vpack.c.bf16 %v370_v12, %v369_v11 }
  0x79   :  { %568 = vmatprep.subr.bf16.mxu0 %v760_v1 }
  0x7c   :  { %570 = vmatpush1.bf16.msra.mxu0 %v569_v18  ;;  %v587_v18 = vpack.c.bf16 %v372_v17, %v371_v16 }
  0x7d   :  { %571 = vmatprep.subr.bf16.mxu0 %v760_v1 }
  0x80   :  { %573 = vmatpush1.bf16.msra.mxu0 %v572_v21  ;;  %v590_v21 = vpack.c.bf16 %v374_v20, %v373_v19 }
  0xc1   :  { %v183_v25 = vpop.permute.xlu1 %182 }
  0xc2   :  { %v209_v26 = vsel %vm194_vm5, %v117_v24, %v183_v25  ;;  %v593_v24 = vpack.c.bf16 %v376_v23, %v375_v22  ;;  %v377_v25 = vld [vmem:[#allocation8 + $0x70] sm:$0xff] }
  0xc3   :  { %v613_v27 = vpop.permute.xlu0 %612  ;;  %480 = vmatprep.mubr.msk.f32.mxu0 %vm199_vm6, %v209_v26  ;;  %v378_v26 = vld [vmem:[#allocation8 + $0x78] sm:$0xff] }
  0xc4   :  { %v614_v28 = vunpack.i.l.bf16 %v613_v27  ;;  %v615_v32 = vunpack.i.h.bf16 %v613_v27  ;;  %v596_v27 = vpack.c.bf16 %v378_v26, %v377_v25 }
  0xc5   :  { %v623_v29 = vpop.permute.xlu1 %622 }
  0xc6   :  { %v624_v34 = vunpack.i.l.bf16 %v623_v29  ;;  %v195_v38 = vsel %vm194_vm5, %v880_v3, %v614_v28  ;;  %v625_v42 = vunpack.i.h.bf16 %v623_v29  ;;  %v196_v46 = vsel %vm194_vm5, %v882_v4, %v615_v32  ;;  %v335_v32 = vld [vmem:[#allocation7 + $0x8] sm:$0xff] }
  0xc7   :  { %v618_v33 = vpop.permute.xlu0 %617  ;;  %v120_v4 = vsel %vm116_vm4, %v115_v31, %v113_v30  ;;  %v765_v28 = vmov 0.0   ;;  %v334_v31 = vld [vmem:[#allocation7] sm:$0xff] }
  0xc8   :  { %v620_v35 = vunpack.i.h.bf16 %v618_v33  ;;  %v619_v36 = vunpack.i.l.bf16 %v618_v33  ;;  %535 = vmatprep.mubr.msk.f32.mxu1 %vm764_vm8, %v765_v28 }
  0xc9   :  { %v628_v39 = vpop.permute.xlu1 %627 }
  0xca   :  { %v200_v40 = vsel %vm199_vm6, %v195_v38, %v619_v36  ;;  %v629_v45 = vunpack.i.l.bf16 %v628_v39  ;;  %v201_v48 = vsel %vm199_vm6, %v196_v46, %v620_v35  ;;  %v630_v53 = vunpack.i.h.bf16 %v628_v39 }
  0xcb   :  { %v185_v43 = vpop.permute.xlu0 %184  ;;  %v205_v44 = vsel %vm204_vm7, %v200_v40, %v624_v34  ;;  %v206_v51 = vsel %vm204_vm7, %v201_v48, %v625_v42 }
  0xcc   :  { %v210_v47 = vsel %vm194_vm5, %v119_v37, %v185_v43  ;;  %314 = vmatmul.mubr.f32.vlgmr.msra.gmra.mrb[0].mxu0 %v205_v44  ;;  %v197_v52 = vsel %vm194_vm5, %v896_v13, %v629_v45  ;;  %v198_v13 = vsel %vm194_vm5, %v898_v14, %v630_v53  ;;  %v367_v14 = vld [vmem:[#allocation8 + $0x20] sm:$0xff] }
  0xcd   :  { %481 = vmatprep.mubr.msk.f32.mxu0 %vm199_vm6, %v210_v47  ;;  %v187_v3 = vpop.permute.xlu1 %186  ;;  %v581_v10 = vpack.c.bf16 %v368_v9, %v367_v14 }
  0xce   :  { %v211_v49 = vsel %vm194_vm5, %v118_v41, %v187_v3 }
  0xcf   :  { %v633_v50 = vpop.permute.xlu0 %632  ;;  %582 = vmatpush3.bf16.msra.mxu1 %v581_v10 }
  0xd0   :  { %v634_v54 = vunpack.i.l.bf16 %v633_v50  ;;  %319 = vmatmul.mubr.f32.gmra.mrb[2].mxu0 %v206_v51  ;;  %v635_v57 = vunpack.i.h.bf16 %v633_v50  ;;  %583 = vmatprep.subr.bf16.mxu1 %v760_v1 }
  0xd1   :  { %482 = vmatprep.mubr.msk.f32.mxu0 %vm199_vm6, %v211_v49  ;;  %v189_v55 = vpop.permute.xlu1 %188 }
  0xd2   :  { %v202_v56 = vsel %vm199_vm6, %v197_v52, %v634_v54  ;;  %v212_v59 = vsel %vm194_vm5, %v120_v4, %v189_v55  ;;  %v203_v2 = vsel %vm199_vm6, %v198_v13, %v635_v57  ;;  %v484_v4 = vld [vmem:[%s1024_s2] ss:$0 sm:$0xff] }
  0xd3   :  { %v171_v58 = vpop.permute.xlu0 %170  ;;  %585 = vmatpush3.bf16.msra.mxu1 %v584_v15 }
  0xd4   :  { %v207_v60 = vsel %vm204_vm7, %v202_v56, %v171_v58  ;;  %586 = vmatprep.subr.bf16.mxu1 %v760_v1 }
  0xd5   :  { %324 = vmatmul.mubr.f32.gmra.mrb[4].mxu0 %v207_v60 }
  0xd6   :  { %483 = vmatprep.mubr.msk.f32.mxu0 %vm199_vm6, %v212_v59  ;;  %v485_v59 = vld [vmem:[%s1027_s5] ss:$0 sm:$0xff] }
  0xd7   :  { %v173_v61 = vpop.permute.xlu0 %172  ;;  %588 = vmatpush3.bf16.msra.mxu1 %v587_v18 }
  0xd8   :  { %v208_v62 = vsel %vm204_vm7, %v203_v2, %v173_v61  ;;  %589 = vmatprep.subr.bf16.mxu1 %v760_v1 }
  0xd9   :  { %329 = vmatmul.mubr.f32.gmra.mrb[6].mxu0 %v208_v62 }
  0xdb   :  { %591 = vmatpush3.bf16.msra.mxu1 %v590_v21 }
  0xdc   :  { %592 = vmatprep.subr.bf16.mxu1 %v760_v1 }
  0xdf   :  { %594 = vmatpush3.bf16.msra.mxu1 %v593_v24 }
  0xe0   :  { %595 = vmatprep.subr.bf16.mxu1 %v760_v1 }
  0xe3   :  { %597 = vmatpush3.bf16.msra.mxu1 %v596_v27 }
 0x19f   :  { %v315_v29 = vpop.f32.mrb[0].mxu0 }
 0x1a0   :  { %v317_v30 = vpop.f32.mrb[1].mxu0  ;;  %v336_v34 = vadd.f32 %v334_v31, %v315_v29 }
 0x1a3   :  { %v320_v33 = vpop.f32.mrb[2].mxu0 }
 0x1a4   :  { %v337_v35 = vadd.f32 %v335_v32, %v320_v33  ;;  %v322_v36 = vpop.f32.mrb[3].mxu0 }
 0x1a6   :  { %v340_v37 = vmax.f32 %v336_v34, %v337_v35 }
 0x1a8   :  { %v341_v38 = vrot.slane %v340_v37, 4  ;;  %v325_v39 = vpop.f32.mrb[4].mxu0 }
 0x1a9   :  { %v327_v40 = vpop.f32.mrb[5].mxu0  ;;  %v338_v1 = vadd.f32 %v334_v31, %v325_v39 }
 0x1aa   :  { %v342_v41 = vmax.f32 %v340_v37, %v341_v38 }
 0x1ac   :  { %v330_v42 = vpop.f32.mrb[6].mxu0  ;;  %v343_v45 = vrot.slane %v342_v41, 2 }
 0x1ad   :  { %v339_v43 = vadd.f32 %v335_v32, %v330_v42  ;;  %v332_v44 = vpop.f32.mrb[7].mxu0 }
 0x1ae   :  { %v344_v48 = vmax.f32 %v342_v41, %v343_v45 }
 0x1af   :  { %v347_v46 = vmax.f32 %v338_v1, %v339_v43 }
 0x1b0   :  { %v345_v50 = vrot.slane %v344_v48, 1 }
 0x1b1   :  { %v348_v47 = vrot.slane %v347_v46, 4 }
 0x1b2   :  { %v346_v54 = vmax.f32 %v344_v48, %v345_v50 }
 0x1b3   :  { %v349_v3 = vmax.f32 %v347_v46, %v348_v47 }
 0x1b4   :  { %v361_v56 = vadd.f32 %v484_v4, %v346_v54 }
 0x1b5   :  { %v350_v49 = vrot.slane %v349_v3, 2 }
 0x1b7   :  { %v351_v51 = vmax.f32 %v349_v3, %v350_v49 }
 0x1b9   :  { %v352_v52 = vrot.slane %v351_v51, 1 }
 0x1bb   :  { %v353_v53 = vmax.f32 %v351_v51, %v352_v52 }
 0x1bd   :  { %v362_v55 = vadd.f32 %v484_v4, %v353_v53 }
 0x1bf   :  { %v388_v57 = vrot.slane %v362_v55, 7 }
 0x1c1   :  { %v390_v58 = vsel %vm389_vm9, %v388_v57, %v361_v56 }
 0x1c2   :  { %536 = vmatmul.mubr.f32.vlgmr.msra.gmra.mrb[0].mxu1 %v390_v58 }
 0x295   :  { %v458_v60 = vpop.f32.mrb[0].mxu1 }
 0x296   :  { %v459_v13 = vadd.f32 %v485_v59, %v458_v60  ;;  %v537_v61 = vpop.f32.mrb[1].mxu1 }
 0x298   :  { %462 = vst [vmem:[#allocation10] sm:$0x3] %v459_v13 }
 0x299   :  { %735 = shalt.err (!%p732_p8)
}
 0x29a   :  { %s736_s30 = scalar_lea.hbm %s1028_s6, 32 }
 0x29b   :  { %p737_p9 = scmp.ne.s32.totalorder %s1028_s6, %s736_s30  ;;  %p740_p10 = scmp.lt.u32.totalorder %s736_s30, %s1028_s6 }
 0x29d   :  { %p742_p11 = pnand %p740_p10, %p737_p9 }
 0x29f   :  { %745 = shalt.err (!%p742_p11)
}
 0x2a0   :  { %472 = dma.vmem_to_hbm [thread:$0]  %s470_s27, 32, %s1028_s6, [#allocation4]  }
 0x2a1   :  { %752 = dma.done.wait [#allocation4], 32  }
 0x2a2   :  { %753 = vsyncadd [#allocation4], 4294967264 }
 0x2a3   :  { %476 = vsyncpa [#allocation3], 1 }
 0x2a4   :  { %477 = vsyncpa [#allocation6], 1 }
 0x2a5   :  { %478 = vsyncpa [#allocation9], 1 }
 0x2a6   :  { %479 = vsyncpa [#allocation4], 1 }

// kernel: tpu_custom_call.1
= control target key start
LH: loop header
LB: loop body
LE: loop exit
PB: predicated region body
PF: predicated region fallthrough
CT: control target
= control target key end

     0   :  { %11 = vsyncpa [#allocation3], 0  ;;  %s1011_s0 = inlined_call_operand.hbm [shape: f32[2,16,32], index: 0, kind: input, shape index: {}]   ;;  %s1012_s1 = inlined_call_operand.hbm [shape: f32[192,128], index: 1, kind: input, shape index: {}]   ;;  %s1013_s2 = inlined_call_operand.vmem [shape: f32[1,128], index: 2, kind: input, shape index: {}]   ;;  %s1014_s3 = inlined_call_operand.hbm [shape: f32[16,128], index: 3, kind: input, shape index: {}]   ;;  %s1015_s4 = inlined_call_operand.hbm [shape: f32[128,128], index: 4, kind: input, shape index: {}]   ;;  %s1016_s5 = inlined_call_operand.vmem [shape: f32[1,128], index: 5, kind: input, shape index: {}]   ;;  %s1017_s6 = inlined_call_operand.hbm [shape: f32[2,128], index: 6, kind: output, shape index: {}]  }
   0x1   :  { %12 = vsyncpa [#allocation6], 0 }
   0x2   :  { %13 = vsyncpa [#allocation9], 0 }
   0x3   :  { %14 = vsyncpa [#allocation4], 0  ;;  %s770_s21 = smov [#allocation5]   ;;  %s771_s23 = smov [#allocation2]  }
   0x4   :  { %s32_s22 = sshll.u32 %s770_s21, 4  ;;  %s20_s24 = sshll.u32 %s771_s23, 4  ;;  %s33_s22 = int_to_ptr.vmem [resolvable:$true] %s32_s22  ;;  %s818_s24 = int_to_ptr.vmem [resolvable:$true] %s20_s24 }
   0x5   :  { %s652_s27 = scalar_lea.hbm %s1012_s1, 3072 }
   0x6   :  { %p653_p0 = scmp.ne.s32.totalorder %s1012_s1, %s652_s27  ;;  %p656_p1 = scmp.lt.u32.totalorder %s652_s27, %s1012_s1 }
   0x8   :  { %p658_p2 = pnand %p656_p1, %p653_p0 }
   0xa   :  { %661 = shalt.err (!%p658_p2)
}
   0xb   :  { %s662_s8 = scalar_lea.vmem %s33_s22, 3072  ;;  %p667_p4 = scmp.lt.s32.totalorder %s33_s22, %s33_s22 }
   0xc   :  { %p663_p3 = scmp.ne.s32.totalorder %s33_s22, %s662_s8  ;;  %p668_p5 = scmp.lt.s32.totalorder %s662_s8, %s662_s8 }
   0xe   :  { %p669_p6 = por %p668_p5, %p667_p4 }
  0x10   :  { %p670_p7 = pnand %p669_p6, %p663_p3 }
  0x12   :  { %673 = shalt.err (!%p670_p7)
}
  0x13   :  { %s772_s9 = smov 128   ;;  %s773_s10 = smov 8  }
  0x14   :  { %38 = dma.hbm_to_vmem [thread:$0]  %s1012_s1, 3072, %s33_s22, [#allocation6], %s772_s9, %s772_s9, %s773_s10  }
  0x15   :  { %s674_s15 = scalar_lea.hbm %s1011_s0, 512 }
  0x16   :  { %p675_p8 = scmp.ne.s32.totalorder %s1011_s0, %s674_s15  ;;  %p678_p9 = scmp.lt.u32.totalorder %s674_s15, %s1011_s0 }
  0x18   :  { %p680_p10 = pnand %p678_p9, %p675_p8 }
  0x1a   :  { %683 = shalt.err (!%p680_p10)
}
  0x1b   :  { %s684_s20 = scalar_lea.vmem %s818_s24, 512  ;;  %p689_p12 = scmp.lt.s32.totalorder %s818_s24, %s818_s24 }
  0x1c   :  { %p685_p11 = scmp.ne.s32.totalorder %s818_s24, %s684_s20  ;;  %p690_p13 = scmp.lt.s32.totalorder %s684_s20, %s684_s20 }
  0x1e   :  { %p691_p0 = por %p690_p13, %p689_p12 }
  0x20   :  { %p692_p1 = pnand %p691_p0, %p685_p11 }
  0x22   :  { %695 = shalt.err (!%p692_p1)
}
  0x23   :  { %26 = dma.hbm_to_vmem [thread:$0]  %s1011_s0, 512, %s818_s24, [#allocation3], %s772_s9, %s772_s9, %s773_s10  }
  0x24   :  { %s774_s22 = smov [#allocation7]   ;;  %s775_s25 = smov [#allocation8]  }
  0x25   :  { %s46_s23 = sshll.u32 %s774_s22, 4  ;;  %s58_s26 = sshll.u32 %s775_s25, 4  ;;  %s47_s23 = int_to_ptr.vmem [resolvable:$true] %s46_s23  ;;  %s855_s26 = int_to_ptr.vmem [resolvable:$true] %s58_s26 }
  0x26   :  { %s696_s29 = scalar_lea.hbm %s1014_s3, 256 }
  0x27   :  { %p697_p2 = scmp.ne.s32.totalorder %s1014_s3, %s696_s29  ;;  %p700_p3 = scmp.lt.u32.totalorder %s696_s29, %s1014_s3 }
  0x29   :  { %p702_p4 = pnand %p700_p3, %p697_p2 }
  0x2b   :  { %705 = shalt.err (!%p702_p4)
}
  0x2c   :  { %s706_s0 = scalar_lea.vmem %s47_s23, 256  ;;  %p711_p6 = scmp.lt.s32.totalorder %s47_s23, %s47_s23 }
  0x2d   :  { %p707_p5 = scmp.ne.s32.totalorder %s47_s23, %s706_s0  ;;  %p712_p7 = scmp.lt.s32.totalorder %s706_s0, %s706_s0 }
  0x2f   :  { %p713_p8 = por %p712_p7, %p711_p6 }
  0x31   :  { %p714_p9 = pnand %p713_p8, %p707_p5 }
  0x33   :  { %717 = shalt.err (!%p714_p9)
}
  0x34   :  { %52 = dma.hbm_to_vmem [thread:$0]  %s1014_s3, 256, %s47_s23, [#allocation6], %s772_s9, %s772_s9, %s773_s10  }
  0x35   :  { %s718_s15 = scalar_lea.hbm %s1015_s4, 2048 }
  0x36   :  { %p719_p10 = scmp.ne.s32.totalorder %s1015_s4, %s718_s15  ;;  %p722_p11 = scmp.lt.u32.totalorder %s718_s15, %s1015_s4 }
  0x38   :  { %p724_p12 = pnand %p722_p11, %p719_p10 }
  0x3a   :  { %727 = shalt.err (!%p724_p12)
}
  0x3b   :  { %s728_s20 = scalar_lea.vmem %s855_s26, 2048  ;;  %p733_p0 = scmp.lt.s32.totalorder %s855_s26, %s855_s26 }
  0x3c   :  { %p729_p13 = scmp.ne.s32.totalorder %s855_s26, %s728_s20  ;;  %p734_p1 = scmp.lt.s32.totalorder %s728_s20, %s728_s20 }
  0x3e   :  { %p735_p2 = por %p734_p1, %p733_p0 }
  0x40   :  { %p736_p3 = pnand %p735_p2, %p729_p13 }
  0x42   :  { %739 = shalt.err (!%p736_p3)
}
  0x43   :  { %64 = dma.hbm_to_vmem [thread:$0]  %s1015_s4, 2048, %s855_s26, [#allocation9], %s772_s9, %s772_s9, %s773_s10  }
  0x44   :  { %762 = dma.done.wait [#allocation3], 512  }
  0x45   :  { %763 = vsyncadd [#allocation3], 4294966784 }
  0x46   :  { %764 = dma.done.wait [#allocation6], 3328  }
  0x47   :  { %765 = vsyncadd [#allocation6], 4294963968 }
  0x48   :  { %766 = dma.done.wait [#allocation9], 2048  }
  0x49   :  { %767 = vsyncadd [#allocation9], 4294965248  ;;  %v776_v0 = vmov 0.0|0.0   ;;  %v894_v1 = vld [vmem:[#allocation2] sm:$0xff]  ;;  %v896_v2 = vld [vmem:[#allocation2 + $0x8] sm:$0xff]  ;;  %vm87_vm0 = vcmask 1046528  }
  0x4a   :  { %554 = vmatprep.subr.bf16.mxu0 %v776_v0  ;;  %590 = vmatprep.subr.bf16.mxu1 %v776_v0  ;;  %vm141_vm1 = vcmask 1042432   ;;  %vm100_vm2 = vcmask 1045504   ;;  %vm113_vm3 = vcmask 1044480   ;;  %v88_v3 = vrot.slane %v894_v1, 1  ;;  %v906_v11 = vld [vmem:[#allocation2 + $0x10] sm:$0xff]  ;;  %v908_v12 = vld [vmem:[#allocation2 + $0x18] sm:$0xff] }
  0x4b   :  { %v89_v4 = vrot.slane %v896_v2, 1  ;;  %v142_v5 = vrot.slane %v894_v1, 5  ;;  %v143_v6 = vrot.slane %v896_v2, 5  ;;  %v101_v7 = vrot.slane %v894_v1, 2  ;;  %s777_s4 = smov 32   ;;  %v229_v25 = vld [vmem:[#allocation5] sm:$0xff] }
  0x4c   :  { %v102_v8 = vrot.slane %v896_v2, 2  ;;  %v114_v9 = vrot.slane %v894_v1, 3  ;;  %v115_v10 = vrot.slane %v896_v2, 3  ;;  %v91_v21 = vrot.slane %v906_v11, 1  ;;  %v230_v26 = vld [vmem:[#allocation5 + $0x8] sm:$0xff]  ;;  %s778_s9 = smov 96  }
  0x4d   :  { %v90_v13 = vsel %vm87_vm0, %v88_v3, %v89_v4  ;;  %v98_v14 = vsel %vm87_vm0, %v89_v4, %v88_v3  ;;  %v144_v15 = vsel %vm141_vm1, %v142_v5, %v143_v6  ;;  %v92_v22 = vrot.slane %v908_v12, 1  ;;  %v231_v32 = vld [vmem:[#allocation5 + $0x10] sm:$0xff]  ;;  %v232_v33 = vld [vmem:[#allocation5 + $0x18] sm:$0xff]  ;;  %s779_s10 = smov 64   ;;  %v233_v41 = vld [vmem:[#allocation5 + $0x20] sm:$0xff]  ;;  %s782_s26 = smov [#allocation10]  }
  0x4e   :  { %v627_v16 = vpack.i.bf16 %v98_v14, %v90_v13  ;;  %198 = vrot.lane.b32.xlu1 %v144_v15, %s777_s4  ;;  %v103_v17 = vsel %vm100_vm2, %v101_v7, %v102_v8  ;;  %v111_v18 = vsel %vm100_vm2, %v102_v8, %v101_v7  ;;  %v116_v19 = vsel %vm113_vm3, %v114_v9, %v115_v10  ;;  %v234_v42 = vld [vmem:[#allocation5 + $0x28] sm:$0xff]  ;;  %v235_v48 = vld [vmem:[#allocation5 + $0x30] sm:$0xff]  ;;  %v236_v49 = vld [vmem:[#allocation5 + $0x38] sm:$0xff]  ;;  %s485_s27 = sshll.u32 %s782_s26, 4  ;;  %s486_s27 = int_to_ptr.vmem [resolvable:$true] %s485_s27 }
  0x4f   :  { %v124_v20 = vsel %vm113_vm3, %v115_v10, %v114_v9  ;;  %v632_v23 = vpack.i.bf16 %v111_v18, %v103_v17  ;;  %v93_v27 = vsel %vm87_vm0, %v91_v21, %v92_v22  ;;  %v99_v28 = vsel %vm87_vm0, %v92_v22, %v91_v21  ;;  %v237_v53 = vld [vmem:[#allocation5 + $0x40] sm:$0xff]  ;;  %v238_v54 = vld [vmem:[#allocation5 + $0x48] sm:$0xff]  ;;  %v239_v57 = vld [vmem:[#allocation5 + $0x50] sm:$0xff]  ;;  %s740_s28 = scalar_lea.vmem %s486_s27, 32  ;;  %p745_p5 = scmp.lt.s32.totalorder %s486_s27, %s486_s27 }
  0x50   :  { %628 = vrot.lane.b32.xlu0 %v627_v16, %s777_s4  ;;  %v637_v24 = vpack.i.bf16 %v124_v20, %v116_v19  ;;  %v104_v29 = vrot.slane %v906_v11, 2  ;;  %v105_v30 = vrot.slane %v908_v12, 2  ;;  %v642_v31 = vpack.i.bf16 %v99_v28, %v93_v27  ;;  %v240_v58 = vld [vmem:[#allocation5 + $0x58] sm:$0xff]  ;;  %v241_v60 = vld [vmem:[#allocation5 + $0x60] sm:$0xff]  ;;  %v242_v61 = vld [vmem:[#allocation5 + $0x68] sm:$0xff]  ;;  %p741_p4 = scmp.ne.s32.totalorder %s486_s27, %s740_s28  ;;  %p746_p6 = scmp.lt.s32.totalorder %s740_s28, %s740_s28 }
  0x51   :  { %v145_v34 = vrot.slane %v906_v11, 5  ;;  %v146_v35 = vrot.slane %v908_v12, 5  ;;  %v555_v36 = vpack.c.bf16 %v230_v26, %v229_v25  ;;  %v152_v37 = vsel %vm141_vm1, %v143_v6, %v142_v5  ;;  %v243_v63 = vld [vmem:[#allocation5 + $0x70] sm:$0xff]  ;;  %v244_v3 = vld [vmem:[#allocation5 + $0x78] sm:$0xff]  ;;  %v245_v5 = vld [vmem:[#allocation5 + $0x80] sm:$0xff] }
  0x52   :  { %638 = vrot.lane.b32.xlu1 %v637_v24, %s778_s9  ;;  %v106_v38 = vsel %vm100_vm2, %v104_v29, %v105_v30  ;;  %v112_v39 = vsel %vm100_vm2, %v105_v30, %v104_v29  ;;  %v558_v40 = vpack.c.bf16 %v232_v33, %v231_v32  ;;  %v117_v45 = vrot.slane %v906_v11, 3  ;;  %v246_v6 = vld [vmem:[#allocation5 + $0x88] sm:$0xff]  ;;  %v247_v8 = vld [vmem:[#allocation5 + $0x90] sm:$0xff]  ;;  %v248_v9 = vld [vmem:[#allocation5 + $0x98] sm:$0xff]  ;;  %p747_p7 = por %p746_p6, %p745_p5 }
  0x53   :  { %556 = vmatpush1.bf16.msra.mxu0 %v555_v36  ;;  %v147_v43 = vsel %vm141_vm1, %v145_v34, %v146_v35  ;;  %v647_v44 = vpack.i.bf16 %v112_v39, %v106_v38  ;;  %v118_v46 = vrot.slane %v908_v12, 3  ;;  %v561_v47 = vpack.c.bf16 %v234_v42, %v233_v41  ;;  %v249_v13 = vld [vmem:[#allocation5 + $0xa0] sm:$0xff]  ;;  %v250_v14 = vld [vmem:[#allocation5 + $0xa8] sm:$0xff]  ;;  %v251_v16 = vld [vmem:[#allocation5 + $0xb0] sm:$0xff] }
  0x54   :  { %633 = vrot.lane.b32.xlu0 %v632_v23, %s779_s10  ;;  %557 = vmatprep.subr.bf16.mxu0 %v776_v0  ;;  %v153_v50 = vsel %vm141_vm1, %v146_v35, %v145_v34  ;;  %v564_v52 = vpack.c.bf16 %v236_v49, %v235_v48  ;;  %v567_v56 = vpack.c.bf16 %v238_v54, %v237_v53  ;;  %v252_v17 = vld [vmem:[#allocation5 + $0xb8] sm:$0xff]  ;;  %v127_v19 = vrot.slane %v894_v1, 4  ;;  %p748_p8 = pnand %p747_p7, %p741_p4 }
  0x55   :  { %v119_v51 = vsel %vm113_vm3, %v117_v45, %v118_v46  ;;  %v125_v55 = vsel %vm113_vm3, %v118_v46, %v117_v45  ;;  %v570_v59 = vpack.c.bf16 %v240_v58, %v239_v57  ;;  %v573_v62 = vpack.c.bf16 %v242_v61, %v241_v60  ;;  %v379_v61 = vld [vmem:[#allocation8] sm:$0xff] }
  0x56   :  { %643 = vrot.lane.b32.xlu1 %v642_v31, %s777_s4  ;;  %v576_v4 = vpack.c.bf16 %v244_v3, %v243_v63  ;;  %v579_v7 = vpack.c.bf16 %v246_v6, %v245_v5  ;;  %v582_v10 = vpack.c.bf16 %v248_v9, %v247_v8  ;;  %v585_v15 = vpack.c.bf16 %v250_v14, %v249_v13  ;;  %v381_v3 = vld [vmem:[#allocation8 + $0x10] sm:$0xff]  ;;  %v384_v6 = vld [vmem:[#allocation8 + $0x28] sm:$0xff]  ;;  %v386_v9 = vld [vmem:[#allocation8 + $0x38] sm:$0xff] }
  0x57   :  { %559 = vmatpush1.bf16.msra.mxu0 %v558_v40  ;;  %v588_v18 = vpack.c.bf16 %v252_v17, %v251_v16  ;;  %v128_v20 = vrot.slane %v896_v2, 4  ;;  %vm126_vm4 = vcmask 1043456   ;;  %vm210_vm5 = vcmask 261120   ;;  %v385_v8 = vld [vmem:[#allocation8 + $0x30] sm:$0xff]  ;;  %v387_v13 = vld [vmem:[#allocation8 + $0x40] sm:$0xff]  ;;  %v388_v14 = vld [vmem:[#allocation8 + $0x48] sm:$0xff] }
  0x58   :  { %200 = vrot.lane.b32.xlu0 %v152_v37, %s777_s4  ;;  %560 = vmatprep.subr.bf16.mxu0 %v776_v0  ;;  %vm215_vm6 = vcmask 523264   ;;  %v130_v27 = vrot.slane %v906_v11, 4  ;;  %v131_v28 = vrot.slane %v908_v12, 4  ;;  %vm220_vm7 = vcmask 785408   ;;  %v389_v16 = vld [vmem:[#allocation8 + $0x50] sm:$0xff]  ;;  %v390_v17 = vld [vmem:[#allocation8 + $0x58] sm:$0xff] }
  0x59   :  { %v129_v21 = vsel %vm126_vm4, %v127_v19, %v128_v20  ;;  %v139_v34 = vsel %vm126_vm4, %v128_v20, %v127_v19  ;;  %v391_v19 = vld [vmem:[#allocation8 + $0x60] sm:$0xff]  ;;  %v392_v20 = vld [vmem:[#allocation8 + $0x68] sm:$0xff]  ;;  %vm780_vm8 = vmmov 0   ;;  %vm405_vm9 = vcmask 1041409  }
  0x5a   :  { %202 = vrot.lane.b32.xlu1 %v147_v43, %s777_s4  ;;  %v132_v38 = vsel %vm126_vm4, %v130_v27, %v131_v28 }
  0x5b   :  { %562 = vmatpush1.bf16.msra.mxu0 %v561_v47 }
  0x5c   :  { %648 = vrot.lane.b32.xlu0 %v647_v44, %s779_s10  ;;  %563 = vmatprep.subr.bf16.mxu0 %v776_v0 }
  0x5e   :  { %204 = vrot.lane.b32.xlu1 %v153_v50, %s777_s4 }
  0x5f   :  { %565 = vmatpush1.bf16.msra.mxu0 %v564_v52 }
  0x60   :  { %188 = vrot.lane.b32.xlu0 %v119_v51, %s778_s9  ;;  %566 = vmatprep.subr.bf16.mxu0 %v776_v0 }
  0x63   :  { %568 = vmatpush1.bf16.msra.mxu0 %v567_v56 }
  0x64   :  { %190 = vrot.lane.b32.xlu0 %v125_v55, %s778_s9  ;;  %569 = vmatprep.subr.bf16.mxu0 %v776_v0 }
  0x67   :  { %571 = vmatpush1.bf16.msra.mxu0 %v570_v59 }
  0x68   :  { %572 = vmatprep.subr.bf16.mxu0 %v776_v0 }
  0x6b   :  { %574 = vmatpush1.bf16.msra.mxu0 %v573_v62  ;;  %v380_v62 = vld [vmem:[#allocation8 + $0x8] sm:$0xff] }
  0x6c   :  { %575 = vmatprep.subr.bf16.mxu0 %v776_v0  ;;  %v591_v63 = vpack.c.bf16 %v380_v62, %v379_v61 }
  0x6e   :  { %592 = vmatpush3.bf16.msra.mxu1 %v591_v63 }
  0x6f   :  { %577 = vmatpush1.bf16.msra.mxu0 %v576_v4  ;;  %593 = vmatprep.subr.bf16.mxu1 %v776_v0  ;;  %v382_v4 = vld [vmem:[#allocation8 + $0x18] sm:$0xff] }
  0x70   :  { %578 = vmatprep.subr.bf16.mxu0 %v776_v0  ;;  %v594_v5 = vpack.c.bf16 %v382_v4, %v381_v3 }
  0x72   :  { %595 = vmatpush3.bf16.msra.mxu1 %v594_v5 }
  0x73   :  { %580 = vmatpush1.bf16.msra.mxu0 %v579_v7  ;;  %596 = vmatprep.subr.bf16.mxu1 %v776_v0 }
  0x74   :  { %581 = vmatprep.subr.bf16.mxu0 %v776_v0 }
  0x77   :  { %583 = vmatpush1.bf16.msra.mxu0 %v582_v10  ;;  %v600_v10 = vpack.c.bf16 %v386_v9, %v385_v8 }
  0x78   :  { %584 = vmatprep.subr.bf16.mxu0 %v776_v0 }
  0x7b   :  { %586 = vmatpush1.bf16.msra.mxu0 %v585_v15  ;;  %v603_v15 = vpack.c.bf16 %v388_v14, %v387_v13 }
  0x7c   :  { %587 = vmatprep.subr.bf16.mxu0 %v776_v0 }
  0x7f   :  { %589 = vmatpush1.bf16.msra.mxu0 %v588_v18  ;;  %v606_v18 = vpack.c.bf16 %v390_v17, %v389_v16 }
  0xc0   :  { %v199_v22 = vpop.permute.xlu1 %198 }
  0xc1   :  { %v225_v23 = vsel %vm210_vm5, %v129_v21, %v199_v22  ;;  %v609_v21 = vpack.c.bf16 %v392_v20, %v391_v19  ;;  %v393_v22 = vld [vmem:[#allocation8 + $0x70] sm:$0xff] }
  0xc2   :  { %v629_v24 = vpop.permute.xlu0 %628  ;;  %496 = vmatprep.mubr.msk.f32.mxu0 %vm215_vm6, %v225_v23  ;;  %v394_v23 = vld [vmem:[#allocation8 + $0x78] sm:$0xff] }
  0xc3   :  { %v630_v25 = vunpack.i.l.bf16 %v629_v24  ;;  %v631_v29 = vunpack.i.h.bf16 %v629_v24  ;;  %v612_v24 = vpack.c.bf16 %v394_v23, %v393_v22 }
  0xc4   :  { %v639_v26 = vpop.permute.xlu1 %638 }
  0xc5   :  { %v640_v31 = vunpack.i.l.bf16 %v639_v26  ;;  %v211_v35 = vsel %vm210_vm5, %v894_v1, %v630_v25  ;;  %v641_v39 = vunpack.i.h.bf16 %v639_v26  ;;  %v212_v43 = vsel %vm210_vm5, %v896_v2, %v631_v29  ;;  %v351_v29 = vld [vmem:[#allocation7 + $0x8] sm:$0xff] }
  0xc6   :  { %v634_v30 = vpop.permute.xlu0 %633  ;;  %v140_v2 = vsel %vm126_vm4, %v131_v28, %v130_v27  ;;  %v781_v25 = vmov 0.0   ;;  %v350_v28 = vld [vmem:[#allocation7] sm:$0xff] }
  0xc7   :  { %v636_v32 = vunpack.i.h.bf16 %v634_v30  ;;  %v635_v33 = vunpack.i.l.bf16 %v634_v30  ;;  %551 = vmatprep.mubr.msk.f32.mxu1 %vm780_vm8, %v781_v25 }
  0xc8   :  { %v644_v36 = vpop.permute.xlu1 %643 }
  0xc9   :  { %v216_v37 = vsel %vm215_vm6, %v211_v35, %v635_v33  ;;  %v645_v42 = vunpack.i.l.bf16 %v644_v36  ;;  %v217_v45 = vsel %vm215_vm6, %v212_v43, %v636_v32  ;;  %v646_v50 = vunpack.i.h.bf16 %v644_v36 }
  0xca   :  { %v201_v40 = vpop.permute.xlu0 %200  ;;  %v221_v41 = vsel %vm220_vm7, %v216_v37, %v640_v31  ;;  %v222_v48 = vsel %vm220_vm7, %v217_v45, %v641_v39 }
  0xcb   :  { %v226_v44 = vsel %vm210_vm5, %v139_v34, %v201_v40  ;;  %330 = vmatmul.mubr.f32.vlgmr.msra.gmra.mrb[0].mxu0 %v221_v41  ;;  %v213_v49 = vsel %vm210_vm5, %v906_v11, %v645_v42  ;;  %v214_v58 = vsel %vm210_vm5, %v908_v12, %v646_v50  ;;  %v383_v12 = vld [vmem:[#allocation8 + $0x20] sm:$0xff] }
  0xcc   :  { %497 = vmatprep.mubr.msk.f32.mxu0 %vm215_vm6, %v226_v44  ;;  %v203_v1 = vpop.permute.xlu1 %202  ;;  %v597_v7 = vpack.c.bf16 %v384_v6, %v383_v12 }
  0xcd   :  { %v227_v46 = vsel %vm210_vm5, %v132_v38, %v203_v1 }
  0xce   :  { %v649_v47 = vpop.permute.xlu0 %648  ;;  %598 = vmatpush3.bf16.msra.mxu1 %v597_v7 }
  0xcf   :  { %v650_v51 = vunpack.i.l.bf16 %v649_v47  ;;  %335 = vmatmul.mubr.f32.gmra.mrb[2].mxu0 %v222_v48  ;;  %v651_v54 = vunpack.i.h.bf16 %v649_v47  ;;  %599 = vmatprep.subr.bf16.mxu1 %v776_v0 }
  0xd0   :  { %498 = vmatprep.mubr.msk.f32.mxu0 %vm215_vm6, %v227_v46  ;;  %v205_v52 = vpop.permute.xlu1 %204 }
  0xd1   :  { %v218_v53 = vsel %vm215_vm6, %v213_v49, %v650_v51  ;;  %v228_v56 = vsel %vm210_vm5, %v140_v2, %v205_v52  ;;  %v219_v59 = vsel %vm215_vm6, %v214_v58, %v651_v54  ;;  %v500_v2 = vld [vmem:[%s1013_s2] ss:$0 sm:$0xff] }
  0xd2   :  { %v189_v55 = vpop.permute.xlu0 %188  ;;  %601 = vmatpush3.bf16.msra.mxu1 %v600_v10 }
  0xd3   :  { %v223_v57 = vsel %vm220_vm7, %v218_v53, %v189_v55  ;;  %602 = vmatprep.subr.bf16.mxu1 %v776_v0 }
  0xd4   :  { %340 = vmatmul.mubr.f32.gmra.mrb[4].mxu0 %v223_v57 }
  0xd5   :  { %499 = vmatprep.mubr.msk.f32.mxu0 %vm215_vm6, %v228_v56  ;;  %v501_v56 = vld [vmem:[%s1016_s5] ss:$0 sm:$0xff] }
  0xd6   :  { %v191_v11 = vpop.permute.xlu0 %190  ;;  %604 = vmatpush3.bf16.msra.mxu1 %v603_v15 }
  0xd7   :  { %v224_v60 = vsel %vm220_vm7, %v219_v59, %v191_v11  ;;  %605 = vmatprep.subr.bf16.mxu1 %v776_v0 }
  0xd8   :  { %345 = vmatmul.mubr.f32.gmra.mrb[6].mxu0 %v224_v60 }
  0xda   :  { %607 = vmatpush3.bf16.msra.mxu1 %v606_v18 }
  0xdb   :  { %608 = vmatprep.subr.bf16.mxu1 %v776_v0 }
  0xde   :  { %610 = vmatpush3.bf16.msra.mxu1 %v609_v21 }
  0xdf   :  { %611 = vmatprep.subr.bf16.mxu1 %v776_v0 }
  0xe2   :  { %613 = vmatpush3.bf16.msra.mxu1 %v612_v24 }
 0x19e   :  { %v331_v26 = vpop.f32.mrb[0].mxu0 }
 0x19f   :  { %v333_v27 = vpop.f32.mrb[1].mxu0  ;;  %v352_v31 = vadd.f32 %v350_v28, %v331_v26 }
 0x1a2   :  { %v336_v30 = vpop.f32.mrb[2].mxu0 }
 0x1a3   :  { %v353_v32 = vadd.f32 %v351_v29, %v336_v30  ;;  %v338_v33 = vpop.f32.mrb[3].mxu0 }
 0x1a5   :  { %v356_v34 = vmax.f32 %v352_v31, %v353_v32 }
 0x1a7   :  { %v357_v35 = vrot.slane %v356_v34, 4  ;;  %v341_v36 = vpop.f32.mrb[4].mxu0 }
 0x1a8   :  { %v343_v37 = vpop.f32.mrb[5].mxu0  ;;  %v354_v0 = vadd.f32 %v350_v28, %v341_v36 }
 0x1a9   :  { %v358_v38 = vmax.f32 %v356_v34, %v357_v35 }
 0x1ab   :  { %v346_v39 = vpop.f32.mrb[6].mxu0  ;;  %v359_v42 = vrot.slane %v358_v38, 2 }
 0x1ac   :  { %v355_v40 = vadd.f32 %v351_v29, %v346_v39  ;;  %v348_v41 = vpop.f32.mrb[7].mxu0 }
 0x1ad   :  { %v360_v45 = vmax.f32 %v358_v38, %v359_v42 }
 0x1ae   :  { %v363_v43 = vmax.f32 %v354_v0, %v355_v40 }
 0x1af   :  { %v361_v47 = vrot.slane %v360_v45, 1 }
 0x1b0   :  { %v364_v44 = vrot.slane %v363_v43, 4 }
 0x1b1   :  { %v362_v51 = vmax.f32 %v360_v45, %v361_v47 }
 0x1b2   :  { %v365_v1 = vmax.f32 %v363_v43, %v364_v44 }
 0x1b3   :  { %v377_v53 = vadd.f32 %v500_v2, %v362_v51 }
 0x1b4   :  { %v366_v46 = vrot.slane %v365_v1, 2 }
 0x1b6   :  { %v367_v48 = vmax.f32 %v365_v1, %v366_v46 }
 0x1b8   :  { %v368_v49 = vrot.slane %v367_v48, 1 }
 0x1ba   :  { %v369_v50 = vmax.f32 %v367_v48, %v368_v49 }
 0x1bc   :  { %v378_v52 = vadd.f32 %v500_v2, %v369_v50 }
 0x1be   :  { %v404_v54 = vrot.slane %v378_v52, 7 }
 0x1c0   :  { %v406_v55 = vsel %vm405_vm9, %v404_v54, %v377_v53 }
 0x1c1   :  { %552 = vmatmul.mubr.f32.vlgmr.msra.gmra.mrb[0].mxu1 %v406_v55 }
 0x294   :  { %v474_v57 = vpop.f32.mrb[0].mxu1 }
 0x295   :  { %v475_v58 = vadd.f32 %v501_v56, %v474_v57  ;;  %v553_v11 = vpop.f32.mrb[1].mxu1 }
 0x297   :  { %478 = vst [vmem:[#allocation10] sm:$0x3] %v475_v58 }
 0x298   :  { %751 = shalt.err (!%p748_p8)
}
 0x299   :  { %s752_s30 = scalar_lea.hbm %s1017_s6, 32 }
 0x29a   :  { %p753_p9 = scmp.ne.s32.totalorder %s1017_s6, %s752_s30  ;;  %p756_p10 = scmp.lt.u32.totalorder %s752_s30, %s1017_s6 }
 0x29c   :  { %p758_p11 = pnand %p756_p10, %p753_p9 }
 0x29e   :  { %761 = shalt.err (!%p758_p11)
}
 0x29f   :  { %488 = dma.vmem_to_hbm [thread:$0]  %s486_s27, 32, %s1017_s6, [#allocation4]  }
 0x2a0   :  { %768 = dma.done.wait [#allocation4], 32  }
 0x2a1   :  { %769 = vsyncadd [#allocation4], 4294967264 }
 0x2a2   :  { %492 = vsyncpa [#allocation3], 1 }
 0x2a3   :  { %493 = vsyncpa [#allocation6], 1 }
 0x2a4   :  { %494 = vsyncpa [#allocation9], 1 }
 0x2a5   :  { %495 = vsyncpa [#allocation4], 1 }

// kernel: tpu_custom_call.1
= control target key start
LH: loop header
LB: loop body
LE: loop exit
PB: predicated region body
PF: predicated region fallthrough
CT: control target
= control target key end

     0   :  { %11 = vsyncpa [#allocation3], 0  ;;  %s1011_s0 = inlined_call_operand.hbm [shape: f32[2,16,32], index: 0, kind: input, shape index: {}]   ;;  %s1012_s1 = inlined_call_operand.hbm [shape: f32[192,128], index: 1, kind: input, shape index: {}]   ;;  %s1013_s2 = inlined_call_operand.vmem [shape: f32[1,128], index: 2, kind: input, shape index: {}]   ;;  %s1014_s3 = inlined_call_operand.hbm [shape: f32[16,128], index: 3, kind: input, shape index: {}]   ;;  %s1015_s4 = inlined_call_operand.hbm [shape: f32[128,128], index: 4, kind: input, shape index: {}]   ;;  %s1016_s5 = inlined_call_operand.vmem [shape: f32[1,128], index: 5, kind: input, shape index: {}]   ;;  %s1017_s6 = inlined_call_operand.hbm [shape: f32[2,128], index: 6, kind: output, shape index: {}]  }
   0x1   :  { %12 = vsyncpa [#allocation6], 0 }
   0x2   :  { %13 = vsyncpa [#allocation9], 0 }
   0x3   :  { %14 = vsyncpa [#allocation4], 0  ;;  %s770_s21 = smov [#allocation5]   ;;  %s771_s23 = smov [#allocation2]  }
   0x4   :  { %s32_s22 = sshll.u32 %s770_s21, 4  ;;  %s20_s24 = sshll.u32 %s771_s23, 4  ;;  %s33_s22 = int_to_ptr.vmem [resolvable:$true] %s32_s22  ;;  %s818_s24 = int_to_ptr.vmem [resolvable:$true] %s20_s24 }
   0x5   :  { %s652_s27 = scalar_lea.hbm %s1012_s1, 3072 }
   0x6   :  { %p653_p0 = scmp.ne.s32.totalorder %s1012_s1, %s652_s27  ;;  %p656_p1 = scmp.lt.u32.totalorder %s652_s27, %s1012_s1 }
   0x8   :  { %p658_p2 = pnand %p656_p1, %p653_p0 }
   0xa   :  { %661 = shalt.err (!%p658_p2)
}
   0xb   :  { %s662_s8 = scalar_lea.vmem %s33_s22, 3072  ;;  %p667_p4 = scmp.lt.s32.totalorder %s33_s22, %s33_s22 }
   0xc   :  { %p663_p3 = scmp.ne.s32.totalorder %s33_s22, %s662_s8  ;;  %p668_p5 = scmp.lt.s32.totalorder %s662_s8, %s662_s8 }
   0xe   :  { %p669_p6 = por %p668_p5, %p667_p4 }
  0x10   :  { %p670_p7 = pnand %p669_p6, %p663_p3 }
  0x12   :  { %673 = shalt.err (!%p670_p7)
}
  0x13   :  { %s772_s9 = smov 128   ;;  %s773_s10 = smov 8  }
  0x14   :  { %38 = dma.hbm_to_vmem [thread:$0]  %s1012_s1, 3072, %s33_s22, [#allocation6], %s772_s9, %s772_s9, %s773_s10  }
  0x15   :  { %s674_s15 = scalar_lea.hbm %s1011_s0, 512 }
  0x16   :  { %p675_p8 = scmp.ne.s32.totalorder %s1011_s0, %s674_s15  ;;  %p678_p9 = scmp.lt.u32.totalorder %s674_s15, %s1011_s0 }
  0x18   :  { %p680_p10 = pnand %p678_p9, %p675_p8 }
  0x1a   :  { %683 = shalt.err (!%p680_p10)
}
  0x1b   :  { %s684_s20 = scalar_lea.vmem %s818_s24, 512  ;;  %p689_p12 = scmp.lt.s32.totalorder %s818_s24, %s818_s24 }
  0x1c   :  { %p685_p11 = scmp.ne.s32.totalorder %s818_s24, %s684_s20  ;;  %p690_p13 = scmp.lt.s32.totalorder %s684_s20, %s684_s20 }
  0x1e   :  { %p691_p0 = por %p690_p13, %p689_p12 }
  0x20   :  { %p692_p1 = pnand %p691_p0, %p685_p11 }
  0x22   :  { %695 = shalt.err (!%p692_p1)
}
  0x23   :  { %26 = dma.hbm_to_vmem [thread:$0]  %s1011_s0, 512, %s818_s24, [#allocation3], %s772_s9, %s772_s9, %s773_s10  }
  0x24   :  { %s774_s22 = smov [#allocation7]   ;;  %s775_s25 = smov [#allocation8]  }
  0x25   :  { %s46_s23 = sshll.u32 %s774_s22, 4  ;;  %s58_s26 = sshll.u32 %s775_s25, 4  ;;  %s47_s23 = int_to_ptr.vmem [resolvable:$true] %s46_s23  ;;  %s855_s26 = int_to_ptr.vmem [resolvable:$true] %s58_s26 }
  0x26   :  { %s696_s29 = scalar_lea.hbm %s1014_s3, 256 }
  0x27   :  { %p697_p2 = scmp.ne.s32.totalorder %s1014_s3, %s696_s29  ;;  %p700_p3 = scmp.lt.u32.totalorder %s696_s29, %s1014_s3 }
  0x29   :  { %p702_p4 = pnand %p700_p3, %p697_p2 }
  0x2b   :  { %705 = shalt.err (!%p702_p4)
}
  0x2c   :  { %s706_s0 = scalar_lea.vmem %s47_s23, 256  ;;  %p711_p6 = scmp.lt.s32.totalorder %s47_s23, %s47_s23 }
  0x2d   :  { %p707_p5 = scmp.ne.s32.totalorder %s47_s23, %s706_s0  ;;  %p712_p7 = scmp.lt.s32.totalorder %s706_s0, %s706_s0 }
  0x2f   :  { %p713_p8 = por %p712_p7, %p711_p6 }
  0x31   :  { %p714_p9 = pnand %p713_p8, %p707_p5 }
  0x33   :  { %717 = shalt.err (!%p714_p9)
}
  0x34   :  { %52 = dma.hbm_to_vmem [thread:$0]  %s1014_s3, 256, %s47_s23, [#allocation6], %s772_s9, %s772_s9, %s773_s10  }
  0x35   :  { %s718_s15 = scalar_lea.hbm %s1015_s4, 2048 }
  0x36   :  { %p719_p10 = scmp.ne.s32.totalorder %s1015_s4, %s718_s15  ;;  %p722_p11 = scmp.lt.u32.totalorder %s718_s15, %s1015_s4 }
  0x38   :  { %p724_p12 = pnand %p722_p11, %p719_p10 }
  0x3a   :  { %727 = shalt.err (!%p724_p12)
}
  0x3b   :  { %s728_s20 = scalar_lea.vmem %s855_s26, 2048  ;;  %p733_p0 = scmp.lt.s32.totalorder %s855_s26, %s855_s26 }
  0x3c   :  { %p729_p13 = scmp.ne.s32.totalorder %s855_s26, %s728_s20  ;;  %p734_p1 = scmp.lt.s32.totalorder %s728_s20, %s728_s20 }
  0x3e   :  { %p735_p2 = por %p734_p1, %p733_p0 }
  0x40   :  { %p736_p3 = pnand %p735_p2, %p729_p13 }
  0x42   :  { %739 = shalt.err (!%p736_p3)
}
  0x43   :  { %64 = dma.hbm_to_vmem [thread:$0]  %s1015_s4, 2048, %s855_s26, [#allocation9], %s772_s9, %s772_s9, %s773_s10  }
  0x44   :  { %762 = dma.done.wait [#allocation3], 512  }
  0x45   :  { %763 = vsyncadd [#allocation3], 4294966784 }
  0x46   :  { %764 = dma.done.wait [#allocation6], 3328  }
  0x47   :  { %765 = vsyncadd [#allocation6], 4294963968 }
  0x48   :  { %766 = dma.done.wait [#allocation9], 2048  }
  0x49   :  { %767 = vsyncadd [#allocation9], 4294965248  ;;  %v776_v0 = vmov 0.0|0.0   ;;  %v894_v1 = vld [vmem:[#allocation2] sm:$0xff]  ;;  %v896_v2 = vld [vmem:[#allocation2 + $0x8] sm:$0xff]  ;;  %vm87_vm0 = vcmask 1046528  }
  0x4a   :  { %554 = vmatprep.subr.bf16.mxu0 %v776_v0  ;;  %590 = vmatprep.subr.bf16.mxu1 %v776_v0  ;;  %vm141_vm1 = vcmask 1042432   ;;  %vm100_vm2 = vcmask 1045504   ;;  %vm113_vm3 = vcmask 1044480   ;;  %v88_v3 = vrot.slane %v894_v1, 1  ;;  %v906_v11 = vld [vmem:[#allocation2 + $0x10] sm:$0xff]  ;;  %v908_v12 = vld [vmem:[#allocation2 + $0x18] sm:$0xff] }
  0x4b   :  { %v89_v4 = vrot.slane %v896_v2, 1  ;;  %v142_v5 = vrot.slane %v894_v1, 5  ;;  %v143_v6 = vrot.slane %v896_v2, 5  ;;  %v101_v7 = vrot.slane %v894_v1, 2  ;;  %s777_s4 = smov 32   ;;  %v229_v25 = vld [vmem:[#allocation5] sm:$0xff] }
  0x4c   :  { %v102_v8 = vrot.slane %v896_v2, 2  ;;  %v114_v9 = vrot.slane %v894_v1, 3  ;;  %v115_v10 = vrot.slane %v896_v2, 3  ;;  %v91_v21 = vrot.slane %v906_v11, 1  ;;  %v230_v26 = vld [vmem:[#allocation5 + $0x8] sm:$0xff]  ;;  %s778_s9 = smov 96  }
  0x4d   :  { %v90_v13 = vsel %vm87_vm0, %v88_v3, %v89_v4  ;;  %v98_v14 = vsel %vm87_vm0, %v89_v4, %v88_v3  ;;  %v144_v15 = vsel %vm141_vm1, %v142_v5, %v143_v6  ;;  %v92_v22 = vrot.slane %v908_v12, 1  ;;  %v231_v32 = vld [vmem:[#allocation5 + $0x10] sm:$0xff]  ;;  %v232_v33 = vld [vmem:[#allocation5 + $0x18] sm:$0xff]  ;;  %s779_s10 = smov 64   ;;  %v233_v41 = vld [vmem:[#allocation5 + $0x20] sm:$0xff]  ;;  %s782_s26 = smov [#allocation10]  }
  0x4e   :  { %v627_v16 = vpack.i.bf16 %v98_v14, %v90_v13  ;;  %198 = vrot.lane.b32.xlu1 %v144_v15, %s777_s4  ;;  %v103_v17 = vsel %vm100_vm2, %v101_v7, %v102_v8  ;;  %v111_v18 = vsel %vm100_vm2, %v102_v8, %v101_v7  ;;  %v116_v19 = vsel %vm113_vm3, %v114_v9, %v115_v10  ;;  %v234_v42 = vld [vmem:[#allocation5 + $0x28] sm:$0xff]  ;;  %v235_v48 = vld [vmem:[#allocation5 + $0x30] sm:$0xff]  ;;  %v236_v49 = vld [vmem:[#allocation5 + $0x38] sm:$0xff]  ;;  %s485_s27 = sshll.u32 %s782_s26, 4  ;;  %s486_s27 = int_to_ptr.vmem [resolvable:$true] %s485_s27 }
  0x4f   :  { %v124_v20 = vsel %vm113_vm3, %v115_v10, %v114_v9  ;;  %v632_v23 = vpack.i.bf16 %v111_v18, %v103_v17  ;;  %v93_v27 = vsel %vm87_vm0, %v91_v21, %v92_v22  ;;  %v99_v28 = vsel %vm87_vm0, %v92_v22, %v91_v21  ;;  %v237_v53 = vld [vmem:[#allocation5 + $0x40] sm:$0xff]  ;;  %v238_v54 = vld [vmem:[#allocation5 + $0x48] sm:$0xff]  ;;  %v239_v57 = vld [vmem:[#allocation5 + $0x50] sm:$0xff]  ;;  %s740_s28 = scalar_lea.vmem %s486_s27, 32  ;;  %p745_p5 = scmp.lt.s32.totalorder %s486_s27, %s486_s27 }
  0x50   :  { %628 = vrot.lane.b32.xlu0 %v627_v16, %s777_s4  ;;  %v637_v24 = vpack.i.bf16 %v124_v20, %v116_v19  ;;  %v104_v29 = vrot.slane %v906_v11, 2  ;;  %v105_v30 = vrot.slane %v908_v12, 2  ;;  %v642_v31 = vpack.i.bf16 %v99_v28, %v93_v27  ;;  %v240_v58 = vld [vmem:[#allocation5 + $0x58] sm:$0xff]  ;;  %v241_v60 = vld [vmem:[#allocation5 + $0x60] sm:$0xff]  ;;  %v242_v61 = vld [vmem:[#allocation5 + $0x68] sm:$0xff]  ;;  %p741_p4 = scmp.ne.s32.totalorder %s486_s27, %s740_s28  ;;  %p746_p6 = scmp.lt.s32.totalorder %s740_s28, %s740_s28 }
  0x51   :  { %v145_v34 = vrot.slane %v906_v11, 5  ;;  %v146_v35 = vrot.slane %v908_v12, 5  ;;  %v555_v36 = vpack.c.bf16 %v230_v26, %v229_v25  ;;  %v152_v37 = vsel %vm141_vm1, %v143_v6, %v142_v5  ;;  %v243_v63 = vld [vmem:[#allocation5 + $0x70] sm:$0xff]  ;;  %v244_v3 = vld [vmem:[#allocation5 + $0x78] sm:$0xff]  ;;  %v245_v5 = vld [vmem:[#allocation5 + $0x80] sm:$0xff] }
  0x52   :  { %638 = vrot.lane.b32.xlu1 %v637_v24, %s778_s9  ;;  %v106_v38 = vsel %vm100_vm2, %v104_v29, %v105_v30  ;;  %v112_v39 = vsel %vm100_vm2, %v105_v30, %v104_v29  ;;  %v558_v40 = vpack.c.bf16 %v232_v33, %v231_v32  ;;  %v117_v45 = vrot.slane %v906_v11, 3  ;;  %v246_v6 = vld [vmem:[#allocation5 + $0x88] sm:$0xff]  ;;  %v247_v8 = vld [vmem:[#allocation5 + $0x90] sm:$0xff]  ;;  %v248_v9 = vld [vmem:[#allocation5 + $0x98] sm:$0xff]  ;;  %p747_p7 = por %p746_p6, %p745_p5 }
  0x53   :  { %556 = vmatpush1.bf16.msra.mxu0 %v555_v36  ;;  %v147_v43 = vsel %vm141_vm1, %v145_v34, %v146_v35  ;;  %v647_v44 = vpack.i.bf16 %v112_v39, %v106_v38  ;;  %v118_v46 = vrot.slane %v908_v12, 3  ;;  %v561_v47 = vpack.c.bf16 %v234_v42, %v233_v41  ;;  %v249_v13 = vld [vmem:[#allocation5 + $0xa0] sm:$0xff]  ;;  %v250_v14 = vld [vmem:[#allocation5 + $0xa8] sm:$0xff]  ;;  %v251_v16 = vld [vmem:[#allocation5 + $0xb0] sm:$0xff] }
  0x54   :  { %633 = vrot.lane.b32.xlu0 %v632_v23, %s779_s10  ;;  %557 = vmatprep.subr.bf16.mxu0 %v776_v0  ;;  %v153_v50 = vsel %vm141_vm1, %v146_v35, %v145_v34  ;;  %v564_v52 = vpack.c.bf16 %v236_v49, %v235_v48  ;;  %v567_v56 = vpack.c.bf16 %v238_v54, %v237_v53  ;;  %v252_v17 = vld [vmem:[#allocation5 + $0xb8] sm:$0xff]  ;;  %v127_v19 = vrot.slane %v894_v1, 4  ;;  %p748_p8 = pnand %p747_p7, %p741_p4 }
  0x55   :  { %v119_v51 = vsel %vm113_vm3, %v117_v45, %v118_v46  ;;  %v125_v55 = vsel %vm113_vm3, %v118_v46, %v117_v45  ;;  %v570_v59 = vpack.c.bf16 %v240_v58, %v239_v57  ;;  %v573_v62 = vpack.c.bf16 %v242_v61, %v241_v60  ;;  %v379_v61 = vld [vmem:[#allocation8] sm:$0xff] }
  0x56   :  { %643 = vrot.lane.b32.xlu1 %v642_v31, %s777_s4  ;;  %v576_v4 = vpack.c.bf16 %v244_v3, %v243_v63  ;;  %v579_v7 = vpack.c.bf16 %v246_v6, %v245_v5  ;;  %v582_v10 = vpack.c.bf16 %v248_v9, %v247_v8  ;;  %v585_v15 = vpack.c.bf16 %v250_v14, %v249_v13  ;;  %v381_v3 = vld [vmem:[#allocation8 + $0x10] sm:$0xff]  ;;  %v384_v6 = vld [vmem:[#allocation8 + $0x28] sm:$0xff]  ;;  %v386_v9 = vld [vmem:[#allocation8 + $0x38] sm:$0xff] }
  0x57   :  { %559 = vmatpush1.bf16.msra.mxu0 %v558_v40  ;;  %v588_v18 = vpack.c.bf16 %v252_v17, %v251_v16  ;;  %v128_v20 = vrot.slane %v896_v2, 4  ;;  %vm126_vm4 = vcmask 1043456   ;;  %vm210_vm5 = vcmask 261120   ;;  %v385_v8 = vld [vmem:[#allocation8 + $0x30] sm:$0xff]  ;;  %v387_v13 = vld [vmem:[#allocation8 + $0x40] sm:$0xff]  ;;  %v388_v14 = vld [vmem:[#allocation8 + $0x48] sm:$0xff] }
  0x58   :  { %200 = vrot.lane.b32.xlu0 %v152_v37, %s777_s4  ;;  %560 = vmatprep.subr.bf16.mxu0 %v776_v0  ;;  %vm215_vm6 = vcmask 523264   ;;  %v130_v27 = vrot.slane %v906_v11, 4  ;;  %v131_v28 = vrot.slane %v908_v12, 4  ;;  %vm220_vm7 = vcmask 785408   ;;  %v389_v16 = vld [vmem:[#allocation8 + $0x50] sm:$0xff]  ;;  %v390_v17 = vld [vmem:[#allocation8 + $0x58] sm:$0xff] }
  0x59   :  { %v129_v21 = vsel %vm126_vm4, %v127_v19, %v128_v20  ;;  %v139_v34 = vsel %vm126_vm4, %v128_v20, %v127_v19  ;;  %v391_v19 = vld [vmem:[#allocation8 + $0x60] sm:$0xff]  ;;  %v392_v20 = vld [vmem:[#allocation8 + $0x68] sm:$0xff]  ;;  %vm780_vm8 = vmmov 0   ;;  %vm405_vm9 = vcmask 1041409  }
  0x5a   :  { %202 = vrot.lane.b32.xlu1 %v147_v43, %s777_s4  ;;  %v132_v38 = vsel %vm126_vm4, %v130_v27, %v131_v28 }
  0x5b   :  { %562 = vmatpush1.bf16.msra.mxu0 %v561_v47 }
  0x5c   :  { %648 = vrot.lane.b32.xlu0 %v647_v44, %s779_s10  ;;  %563 = vmatprep.subr.bf16.mxu0 %v776_v0 }
  0x5e   :  { %204 = vrot.lane.b32.xlu1 %v153_v50, %s777_s4 }
  0x5f   :  { %565 = vmatpush1.bf16.msra.mxu0 %v564_v52 }
  0x60   :  { %188 = vrot.lane.b32.xlu0 %v119_v51, %s778_s9  ;;  %566 = vmatprep.subr.bf16.mxu0 %v776_v0 }
  0x63   :  { %568 = vmatpush1.bf16.msra.mxu0 %v567_v56 }
  0x64   :  { %190 = vrot.lane.b32.xlu0 %v125_v55, %s778_s9  ;;  %569 = vmatprep.subr.bf16.mxu0 %v776_v0 }
  0x67   :  { %571 = vmatpush1.bf16.msra.mxu0 %v570_v59 }
  0x68   :  { %572 = vmatprep.subr.bf16.mxu0 %v776_v0 }
  0x6b   :  { %574 = vmatpush1.bf16.msra.mxu0 %v573_v62  ;;  %v380_v62 = vld [vmem:[#allocation8 + $0x8] sm:$0xff] }
  0x6c   :  { %575 = vmatprep.subr.bf16.mxu0 %v776_v0  ;;  %v591_v63 = vpack.c.bf16 %v380_v62, %v379_v61 }
  0x6e   :  { %592 = vmatpush3.bf16.msra.mxu1 %v591_v63 }
  0x6f   :  { %577 = vmatpush1.bf16.msra.mxu0 %v576_v4  ;;  %593 = vmatprep.subr.bf16.mxu1 %v776_v0  ;;  %v382_v4 = vld [vmem:[#allocation8 + $0x18] sm:$0xff] }
  0x70   :  { %578 = vmatprep.subr.bf16.mxu0 %v776_v0  ;;  %v594_v5 = vpack.c.bf16 %v382_v4, %v381_v3 }
  0x72   :  { %595 = vmatpush3.bf16.msra.mxu1 %v594_v5 }
  0x73   :  { %580 = vmatpush1.bf16.msra.mxu0 %v579_v7  ;;  %596 = vmatprep.subr.bf16.mxu1 %v776_v0 }
  0x74   :  { %581 = vmatprep.subr.bf16.mxu0 %v776_v0 }
  0x77   :  { %583 = vmatpush1.bf16.msra.mxu0 %v582_v10  ;;  %v600_v10 = vpack.c.bf16 %v386_v9, %v385_v8 }
  0x78   :  { %584 = vmatprep.subr.bf16.mxu0 %v776_v0 }
  0x7b   :  { %586 = vmatpush1.bf16.msra.mxu0 %v585_v15  ;;  %v603_v15 = vpack.c.bf16 %v388_v14, %v387_v13 }
  0x7c   :  { %587 = vmatprep.subr.bf16.mxu0 %v776_v0 }
  0x7f   :  { %589 = vmatpush1.bf16.msra.mxu0 %v588_v18  ;;  %v606_v18 = vpack.c.bf16 %v390_v17, %v389_v16 }
  0xc0   :  { %v199_v22 = vpop.permute.xlu1 %198 }
  0xc1   :  { %v225_v23 = vsel %vm210_vm5, %v129_v21, %v199_v22  ;;  %v609_v21 = vpack.c.bf16 %v392_v20, %v391_v19  ;;  %v393_v22 = vld [vmem:[#allocation8 + $0x70] sm:$0xff] }
  0xc2   :  { %v629_v24 = vpop.permute.xlu0 %628  ;;  %496 = vmatprep.mubr.msk.f32.mxu0 %vm215_vm6, %v225_v23  ;;  %v394_v23 = vld [vmem:[#allocation8 + $0x78] sm:$0xff] }
  0xc3   :  { %v630_v25 = vunpack.i.l.bf16 %v629_v24  ;;  %v631_v29 = vunpack.i.h.bf16 %v629_v24  ;;  %v612_v24 = vpack.c.bf16 %v394_v23, %v393_v22 }
  0xc4   :  { %v639_v26 = vpop.permute.xlu1 %638 }
  0xc5   :  { %v640_v31 = vunpack.i.l.bf16 %v639_v26  ;;  %v211_v35 = vsel %vm210_vm5, %v894_v1, %v630_v25  ;;  %v641_v39 = vunpack.i.h.bf16 %v639_v26  ;;  %v212_v43 = vsel %vm210_vm5, %v896_v2, %v631_v29  ;;  %v351_v29 = vld [vmem:[#allocation7 + $0x8] sm:$0xff] }
  0xc6   :  { %v634_v30 = vpop.permute.xlu0 %633  ;;  %v140_v2 = vsel %vm126_vm4, %v131_v28, %v130_v27  ;;  %v781_v25 = vmov 0.0   ;;  %v350_v28 = vld [vmem:[#allocation7] sm:$0xff] }
  0xc7   :  { %v636_v32 = vunpack.i.h.bf16 %v634_v30  ;;  %v635_v33 = vunpack.i.l.bf16 %v634_v30  ;;  %551 = vmatprep.mubr.msk.f32.mxu1 %vm780_vm8, %v781_v25 }
  0xc8   :  { %v644_v36 = vpop.permute.xlu1 %643 }
  0xc9   :  { %v216_v37 = vsel %vm215_vm6, %v211_v35, %v635_v33  ;;  %v645_v42 = vunpack.i.l.bf16 %v644_v36  ;;  %v217_v45 = vsel %vm215_vm6, %v212_v43, %v636_v32  ;;  %v646_v50 = vunpack.i.h.bf16 %v644_v36 }
  0xca   :  { %v201_v40 = vpop.permute.xlu0 %200  ;;  %v221_v41 = vsel %vm220_vm7, %v216_v37, %v640_v31  ;;  %v222_v48 = vsel %vm220_vm7, %v217_v45, %v641_v39 }
  0xcb   :  { %v226_v44 = vsel %vm210_vm5, %v139_v34, %v201_v40  ;;  %330 = vmatmul.mubr.f32.vlgmr.msra.gmra.mrb[0].mxu0 %v221_v41  ;;  %v213_v49 = vsel %vm210_vm5, %v906_v11, %v645_v42  ;;  %v214_v58 = vsel %vm210_vm5, %v908_v12, %v646_v50  ;;  %v383_v12 = vld [vmem:[#allocation8 + $0x20] sm:$0xff] }
  0xcc   :  { %497 = vmatprep.mubr.msk.f32.mxu0 %vm215_vm6, %v226_v44  ;;  %v203_v1 = vpop.permute.xlu1 %202  ;;  %v597_v7 = vpack.c.bf16 %v384_v6, %v383_v12 }
  0xcd   :  { %v227_v46 = vsel %vm210_vm5, %v132_v38, %v203_v1 }
  0xce   :  { %v649_v47 = vpop.permute.xlu0 %648  ;;  %598 = vmatpush3.bf16.msra.mxu1 %v597_v7 }
  0xcf   :  { %v650_v51 = vunpack.i.l.bf16 %v649_v47  ;;  %335 = vmatmul.mubr.f32.gmra.mrb[2].mxu0 %v222_v48  ;;  %v651_v54 = vunpack.i.h.bf16 %v649_v47  ;;  %599 = vmatprep.subr.bf16.mxu1 %v776_v0 }
  0xd0   :  { %498 = vmatprep.mubr.msk.f32.mxu0 %vm215_vm6, %v227_v46  ;;  %v205_v52 = vpop.permute.xlu1 %204 }
  0xd1   :  { %v218_v53 = vsel %vm215_vm6, %v213_v49, %v650_v51  ;;  %v228_v56 = vsel %vm210_vm5, %v140_v2, %v205_v52  ;;  %v219_v59 = vsel %vm215_vm6, %v214_v58, %v651_v54  ;;  %v500_v2 = vld [vmem:[%s1013_s2] ss:$0 sm:$0xff] }
  0xd2   :  { %v189_v55 = vpop.permute.xlu0 %188  ;;  %601 = vmatpush3.bf16.msra.mxu1 %v600_v10 }
  0xd3   :  { %v223_v57 = vsel %vm220_vm7, %v218_v53, %v189_v55  ;;  %602 = vmatprep.subr.bf16.mxu1 %v776_v0 }
  0xd4   :  { %340 = vmatmul.mubr.f32.gmra.mrb[4].mxu0 %v223_v57 }
  0xd5   :  { %499 = vmatprep.mubr.msk.f32.mxu0 %vm215_vm6, %v228_v56  ;;  %v501_v56 = vld [vmem:[%s1016_s5] ss:$0 sm:$0xff] }
  0xd6   :  { %v191_v11 = vpop.permute.xlu0 %190  ;;  %604 = vmatpush3.bf16.msra.mxu1 %v603_v15 }
  0xd7   :  { %v224_v60 = vsel %vm220_vm7, %v219_v59, %v191_v11  ;;  %605 = vmatprep.subr.bf16.mxu1 %v776_v0 }
  0xd8   :  { %345 = vmatmul.mubr.f32.gmra.mrb[6].mxu0 %v224_v60 }
  0xda   :  { %607 = vmatpush3.bf16.msra.mxu1 %v606_v18 }
  0xdb   :  { %608 = vmatprep.subr.bf16.mxu1 %v776_v0 }
  0xde   :  { %610 = vmatpush3.bf16.msra.mxu1 %v609_v21 }
  0xdf   :  { %611 = vmatprep.subr.bf16.mxu1 %v776_v0 }
  0xe2   :  { %613 = vmatpush3.bf16.msra.mxu1 %v612_v24 }
 0x19e   :  { %v331_v26 = vpop.f32.mrb[0].mxu0 }
 0x19f   :  { %v333_v27 = vpop.f32.mrb[1].mxu0  ;;  %v352_v31 = vadd.f32 %v350_v28, %v331_v26 }
 0x1a2   :  { %v336_v30 = vpop.f32.mrb[2].mxu0 }
 0x1a3   :  { %v353_v32 = vadd.f32 %v351_v29, %v336_v30  ;;  %v338_v33 = vpop.f32.mrb[3].mxu0 }
 0x1a5   :  { %v356_v34 = vmax.f32 %v352_v31, %v353_v32 }
 0x1a7   :  { %v357_v35 = vrot.slane %v356_v34, 4  ;;  %v341_v36 = vpop.f32.mrb[4].mxu0 }
 0x1a8   :  { %v343_v37 = vpop.f32.mrb[5].mxu0  ;;  %v354_v0 = vadd.f32 %v350_v28, %v341_v36 }
 0x1a9   :  { %v358_v38 = vmax.f32 %v356_v34, %v357_v35 }
 0x1ab   :  { %v346_v39 = vpop.f32.mrb[6].mxu0  ;;  %v359_v42 = vrot.slane %v358_v38, 2 }
 0x1ac   :  { %v355_v40 = vadd.f32 %v351_v29, %v346_v39  ;;  %v348_v41 = vpop.f32.mrb[7].mxu0 }
 0x1ad   :  { %v360_v45 = vmax.f32 %v358_v38, %v359_v42 }
 0x1ae   :  { %v363_v43 = vmax.f32 %v354_v0, %v355_v40 }
 0x1af   :  { %v361_v47 = vrot.slane %v360_v45, 1 }
 0x1b0   :  { %v364_v44 = vrot.slane %v363_v43, 4 }
 0x1b1   :  { %v362_v51 = vmax.f32 %v360_v45, %v361_v47 }
 0x1b2   :  { %v365_v1 = vmax.f32 %v363_v43, %v364_v44 }
 0x1b3   :  { %v377_v53 = vadd.f32 %v500_v2, %v362_v51 }
 0x1b4   :  { %v366_v46 = vrot.slane %v365_v1, 2 }
 0x1b6   :  { %v367_v48 = vmax.f32 %v365_v1, %v366_v46 }
 0x1b8   :  { %v368_v49 = vrot.slane %v367_v48, 1 }
 0x1ba   :  { %v369_v50 = vmax.f32 %v367_v48, %v368_v49 }
 0x1bc   :  { %v378_v52 = vadd.f32 %v500_v2, %v369_v50 }
 0x1be   :  { %v404_v54 = vrot.slane %v378_v52, 7 }
 0x1c0   :  { %v406_v55 = vsel %vm405_vm9, %v404_v54, %v377_v53 }
 0x1c1   :  { %552 = vmatmul.mubr.f32.vlgmr.msra.gmra.mrb[0].mxu1 %v406_v55 }
 0x294   :  { %v474_v57 = vpop.f32.mrb[0].mxu1 }
 0x295   :  { %v475_v58 = vadd.f32 %v501_v56, %v474_v57  ;;  %v553_v11 = vpop.f32.mrb[1].mxu1 }
 0x297   :  { %478 = vst [vmem:[#allocation10] sm:$0x3] %v475_v58 }
 0x298   :  { %751 = shalt.err (!%p748_p8)
}
 0x299   :  { %s752_s30 = scalar_lea.hbm %s1017_s6, 32 }
 0x29a   :  { %p753_p9 = scmp.ne.s32.totalorder %s1017_s6, %s752_s30  ;;  %p756_p10 = scmp.lt.u32.totalorder %s752_s30, %s1017_s6 }
 0x29c   :  { %p758_p11 = pnand %p756_p10, %p753_p9 }
 0x29e   :  { %761 = shalt.err (!%p758_p11)
}
 0x29f   :  { %488 = dma.vmem_to_hbm [thread:$0]  %s486_s27, 32, %s1017_s6, [#allocation4]  }
 0x2a0   :  { %768 = dma.done.wait [#allocation4], 32  }
 0x2a1   :  { %769 = vsyncadd [#allocation4], 4294967264 }
 0x2a2   :  { %492 = vsyncpa [#allocation3], 1 }
 0x2a3   :  { %493 = vsyncpa [#allocation6], 1 }
 0x2a4   :  { %494 = vsyncpa [#allocation9], 1 }
 0x2a5   :  { %495 = vsyncpa [#allocation4], 1 }

// kernel: tpu_custom_call.1
= control target key start
LH: loop header
LB: loop body
LE: loop exit
PB: predicated region body
PF: predicated region fallthrough
CT: control target
= control target key end

     0   :  { %11 = vsyncpa [#allocation3], 0  ;;  %s1563_s0 = inlined_call_operand.hbm [shape: f32[2,16,32], index: 0, kind: input, shape index: {}]   ;;  %s1564_s1 = inlined_call_operand.hbm [shape: f32[6,32,128], index: 1, kind: input, shape index: {}]   ;;  %s1565_s2 = inlined_call_operand.vmem [shape: f32[1,128], index: 2, kind: input, shape index: {}]   ;;  %s1566_s3 = inlined_call_operand.hbm [shape: f32[16,128], index: 3, kind: input, shape index: {}]   ;;  %s1567_s4 = inlined_call_operand.hbm [shape: f32[128,128], index: 4, kind: input, shape index: {}]   ;;  %s1568_s5 = inlined_call_operand.vmem [shape: f32[1,128], index: 5, kind: input, shape index: {}]   ;;  %s1569_s6 = inlined_call_operand.hbm [shape: f32[2,128], index: 6, kind: output, shape index: {}]  }
   0x1   :  { %12 = vsyncpa [#allocation6], 0 }
   0x2   :  { %13 = vsyncpa [#allocation9], 0 }
   0x3   :  { %14 = vsyncpa [#allocation4], 0  ;;  %s1342_s21 = smov [#allocation5]   ;;  %s1343_s23 = smov [#allocation2]  }
   0x4   :  { %s32_s22 = sshll.u32 %s1342_s21, 4  ;;  %s20_s24 = sshll.u32 %s1343_s23, 4  ;;  %s33_s22 = int_to_ptr.vmem [resolvable:$true] %s32_s22  ;;  %s1387_s24 = int_to_ptr.vmem [resolvable:$true] %s20_s24 }
   0x5   :  { %s1224_s27 = scalar_lea.hbm %s1564_s1, 3072 }
   0x6   :  { %p1225_p0 = scmp.ne.s32.totalorder %s1564_s1, %s1224_s27  ;;  %p1228_p1 = scmp.lt.u32.totalorder %s1224_s27, %s1564_s1 }
   0x8   :  { %p1230_p2 = pnand %p1228_p1, %p1225_p0 }
   0xa   :  { %1233 = shalt.err (!%p1230_p2)
}
   0xb   :  { %s1234_s8 = scalar_lea.vmem %s33_s22, 3072  ;;  %p1239_p4 = scmp.lt.s32.totalorder %s33_s22, %s33_s22 }
   0xc   :  { %p1235_p3 = scmp.ne.s32.totalorder %s33_s22, %s1234_s8  ;;  %p1240_p5 = scmp.lt.s32.totalorder %s1234_s8, %s1234_s8 }
   0xe   :  { %p1241_p6 = por %p1240_p5, %p1239_p4 }
  0x10   :  { %p1242_p7 = pnand %p1241_p6, %p1235_p3 }
  0x12   :  { %1245 = shalt.err (!%p1242_p7)
}
  0x13   :  { %s1344_s9 = smov 128   ;;  %s1345_s10 = smov 8  }
  0x14   :  { %38 = dma.hbm_to_vmem [thread:$0]  %s1564_s1, 3072, %s33_s22, [#allocation6], %s1344_s9, %s1344_s9, %s1345_s10  }
  0x15   :  { %s1246_s15 = scalar_lea.hbm %s1563_s0, 512 }
  0x16   :  { %p1247_p8 = scmp.ne.s32.totalorder %s1563_s0, %s1246_s15  ;;  %p1250_p9 = scmp.lt.u32.totalorder %s1246_s15, %s1563_s0 }
  0x18   :  { %p1252_p10 = pnand %p1250_p9, %p1247_p8 }
  0x1a   :  { %1255 = shalt.err (!%p1252_p10)
}
  0x1b   :  { %s1256_s20 = scalar_lea.vmem %s1387_s24, 512  ;;  %p1261_p12 = scmp.lt.s32.totalorder %s1387_s24, %s1387_s24 }
  0x1c   :  { %p1257_p11 = scmp.ne.s32.totalorder %s1387_s24, %s1256_s20  ;;  %p1262_p13 = scmp.lt.s32.totalorder %s1256_s20, %s1256_s20 }
  0x1e   :  { %p1263_p0 = por %p1262_p13, %p1261_p12 }
  0x20   :  { %p1264_p1 = pnand %p1263_p0, %p1257_p11 }
  0x22   :  { %1267 = shalt.err (!%p1264_p1)
}
  0x23   :  { %26 = dma.hbm_to_vmem [thread:$0]  %s1563_s0, 512, %s1387_s24, [#allocation3], %s1344_s9, %s1344_s9, %s1345_s10  }
  0x24   :  { %s1346_s22 = smov [#allocation7]   ;;  %s1347_s25 = smov [#allocation8]  }
  0x25   :  { %s46_s23 = sshll.u32 %s1346_s22, 4  ;;  %s58_s26 = sshll.u32 %s1347_s25, 4  ;;  %s47_s23 = int_to_ptr.vmem [resolvable:$true] %s46_s23  ;;  %s1424_s26 = int_to_ptr.vmem [resolvable:$true] %s58_s26 }
  0x26   :  { %s1268_s29 = scalar_lea.hbm %s1566_s3, 256 }
  0x27   :  { %p1269_p2 = scmp.ne.s32.totalorder %s1566_s3, %s1268_s29  ;;  %p1272_p3 = scmp.lt.u32.totalorder %s1268_s29, %s1566_s3 }
  0x29   :  { %p1274_p4 = pnand %p1272_p3, %p1269_p2 }
  0x2b   :  { %1277 = shalt.err (!%p1274_p4)
}
  0x2c   :  { %s1278_s0 = scalar_lea.vmem %s47_s23, 256  ;;  %p1283_p6 = scmp.lt.s32.totalorder %s47_s23, %s47_s23 }
  0x2d   :  { %p1279_p5 = scmp.ne.s32.totalorder %s47_s23, %s1278_s0  ;;  %p1284_p7 = scmp.lt.s32.totalorder %s1278_s0, %s1278_s0 }
  0x2f   :  { %p1285_p8 = por %p1284_p7, %p1283_p6 }
  0x31   :  { %p1286_p9 = pnand %p1285_p8, %p1279_p5 }
  0x33   :  { %1289 = shalt.err (!%p1286_p9)
}
  0x34   :  { %52 = dma.hbm_to_vmem [thread:$0]  %s1566_s3, 256, %s47_s23, [#allocation6], %s1344_s9, %s1344_s9, %s1345_s10  }
  0x35   :  { %s1290_s15 = scalar_lea.hbm %s1567_s4, 2048 }
  0x36   :  { %p1291_p10 = scmp.ne.s32.totalorder %s1567_s4, %s1290_s15  ;;  %p1294_p11 = scmp.lt.u32.totalorder %s1290_s15, %s1567_s4 }
  0x38   :  { %p1296_p12 = pnand %p1294_p11, %p1291_p10 }
  0x3a   :  { %1299 = shalt.err (!%p1296_p12)
}
  0x3b   :  { %s1300_s20 = scalar_lea.vmem %s1424_s26, 2048  ;;  %p1305_p0 = scmp.lt.s32.totalorder %s1424_s26, %s1424_s26 }
  0x3c   :  { %p1301_p13 = scmp.ne.s32.totalorder %s1424_s26, %s1300_s20  ;;  %p1306_p1 = scmp.lt.s32.totalorder %s1300_s20, %s1300_s20 }
  0x3e   :  { %p1307_p2 = por %p1306_p1, %p1305_p0 }
  0x40   :  { %p1308_p3 = pnand %p1307_p2, %p1301_p13 }
  0x42   :  { %1311 = shalt.err (!%p1308_p3)
}
  0x43   :  { %64 = dma.hbm_to_vmem [thread:$0]  %s1567_s4, 2048, %s1424_s26, [#allocation9], %s1344_s9, %s1344_s9, %s1345_s10  }
  0x44   :  { %1334 = dma.done.wait [#allocation3], 512  }
  0x45   :  { %1335 = vsyncadd [#allocation3], 4294966784 }
  0x46   :  { %1336 = dma.done.wait [#allocation6], 3328  }
  0x47   :  { %1337 = vsyncadd [#allocation6], 4294963968 }
  0x48   :  { %1338 = dma.done.wait [#allocation9], 2048  }
  0x49   :  { %1339 = vsyncadd [#allocation9], 4294965248  ;;  %vm109_vm0 = vcmask 261120   ;;  %v83_v0 = vld [vmem:[#allocation5] sm:$0xff]  ;;  %v84_v1 = vld [vmem:[#allocation5 + $0x8] sm:$0xff]  ;;  %vm91_vm1 = vcmask 1046528  }
  0x4a   :  { %v85_v2 = vld [vmem:[#allocation5 + $0x10] sm:$0xff]  ;;  %v1130_v3 = vpack.c.bf16 %v84_v1, %v83_v0  ;;  %v86_v4 = vld [vmem:[#allocation5 + $0x18] sm:$0xff]  ;;  %v1461_v5 = vld [vmem:[#allocation2] sm:$0xff]  ;;  %vm298_vm2 = vcmask 1045504   ;;  %v1348_v46 = vmov 0.0|0.0   ;;  %vm415_vm3 = vcmask 1044480  }
  0x4b   :  { %v1134_v6 = vpack.c.bf16 %v86_v4, %v85_v2  ;;  %1025 = vmatprep.mubr.msk.f32.mxu0 %vm109_vm0, %v1461_v5  ;;  %v312_v7 = vld [vmem:[#allocation5 + $0x40] sm:$0xff]  ;;  %v313_v8 = vld [vmem:[#allocation5 + $0x48] sm:$0xff]  ;;  %v314_v10 = vld [vmem:[#allocation5 + $0x50] sm:$0xff]  ;;  %v299_v15 = vrot.slane %v1461_v5, 2  ;;  %v92_v23 = vrot.slane %v1461_v5, 1  ;;  %v416_v41 = vrot.slane %v1461_v5, 3 }
  0x4c   :  { %1131 = vmatprep.subr.bf16.mxu0 %v1130_v3  ;;  %v1138_v9 = vpack.c.bf16 %v313_v8, %v312_v7  ;;  %v315_v11 = vld [vmem:[#allocation5 + $0x58] sm:$0xff]  ;;  %v105_v12 = vld [vmem:[#allocation5 + $0x20] sm:$0xff]  ;;  %v1465_v13 = vld [vmem:[#allocation2 + $0x8] sm:$0xff]  ;;  %v533_v61 = vrot.slane %v1461_v5, 4  ;;  %vm532_vm4 = vcmask 1043456   ;;  %vm649_vm5 = vcmask 1042432  }
  0x4d   :  { %1133 = vmatpush3.bf16.msra.mxu0 %v1130_v3  ;;  %v106_v14 = vld [vmem:[#allocation5 + $0x28] sm:$0xff]  ;;  %v300_v16 = vrot.slane %v1465_v13, 2  ;;  %v107_v18 = vld [vmem:[#allocation5 + $0x30] sm:$0xff]  ;;  %v108_v19 = vld [vmem:[#allocation5 + $0x38] sm:$0xff]  ;;  %v1142_v21 = vpack.c.bf16 %v315_v11, %v314_v10  ;;  %v93_v24 = vrot.slane %v1465_v13, 1  ;;  %v417_v45 = vrot.slane %v1465_v13, 3 }
  0x4e   :  { %1135 = vmatprep.subr.bf16.mxu0 %v1134_v6  ;;  %v1122_v17 = vpack.c.bf16 %v106_v14, %v105_v12  ;;  %v1469_v20 = vld [vmem:[#allocation2 + $0x10] sm:$0xff]  ;;  %v1126_v22 = vpack.c.bf16 %v108_v19, %v107_v18  ;;  %v429_v25 = vld [vmem:[#allocation5 + $0x60] sm:$0xff]  ;;  %v430_v26 = vld [vmem:[#allocation5 + $0x68] sm:$0xff]  ;;  %v534_v62 = vrot.slane %v1465_v13, 4  ;;  %v650_v12 = vrot.slane %v1461_v5, 5  ;;  %s1351_s22 = smov [#allocation10]  }
  0x4f   :  { %v1475_v27 = vld [vmem:[#allocation2 + $0x18] sm:$0xff]  ;;  %v94_v28 = vsel %vm91_vm1, %v92_v23, %v93_v24  ;;  %v95_v29 = vrot.slane %v1469_v20, 1  ;;  %v301_v31 = vsel %vm298_vm2, %v299_v15, %v300_v16  ;;  %v1146_v32 = vpack.c.bf16 %v430_v26, %v429_v25  ;;  %v431_v35 = vld [vmem:[#allocation5 + $0x70] sm:$0xff]  ;;  %v546_v48 = vld [vmem:[#allocation5 + $0x80] sm:$0xff]  ;;  %s901_s23 = sshll.u32 %s1351_s22, 4  ;;  %s902_s23 = int_to_ptr.vmem [resolvable:$true] %s901_s23 }
  0x50   :  { %1123 = vmatprep.subr.bf16.mxu1 %v1122_v17  ;;  %v96_v30 = vrot.slane %v1475_v27, 1  ;;  %v302_v33 = vrot.slane %v1469_v20, 2  ;;  %v303_v34 = vrot.slane %v1475_v27, 2  ;;  %v432_v36 = vld [vmem:[#allocation5 + $0x78] sm:$0xff]  ;;  %1011 = vmatprep.mubr.msk.f32.mxu1 %vm109_vm0, %v94_v28  ;;  %v795_v37 = vld [vmem:[#allocation8] sm:$0xff]  ;;  %v102_v39 = vsel %vm91_vm1, %v93_v24, %v92_v23  ;;  %v547_v49 = vld [vmem:[#allocation5 + $0x88] sm:$0xff]  ;;  %p1317_p5 = scmp.lt.s32.totalorder %s902_s23, %s902_s23 }
  0x51   :  { %1137 = vmatpush3.bf16.msra.mxu0 %v1134_v6  ;;  %1125 = vmatpush3.bf16.msra.mxu1 %v1122_v17  ;;  %v796_v38 = vld [vmem:[#allocation8 + $0x8] sm:$0xff]  ;;  %v309_v40 = vsel %vm298_vm2, %v300_v16, %v299_v15  ;;  %v1150_v44 = vpack.c.bf16 %v432_v36, %v431_v35  ;;  %v418_v52 = vsel %vm415_vm3, %v416_v41, %v417_v45  ;;  %v419_v54 = vrot.slane %v1469_v20, 3  ;;  %v548_v56 = vld [vmem:[#allocation5 + $0x90] sm:$0xff]  ;;  %v663_v63 = vld [vmem:[#allocation5 + $0xa0] sm:$0xff]  ;;  %s1312_s25 = scalar_lea.vmem %s902_s23, 32 }
  0x52   :  { %1139 = vmatprep.subr.bf16.mxu0 %v1138_v9  ;;  %1127 = vmatprep.subr.bf16.mxu1 %v1126_v22  ;;  %v97_v42 = vsel %vm91_vm1, %v95_v29, %v96_v30  ;;  %v304_v43 = vsel %vm298_vm2, %v302_v33, %v303_v34  ;;  %v1171_v47 = vpack.c.bf16 %v796_v38, %v795_v37  ;;  %v420_v55 = vrot.slane %v1475_v27, 3  ;;  %v549_v57 = vld [vmem:[#allocation5 + $0x98] sm:$0xff]  ;;  %v664_v0 = vld [vmem:[#allocation5 + $0xa8] sm:$0xff]  ;;  %v665_v7 = vld [vmem:[#allocation5 + $0xb0] sm:$0xff]  ;;  %p1313_p4 = scmp.ne.s32.totalorder %s902_s23, %s1312_s25  ;;  %p1318_p6 = scmp.lt.s32.totalorder %s1312_s25, %s1312_s25 }
  0x53   :  { %v103_v50 = vsel %vm91_vm1, %v96_v30, %v95_v29  ;;  %v310_v51 = vsel %vm298_vm2, %v303_v34, %v302_v33  ;;  %v1154_v53 = vpack.c.bf16 %v547_v49, %v546_v48  ;;  %v426_v58 = vsel %vm415_vm3, %v417_v45, %v416_v41  ;;  %v666_v8 = vld [vmem:[#allocation5 + $0xb8] sm:$0xff]  ;;  %v799_v23 = vld [vmem:[#allocation8 + $0x20] sm:$0xff]  ;;  %v801_v26 = vld [vmem:[#allocation8 + $0x30] sm:$0xff] }
  0x54   :  { %1026 = vmatmul.mubr.msk.f32.vlgmr.msra.gmra.mrb[0].mxu0 %vm109_vm0, %v1465_v13  ;;  %v421_v59 = vsel %vm415_vm3, %v419_v54, %v420_v55  ;;  %v1158_v60 = vpack.c.bf16 %v549_v57, %v548_v56  ;;  %v427_v1 = vsel %vm415_vm3, %v420_v55, %v419_v54  ;;  %v535_v2 = vsel %vm532_vm4, %v533_v61, %v534_v62  ;;  %v800_v24 = vld [vmem:[#allocation8 + $0x28] sm:$0xff]  ;;  %v803_v29 = vld [vmem:[#allocation8 + $0x40] sm:$0xff]  ;;  %v806_v33 = vld [vmem:[#allocation8 + $0x58] sm:$0xff]  ;;  %p1319_p7 = por %p1318_p6, %p1317_p5 }
  0x55   :  { %1141 = vmatpush3.bf16.msra.mxu0 %v1138_v9  ;;  %1028 = vmatprep.mubr.msk.f32.mxu0 %vm109_vm0, %v1469_v20  ;;  %v1162_v3 = vpack.c.bf16 %v664_v0, %v663_v63  ;;  %v536_v4 = vrot.slane %v1469_v20, 4  ;;  %v537_v6 = vrot.slane %v1475_v27, 4  ;;  %v543_v9 = vsel %vm532_vm4, %v534_v62, %v533_v61  ;;  %v804_v30 = vld [vmem:[#allocation8 + $0x48] sm:$0xff]  ;;  %v807_v35 = vld [vmem:[#allocation8 + $0x60] sm:$0xff]  ;;  %v809_v38 = vld [vmem:[#allocation8 + $0x70] sm:$0xff] }
  0x56   :  { %1143 = vmatprep.subr.bf16.mxu0 %v1142_v21  ;;  %1129 = vmatpush3.bf16.msra.mxu1 %v1126_v22  ;;  %v1166_v11 = vpack.c.bf16 %v666_v8, %v665_v7  ;;  %v651_v14 = vrot.slane %v1465_v13, 5  ;;  %v653_v17 = vrot.slane %v1469_v20, 5  ;;  %v654_v18 = vrot.slane %v1475_v27, 5  ;;  %v797_v20 = vld [vmem:[#allocation8 + $0x10] sm:$0xff]  ;;  %v808_v36 = vld [vmem:[#allocation8 + $0x68] sm:$0xff]  ;;  %v767_v48 = vld [vmem:[#allocation7 + $0x8] sm:$0xff]  ;;  %p1320_p8 = pnand %p1319_p7, %p1313_p4 }
  0x57   :  { %1170 = vmatprep.subr.bf16.mxu1 %v1348_v46  ;;  %v538_v10 = vsel %vm532_vm4, %v536_v4, %v537_v6  ;;  %v544_v15 = vsel %vm532_vm4, %v537_v6, %v536_v4  ;;  %v1177_v25 = vpack.c.bf16 %v800_v24, %v799_v23  ;;  %v1189_v37 = vpack.c.bf16 %v808_v36, %v807_v35 }
  0x58   :  { %1029 = vmatmul.mubr.msk.f32.gmra.mrb[2].mxu0 %vm109_vm0, %v1475_v27  ;;  %v652_v16 = vsel %vm649_vm5, %v650_v12, %v651_v14  ;;  %v660_v5 = vsel %vm649_vm5, %v651_v14, %v650_v12  ;;  %v655_v13 = vsel %vm649_vm5, %v653_v17, %v654_v18  ;;  %v661_v19 = vsel %vm649_vm5, %v654_v18, %v653_v17  ;;  %v802_v27 = vld [vmem:[#allocation8 + $0x38] sm:$0xff]  ;;  %v937_v17 = vld [vmem:[%s1568_s5] ss:$0 sm:$0xff] }
  0x59   :  { %1145 = vmatpush3.bf16.msra.mxu0 %v1142_v21  ;;  %1039 = vmatprep.mubr.msk.f32.mxu0 %vm109_vm0, %v301_v31  ;;  %v798_v21 = vld [vmem:[#allocation8 + $0x18] sm:$0xff]  ;;  %v1180_v28 = vpack.c.bf16 %v802_v27, %v801_v26  ;;  %v1183_v31 = vpack.c.bf16 %v804_v30, %v803_v29  ;;  %vm1349_vm6 = vmmov 0   ;;  %v1350_v41 = vmov 0.0  }
  0x5a   :  { %1147 = vmatprep.subr.bf16.mxu0 %v1146_v32  ;;  %1012 = vmatmul.mubr.msk.f32.vlgmr.msra.gmra.mrb[0].mxu1 %vm109_vm0, %v102_v39  ;;  %v1174_v22 = vpack.c.bf16 %v798_v21, %v797_v20  ;;  %v810_v39 = vld [vmem:[#allocation8 + $0x78] sm:$0xff]  ;;  %vm821_vm7 = vcmask 1041409  }
  0x5b   :  { %1014 = vmatprep.mubr.msk.f32.mxu1 %vm109_vm0, %v97_v42  ;;  %1172 = vmatpush3.bf16.msra.mxu1 %v1171_v47 }
  0x5c   :  { %1040 = vmatmul.mubr.msk.f32.vlgmr.msra.gmra.mrb[0].mxu0 %vm109_vm0, %v309_v40  ;;  %1173 = vmatprep.subr.bf16.mxu1 %v1348_v46  ;;  %v1192_v40 = vpack.c.bf16 %v810_v39, %v809_v38 }
  0x5d   :  { %1149 = vmatpush3.bf16.msra.mxu0 %v1146_v32  ;;  %1042 = vmatprep.mubr.msk.f32.mxu0 %vm109_vm0, %v304_v43  ;;  %v805_v32 = vld [vmem:[#allocation8 + $0x50] sm:$0xff] }
  0x5e   :  { %1151 = vmatprep.subr.bf16.mxu0 %v1150_v44  ;;  %1015 = vmatmul.mubr.msk.f32.gmra.mrb[2].mxu1 %vm109_vm0, %v103_v50  ;;  %v1186_v34 = vpack.c.bf16 %v806_v33, %v805_v32 }
  0x5f   :  { %1175 = vmatpush3.bf16.msra.mxu1 %v1174_v22  ;;  %1119 = vmatprep.mubr.msk.f32.mxu1 %vm1349_vm6, %v1350_v41 }
  0x60   :  { %1043 = vmatmul.mubr.msk.f32.gmra.mrb[2].mxu0 %vm109_vm0, %v310_v51  ;;  %1176 = vmatprep.subr.bf16.mxu1 %v1348_v46  ;;  %v766_v51 = vld [vmem:[#allocation7] sm:$0xff] }
  0x61   :  { %1153 = vmatpush3.bf16.msra.mxu0 %v1150_v44  ;;  %1053 = vmatprep.mubr.msk.f32.mxu0 %vm109_vm0, %v418_v52 }
  0x62   :  { %1155 = vmatprep.subr.bf16.mxu0 %v1154_v53 }
  0x63   :  { %1178 = vmatpush3.bf16.msra.mxu1 %v1177_v25 }
  0x64   :  { %1054 = vmatmul.mubr.msk.f32.vlgmr.msra.gmra.mrb[0].mxu0 %vm109_vm0, %v426_v58  ;;  %1179 = vmatprep.subr.bf16.mxu1 %v1348_v46 }
  0x65   :  { %1157 = vmatpush3.bf16.msra.mxu0 %v1154_v53  ;;  %1056 = vmatprep.mubr.msk.f32.mxu0 %vm109_vm0, %v421_v59 }
  0x66   :  { %1159 = vmatprep.subr.bf16.mxu0 %v1158_v60 }
  0x67   :  { %1181 = vmatpush3.bf16.msra.mxu1 %v1180_v28 }
  0x68   :  { %1057 = vmatmul.mubr.msk.f32.gmra.mrb[2].mxu0 %vm109_vm0, %v427_v1  ;;  %1182 = vmatprep.subr.bf16.mxu1 %v1348_v46 }
  0x69   :  { %1161 = vmatpush3.bf16.msra.mxu0 %v1158_v60  ;;  %1067 = vmatprep.mubr.msk.f32.mxu0 %vm109_vm0, %v535_v2 }
  0x6a   :  { %1163 = vmatprep.subr.bf16.mxu0 %v1162_v3 }
  0x6b   :  { %1184 = vmatpush3.bf16.msra.mxu1 %v1183_v31 }
  0x6c   :  { %1068 = vmatmul.mubr.msk.f32.vlgmr.msra.gmra.mrb[0].mxu0 %vm109_vm0, %v543_v9  ;;  %1185 = vmatprep.subr.bf16.mxu1 %v1348_v46 }
  0x6d   :  { %1165 = vmatpush3.bf16.msra.mxu0 %v1162_v3  ;;  %1070 = vmatprep.mubr.msk.f32.mxu0 %vm109_vm0, %v538_v10 }
  0x6e   :  { %1167 = vmatprep.subr.bf16.mxu0 %v1166_v11 }
  0x6f   :  { %1187 = vmatpush3.bf16.msra.mxu1 %v1186_v34 }
  0x70   :  { %1071 = vmatmul.mubr.msk.f32.gmra.mrb[2].mxu0 %vm109_vm0, %v544_v15  ;;  %1188 = vmatprep.subr.bf16.mxu1 %v1348_v46 }
  0x71   :  { %1169 = vmatpush3.bf16.msra.mxu0 %v1166_v11  ;;  %1081 = vmatprep.mubr.msk.f32.mxu0 %vm109_vm0, %v652_v16  ;;  %v936_v11 = vld [vmem:[%s1565_s2] ss:$0 sm:$0xff] }
  0x73   :  { %1190 = vmatpush3.bf16.msra.mxu1 %v1189_v37 }
  0x74   :  { %1082 = vmatmul.mubr.msk.f32.vlgmr.msra.gmra.mrb[0].mxu0 %vm109_vm0, %v660_v5  ;;  %1191 = vmatprep.subr.bf16.mxu1 %v1348_v46 }
  0x75   :  { %1084 = vmatprep.mubr.msk.f32.mxu0 %vm109_vm0, %v655_v13 }
  0x77   :  { %1193 = vmatpush3.bf16.msra.mxu1 %v1192_v40 }
  0x78   :  { %1085 = vmatmul.mubr.msk.f32.gmra.mrb[2].mxu0 %vm109_vm0, %v661_v19 }
 0x12d   :  { %v1013_v42 = vpop.f32.mrb[0].mxu1 }
 0x12e   :  { %v186_v43 = vpop.f32.mrb[1].mxu1 }
 0x131   :  { %v1016_v44 = vpop.f32.mrb[2].mxu1 }
 0x132   :  { %v196_v45 = vpop.f32.mrb[3].mxu1 }
 0x147   :  { %v1083_v47 = vpop.f32.mrb[0].mxu0 }
 0x148   :  { %v1194_v49 = vadd.f32 %v1083_v47, %v1013_v42  ;;  %v743_v50 = vpop.f32.mrb[1].mxu0 }
 0x149   :  { %v1195_v52 = vadd.f32 %v743_v50, %v186_v43 }
 0x14a   :  { %v769_v53 = vadd.f32 %v1194_v49, %v767_v48 }
 0x14b   :  { %v768_v54 = vadd.f32 %v1195_v52, %v766_v51  ;;  %v1086_v55 = vpop.f32.mrb[2].mxu0 }
 0x14c   :  { %v1196_v56 = vadd.f32 %v1086_v55, %v1016_v44  ;;  %v753_v46 = vpop.f32.mrb[3].mxu0 }
 0x14d   :  { %v772_v57 = vmax.f32 %v768_v54, %v769_v53  ;;  %v1197_v58 = vadd.f32 %v753_v46, %v196_v45 }
 0x14e   :  { %v771_v59 = vadd.f32 %v1196_v56, %v767_v48 }
 0x14f   :  { %v773_v60 = vrot.slane %v772_v57, 4  ;;  %v770_v61 = vadd.f32 %v1197_v58, %v766_v51 }
 0x151   :  { %v774_v62 = vmax.f32 %v772_v57, %v773_v60  ;;  %v779_v63 = vmax.f32 %v770_v61, %v771_v59 }
 0x153   :  { %v775_v0 = vrot.slane %v774_v62, 2  ;;  %v780_v1 = vrot.slane %v779_v63, 4 }
 0x155   :  { %v776_v2 = vmax.f32 %v774_v62, %v775_v0  ;;  %v781_v3 = vmax.f32 %v779_v63, %v780_v1 }
 0x157   :  { %v782_v4 = vrot.slane %v781_v3, 2  ;;  %v777_v6 = vrot.slane %v776_v2, 1 }
 0x159   :  { %v783_v7 = vmax.f32 %v781_v3, %v782_v4  ;;  %v778_v9 = vmax.f32 %v776_v2, %v777_v6 }
 0x15b   :  { %v784_v8 = vrot.slane %v783_v7, 1  ;;  %v793_v14 = vadd.f32 %v936_v11, %v778_v9 }
 0x15d   :  { %v785_v10 = vmax.f32 %v783_v7, %v784_v8 }
 0x15f   :  { %v794_v12 = vadd.f32 %v936_v11, %v785_v10 }
 0x161   :  { %v820_v15 = vrot.slane %v794_v12, 7 }
 0x163   :  { %v822_v16 = vsel %vm821_vm7, %v820_v15, %v793_v14 }
 0x164   :  { %1120 = vmatmul.mubr.f32.vlgmr.msra.gmra.mrb[4].mxu1 %v822_v16 }
 0x237   :  { %v890_v18 = vpop.f32.mrb[4].mxu1 }
 0x238   :  { %v891_v5 = vadd.f32 %v937_v17, %v890_v18  ;;  %v1121_v13 = vpop.f32.mrb[5].mxu1 }
 0x23a   :  { %894 = vst [vmem:[#allocation10] sm:$0x3] %v891_v5 }
 0x23b   :  { %1323 = shalt.err (!%p1320_p8)
}
 0x23c   :  { %s1324_s27 = scalar_lea.hbm %s1569_s6, 32 }
 0x23d   :  { %p1325_p9 = scmp.ne.s32.totalorder %s1569_s6, %s1324_s27  ;;  %p1328_p10 = scmp.lt.u32.totalorder %s1324_s27, %s1569_s6 }
 0x23f   :  { %p1330_p11 = pnand %p1328_p10, %p1325_p9 }
 0x241   :  { %1333 = shalt.err (!%p1330_p11)
}
 0x242   :  { %904 = dma.vmem_to_hbm [thread:$0]  %s902_s23, 32, %s1569_s6, [#allocation4]  }
 0x243   :  { %1340 = dma.done.wait [#allocation4], 32  }
 0x244   :  { %1341 = vsyncadd [#allocation4], 4294967264 }
 0x245   :  { %908 = vsyncpa [#allocation3], 1 }
 0x246   :  { %909 = vsyncpa [#allocation6], 1 }
 0x247   :  { %910 = vsyncpa [#allocation9], 1 }
 0x248   :  { %911 = vsyncpa [#allocation4], 1 }

</bundles_post_ra>
